<compile_context>
chip_gen: v6e
topology: v6e:2x2x1
jax: 0.10.0
libtpu: 0.0.40
codegen_flags: <defaults>
</compile_context>

<pallas_src>
import jax
import jax.numpy as jnp
from jax.experimental import pallas as pl
from jax.experimental.pallas import tpu as pltpu

HIDDEN = 4000        # fixed by Arch4.__init__ (fc1 -> 4000, fc2 -> 1)
MAX_D_TILE = 1024    # bf16 w1 block <= 1024*4096*2B ~ 8 MB -> ~16 MB double-buffered


def _pick_d_tile(D):
    """Largest multiple of 128 dividing D that is <= MAX_D_TILE; else the full D."""
    if D <= MAX_D_TILE:
        return D
    for t in range(MAX_D_TILE, 0, -128):
        if D % t == 0:
            return t
    return D  # fallback single block (real Arch4 D=16384 -> 1024)


def _arch4_kernel(x_ref, w1_ref, b1_ref, w2_ref, b2_ref, o_ref, acc_ref):
    k = pl.program_id(0)

    @pl.when(k == 0)
    def _init():
        acc_ref[...] = jnp.zeros_like(acc_ref)

    # fc1 partial: [B, Dt] @ [Dt, H], accumulated in f32 VMEM scratch.
    # Weights may be stored bf16: cast the streamed tile (exact) so the math
    # is bit-compatible with an f32 reference while HBM traffic stays halved.
    acc_ref[...] += jnp.dot(
        x_ref[...].astype(jnp.float32),
        w1_ref[...].astype(jnp.float32),
        preferred_element_type=jnp.float32,
    )

    @pl.when(k == pl.num_programs(0) - 1)
    def _finalize():
        h = acc_ref[...] + b1_ref[...].astype(jnp.float32)                 # [B, H]
        # fc2 (single output neuron): VPU multiply + cross-lane reduce
        # instead of an N=1 MXU matmul.
        y = jnp.sum(h * w2_ref[...].astype(jnp.float32), axis=-1, keepdims=True)
        y = y + b2_ref[...].astype(jnp.float32)                            # [B, 1]
        o_ref[...] = jnp.abs(y).astype(o_ref.dtype)                        # torch.abs


def arch4_forward(x, w1, b1, w2, b2):
    """x: [B, C, H, W] (NCHW, as in PyTorch). w1:[D,4000], w2:[4000] or [4000,1].
    Returns [B, 1] float32."""
    B = x.shape[0]
    D = int(x.size // B)
    x2d = x.reshape(B, D).astype(jnp.float32)   # glue: flatten like x.view(-1, D)

    b1_2d = b1.reshape(1, HIDDEN)
    w2_row = w2.reshape(1, HIDDEN)              # row layout for the VPU reduction
    b2_2d = b2.reshape(1, 1)

    d_tile = _pick_d_tile(D)
    grid = (D // d_tile,)

    return pl.pallas_call(
        _arch4_kernel,
        out_shape=jax.ShapeDtypeStruct((B, 1), jnp.float32),
        grid_spec=pltpu.PrefetchScalarGridSpec(
            num_scalar_prefetch=0,
            grid=grid,
            in_specs=[
                pl.BlockSpec((B, d_tile), lambda k: (0, k)),        # x   (stream over D)
                pl.BlockSpec((d_tile, HIDDEN), lambda k: (k, 0)),   # w1  (stream over D)
                pl.BlockSpec((1, HIDDEN), lambda k: (0, 0)),        # b1  (resident)
                pl.BlockSpec((1, HIDDEN), lambda k: (0, 0)),        # w2 row (resident)
                pl.BlockSpec((1, 1), lambda k: (0, 0)),             # b2
            ],
            out_specs=pl.BlockSpec((B, 1), lambda k: (0, 0)),       # written at last step
            scratch_shapes=[pltpu.VMEM((B, HIDDEN), jnp.float32)],  # fc1 accumulator
        ),
        compiler_params=pltpu.CompilerParams(
            dimension_semantics=("arbitrary",),   # D is a reduction axis
            vmem_limit_bytes=48 << 20,            # headroom within v7x's 64 MiB VMEM
        ),
    )(x2d, w1, b1_2d, w2_row, b2_2d)


def init_params(key, input_size):
    """Deterministic PyTorch-style Linear init: U(-1/sqrt(fan_in), 1/sqrt(fan_in)).
    Weights stored pre-transposed ([in, out]) and in bf16 (halves HBM streaming);
    biases kept in f32."""
    k1, k2, k3, k4 = jax.random.split(key, 4)
    lim1 = 1.0 / jnp.sqrt(jnp.float32(input_size))
    lim2 = 1.0 / jnp.sqrt(jnp.float32(HIDDEN))
    w1 = jax.random.uniform(k1, (input_size, HIDDEN), jnp.float32, -lim1, lim1
                            ).astype(jnp.bfloat16)
    b1 = jax.random.uniform(k2, (HIDDEN,), jnp.float32, -lim1, lim1)
    w2 = jax.random.uniform(k3, (HIDDEN,), jnp.float32, -lim2, lim2
                            ).astype(jnp.bfloat16)
    b2 = jax.random.uniform(k4, (1,), jnp.float32, -lim2, lim2)
    return w1, b1, w2, b2


if __name__ == "__main__":
    key = jax.random.PRNGKey(0)
    kx, kp = jax.random.split(key)

    # Small shapes consistent with the module: "(1x128x128)" scaled down to 1x16x16.
    B, C, H, W = 2, 1, 16, 16
    input_size = C * H * W  # = 256
    x = jax.random.normal(kx, (B, C, H, W), jnp.float32)

    w1, b1, w2, b2 = init_params(kp, input_size)

    out = jax.block_until_ready(arch4_forward(x, w1, b1, w2, b2))

    # Reference check in plain JAX (same params, bf16 weights upcast exactly).
    x2d = x.reshape(B, -1)
    w1f = w1.astype(jnp.float32)
    w2f = w2.astype(jnp.float32).reshape(HIDDEN, 1)
    ref = jnp.abs((x2d @ w1f + b1) @ w2f + b2.reshape(1, 1))

    assert out.shape == (B, 1)
    assert jnp.allclose(out, ref, atol=1e-3, rtol=1e-3)

    print("KERNEL_OK")
</pallas_src>

<mosaic_0001>
module attributes {stable_mosaic.version = 11 : i64} {
  func.func @_arch4_kernel(%arg0: i32, %arg1: memref<2x256xf32, #tpu.memory_space<vmem>>, %arg2: memref<256x4000xbf16, #tpu.memory_space<vmem>>, %arg3: memref<1x4000xf32, #tpu.memory_space<vmem>>, %arg4: memref<1x4000xbf16, #tpu.memory_space<vmem>>, %arg5: memref<1x1xf32, #tpu.memory_space<vmem>>, %arg6: memref<2x1xf32, #tpu.memory_space<vmem>>, %arg7: memref<2x4000xf32, #tpu.memory_space<vmem>>) attributes {dimension_semantics = [#tpu.dimension_semantics<arbitrary>], iteration_bounds = array<i64: 1>, scalar_prefetch = 0 : i64, scratch_operands = 1 : i64, tpu.core_type = #tpu.core_type<tc>, window_params = [{transform_indices = @transform_0, window_bounds = array<i64: 2, 256>}, {transform_indices = @transform_1, window_bounds = array<i64: 256, 4000>}, {pipeline_mode = #tpu.pipeline_mode<synchronous>, transform_indices = @transform_2, window_bounds = array<i64: 1, 4000>}, {pipeline_mode = #tpu.pipeline_mode<synchronous>, transform_indices = @transform_3, window_bounds = array<i64: 1, 4000>}, {pipeline_mode = #tpu.pipeline_mode<synchronous>, transform_indices = @transform_4, window_bounds = array<i64: 1, 1>}, {pipeline_mode = #tpu.pipeline_mode<synchronous>, transform_indices = @transform_5, window_bounds = array<i64: 2, 1>}]} {
    %c0_i32 = arith.constant 0 : i32
    %0 = arith.cmpi eq, %arg0, %c0_i32 : i32
    %1 = arith.extui %0 : i1 to i32
    %c0_i32_0 = arith.constant 0 : i32
    %2 = arith.cmpi ne, %1, %c0_i32_0 : i32
    scf.if %2 {
      %cst_10 = arith.constant 0.000000e+00 : f32
      %13 = vector.broadcast %cst_10 : f32 to vector<2x4000xf32>
      %c0_11 = arith.constant 0 : index
      %c0_12 = arith.constant 0 : index
      %14 = vector.load %arg7[%c0_11, %c0_12] : memref<2x4000xf32, #tpu.memory_space<vmem>>, vector<2x4000xf32>
      tpu.vector_store %arg7[%c0_11, %c0_12], %13 {strides = array<i32>} : memref<2x4000xf32, #tpu.memory_space<vmem>>, vector<2x4000xf32>,
    } else {
    }
    %c0 = arith.constant 0 : index
    %c0_1 = arith.constant 0 : index
    %3 = vector.load %arg7[%c0, %c0_1] : memref<2x4000xf32, #tpu.memory_space<vmem>>, vector<2x4000xf32>
    %c0_2 = arith.constant 0 : index
    %c0_3 = arith.constant 0 : index
    %4 = vector.load %arg1[%c0_2, %c0_3] : memref<2x256xf32, #tpu.memory_space<vmem>>, vector<2x256xf32>
    %c0_4 = arith.constant 0 : index
    %c0_5 = arith.constant 0 : index
    %5 = vector.load %arg2[%c0_4, %c0_5] : memref<256x4000xbf16, #tpu.memory_space<vmem>>, vector<256x4000xbf16>
    %6 = arith.extf %5 : vector<256x4000xbf16> to vector<256x4000xf32>
    %cst = arith.constant dense<0.000000e+00> : vector<2x4000xf32>
    %7 = tpu.matmul %4, %6, %cst {dimension_numbers = #tpu.dot_dimension_numbers<[1], [0], [0], [1], [0, 0, 1, 1], [], []>} : vector<2x256xf32>, vector<256x4000xf32>, vector<2x4000xf32> -> vector<2x4000xf32>
    %8 = arith.addf %3, %7 : vector<2x4000xf32>
    %c0_6 = arith.constant 0 : index
    %c0_7 = arith.constant 0 : index
    %9 = vector.load %arg7[%c0_6, %c0_7] : memref<2x4000xf32, #tpu.memory_space<vmem>>, vector<2x4000xf32>
    tpu.vector_store %arg7[%c0_6, %c0_7], %8 {strides = array<i32>} : memref<2x4000xf32, #tpu.memory_space<vmem>>, vector<2x4000xf32>,
    %c0_i32_8 = arith.constant 0 : i32
    %10 = arith.cmpi eq, %arg0, %c0_i32_8 : i32
    %11 = arith.extui %10 : i1 to i32
    %c0_i32_9 = arith.constant 0 : i32
    %12 = arith.cmpi ne, %11, %c0_i32_9 : i32
    scf.if %12 {
      %c0_10 = arith.constant 0 : index
      %c0_11 = arith.constant 0 : index
      %13 = vector.load %arg7[%c0_10, %c0_11] : memref<2x4000xf32, #tpu.memory_space<vmem>>, vector<2x4000xf32>
      %c0_12 = arith.constant 0 : index
      %c0_13 = arith.constant 0 : index
      %14 = vector.load %arg3[%c0_12, %c0_13] : memref<1x4000xf32, #tpu.memory_space<vmem>>, vector<1x4000xf32>
      %15 = vector.broadcast %14 : vector<1x4000xf32> to vector<2x4000xf32>
      %16 = arith.addf %13, %15 : vector<2x4000xf32>
      %c0_14 = arith.constant 0 : index
      %c0_15 = arith.constant 0 : index
      %17 = vector.load %arg4[%c0_14, %c0_15] : memref<1x4000xbf16, #tpu.memory_space<vmem>>, vector<1x4000xbf16>
      %18 = arith.extf %17 : vector<1x4000xbf16> to vector<1x4000xf32>
      %19 = vector.broadcast %18 : vector<1x4000xf32> to vector<2x4000xf32>
      %20 = arith.mulf %16, %19 : vector<2x4000xf32>
      %cst_16 = arith.constant dense<0.000000e+00> : vector<2xf32>
      %21 = vector.multi_reduction <add>, %20, %cst_16 [1] : vector<2x4000xf32> to vector<2xf32>
      %22 = vector.shape_cast %21 : vector<2xf32> to vector<2x1xf32>
      %c0_17 = arith.constant 0 : index
      %c0_18 = arith.constant 0 : index
      %23 = vector.load %arg5[%c0_17, %c0_18] : memref<1x1xf32, #tpu.memory_space<vmem>>, vector<1x1xf32>
      %24 = vector.broadcast %23 : vector<1x1xf32> to vector<2x1xf32>
      %25 = arith.addf %22, %24 : vector<2x1xf32>
      %26 = math.absf %25 : vector<2x1xf32>
      %c0_19 = arith.constant 0 : index
      %c0_20 = arith.constant 0 : index
      %27 = vector.load %arg6[%c0_19, %c0_20] : memref<2x1xf32, #tpu.memory_space<vmem>>, vector<2x1xf32>
      tpu.vector_store %arg6[%c0_19, %c0_20], %26 {strides = array<i32>} : memref<2x1xf32, #tpu.memory_space<vmem>>, vector<2x1xf32>,
    } else {
    }
    return
  }
  func.func @transform_0(%arg0: i32) -> (i32, i32) {
    %c0_i32 = arith.constant 0 : i32
    %c0_i32_0 = arith.constant 0 : i32
    return %c0_i32, %arg0 : i32, i32
  }
  func.func @transform_1(%arg0: i32) -> (i32, i32) {
    %c0_i32 = arith.constant 0 : i32
    %c0_i32_0 = arith.constant 0 : i32
    return %arg0, %c0_i32 : i32, i32
  }
  func.func @transform_2(%arg0: i32) -> (i32, i32) {
    %c0_i32 = arith.constant 0 : i32
    %c0_i32_0 = arith.constant 0 : i32
    %c0_i32_1 = arith.constant 0 : i32
    return %c0_i32, %c0_i32_0 : i32, i32
  }
  func.func @transform_3(%arg0: i32) -> (i32, i32) {
    %c0_i32 = arith.constant 0 : i32
    %c0_i32_0 = arith.constant 0 : i32
    %c0_i32_1 = arith.constant 0 : i32
    return %c0_i32, %c0_i32_0 : i32, i32
  }
  func.func @transform_4(%arg0: i32) -> (i32, i32) {
    %c0_i32 = arith.constant 0 : i32
    %c0_i32_0 = arith.constant 0 : i32
    %c0_i32_1 = arith.constant 0 : i32
    return %c0_i32, %c0_i32_0 : i32, i32
  }
  func.func @transform_5(%arg0: i32) -> (i32, i32) {
    %c0_i32 = arith.constant 0 : i32
    %c0_i32_0 = arith.constant 0 : i32
    %c0_i32_1 = arith.constant 0 : i32
    return %c0_i32, %c0_i32_0 : i32, i32
  }
}

</mosaic_0001>

<bundles_post_ra>
// kernel: tpu_custom_call.1
= control target key start
LH: loop header
LB: loop body
LE: loop exit
PB: predicated region body
PF: predicated region fallthrough
CT: control target
= control target key end

     0   :  { %vm33_vm0 = vcmask 1041408   ;;  %vm34_vm1 = vcmask 1043458   ;;  %vm36_vm3 = vcmask 1045508   ;;  %vm38_vm5 = vcmask 261126   ;;  %s5975_s1 = inlined_call_operand.vmem [shape: bf16[256,4000], index: 1, kind: input, shape index: {}]   ;;  %s5976_s0 = inlined_call_operand.vmem [shape: f32[2,256], index: 0, kind: input, shape index: {}]   ;;  %s5977_s3 = inlined_call_operand.vmem [shape: bf16[1,4000], index: 3, kind: input, shape index: {}]   ;;  %s5978_s2 = inlined_call_operand.vmem [shape: f32[1,4000], index: 2, kind: input, shape index: {}]   ;;  %s5979_s4 = inlined_call_operand.<no memory space> [shape: f32[1,1], index: 4, kind: input, shape index: {}]   ;;  %s5980_s5 = inlined_call_operand.vmem [shape: f32[2,1], index: 5, kind: output, shape index: {}]  }
   0x1   :  { %v290_v0 = vld [vmem:[%s5975_s1 + $0x780] sm:$0xff]  ;;  %v291_v1 = vld [vmem:[%s5975_s1 + $0x788] sm:$0xff]  ;;  %vm35_vm2 = vmor %vm34_vm1, %vm33_vm0  ;;  %vm3960_vm7 = vcmask 254976   ;;  %vm3974_vm8 = vcmask 1024  }
   0x2   :  { %v274_v2 = vld [vmem:[%s5975_s1 + $0x700] sm:$0xff]  ;;  %v1043_v3 = vunpack.c.h.bf16 %v290_v0  ;;  %v1045_v4 = vunpack.c.h.bf16 %v291_v1  ;;  %v1042_v5 = vunpack.c.l.bf16 %v290_v0  ;;  %v1044_v6 = vunpack.c.l.bf16 %v291_v1  ;;  %v275_v7 = vld [vmem:[%s5975_s1 + $0x708] sm:$0xff]  ;;  %vm37_vm4 = vmor %vm36_vm3, %vm35_vm2 }
   0x3   :  { %v258_v8 = vld [vmem:[%s5975_s1 + $0x680] sm:$0xff]  ;;  %v259_v9 = vld [vmem:[%s5975_s1 + $0x688] sm:$0xff]  ;;  %v1011_v10 = vunpack.c.h.bf16 %v274_v2  ;;  %v1013_v11 = vunpack.c.h.bf16 %v275_v7  ;;  %v1010_v12 = vunpack.c.l.bf16 %v274_v2  ;;  %v1012_v13 = vunpack.c.l.bf16 %v275_v7  ;;  %vm5888_vm6 = vmor %vm38_vm5, %vm37_vm4 }
   0x4   :  { %v242_v14 = vld [vmem:[%s5975_s1 + $0x600] sm:$0xff]  ;;  %v243_v15 = vld [vmem:[%s5975_s1 + $0x608] sm:$0xff]  ;;  %1597 = vmatprep.subr.mxu0 %v1043_v3  ;;  %1668 = vmatprep.subr.mxu1 %v1045_v4  ;;  %v979_v16 = vunpack.c.h.bf16 %v258_v8  ;;  %v981_v17 = vunpack.c.h.bf16 %v259_v9  ;;  %v978_v18 = vunpack.c.l.bf16 %v258_v8  ;;  %v980_v19 = vunpack.c.l.bf16 %v259_v9 }
   0x5   :  { %1598 = vmatpush1.msra.mxu0 %v1042_v5  ;;  %1669 = vmatpush1.msra.mxu1 %v1044_v6  ;;  %v226_v20 = vld [vmem:[%s5975_s1 + $0x580] sm:$0xff]  ;;  %v227_v21 = vld [vmem:[%s5975_s1 + $0x588] sm:$0xff]  ;;  %v947_v22 = vunpack.c.h.bf16 %v242_v14  ;;  %v949_v23 = vunpack.c.h.bf16 %v243_v15  ;;  %v946_v24 = vunpack.c.l.bf16 %v242_v14  ;;  %v948_v25 = vunpack.c.l.bf16 %v243_v15 }
   0x6   :  { %1599 = vmatprep.subr.mxu0 %v1011_v10  ;;  %1670 = vmatprep.subr.mxu1 %v1013_v11  ;;  %v210_v26 = vld [vmem:[%s5975_s1 + $0x500] sm:$0xff]  ;;  %v211_v27 = vld [vmem:[%s5975_s1 + $0x508] sm:$0xff]  ;;  %v915_v28 = vunpack.c.h.bf16 %v226_v20  ;;  %v917_v29 = vunpack.c.h.bf16 %v227_v21  ;;  %v914_v30 = vunpack.c.l.bf16 %v226_v20  ;;  %v916_v31 = vunpack.c.l.bf16 %v227_v21 }
   0x7   :  { %1600 = vmatpush1.msra.mxu0 %v1010_v12  ;;  %1671 = vmatpush1.msra.mxu1 %v1012_v13  ;;  %v194_v32 = vld [vmem:[%s5975_s1 + $0x480] sm:$0xff]  ;;  %v195_v33 = vld [vmem:[%s5975_s1 + $0x488] sm:$0xff]  ;;  %v883_v34 = vunpack.c.h.bf16 %v210_v26  ;;  %v885_v35 = vunpack.c.h.bf16 %v211_v27  ;;  %v882_v36 = vunpack.c.l.bf16 %v210_v26  ;;  %v884_v37 = vunpack.c.l.bf16 %v211_v27 }
   0x8   :  { %1601 = vmatprep.subr.mxu0 %v979_v16  ;;  %1672 = vmatprep.subr.mxu1 %v981_v17  ;;  %v178_v38 = vld [vmem:[%s5975_s1 + $0x400] sm:$0xff]  ;;  %v179_v39 = vld [vmem:[%s5975_s1 + $0x408] sm:$0xff]  ;;  %v851_v40 = vunpack.c.h.bf16 %v194_v32  ;;  %v853_v41 = vunpack.c.h.bf16 %v195_v33  ;;  %v850_v42 = vunpack.c.l.bf16 %v194_v32  ;;  %v852_v43 = vunpack.c.l.bf16 %v195_v33 }
   0x9   :  { %1602 = vmatpush1.msra.mxu0 %v978_v18  ;;  %1673 = vmatpush1.msra.mxu1 %v980_v19  ;;  %v162_v44 = vld [vmem:[%s5975_s1 + $0x380] sm:$0xff]  ;;  %v163_v45 = vld [vmem:[%s5975_s1 + $0x388] sm:$0xff]  ;;  %v819_v46 = vunpack.c.h.bf16 %v178_v38  ;;  %v821_v47 = vunpack.c.h.bf16 %v179_v39  ;;  %v818_v48 = vunpack.c.l.bf16 %v178_v38  ;;  %v820_v49 = vunpack.c.l.bf16 %v179_v39 }
   0xa   :  { %1603 = vmatprep.subr.mxu0 %v947_v22  ;;  %1674 = vmatprep.subr.mxu1 %v949_v23  ;;  %v146_v50 = vld [vmem:[%s5975_s1 + $0x300] sm:$0xff]  ;;  %v147_v51 = vld [vmem:[%s5975_s1 + $0x308] sm:$0xff]  ;;  %v787_v52 = vunpack.c.h.bf16 %v162_v44  ;;  %v789_v53 = vunpack.c.h.bf16 %v163_v45  ;;  %v786_v54 = vunpack.c.l.bf16 %v162_v44  ;;  %v788_v55 = vunpack.c.l.bf16 %v163_v45 }
   0xb   :  { %1604 = vmatpush1.msra.mxu0 %v946_v24  ;;  %1675 = vmatpush1.msra.mxu1 %v948_v25  ;;  %v130_v56 = vld [vmem:[%s5975_s1 + $0x280] sm:$0xff]  ;;  %v131_v57 = vld [vmem:[%s5975_s1 + $0x288] sm:$0xff]  ;;  %v755_v58 = vunpack.c.h.bf16 %v146_v50  ;;  %v757_v59 = vunpack.c.h.bf16 %v147_v51  ;;  %v754_v60 = vunpack.c.l.bf16 %v146_v50  ;;  %v756_v61 = vunpack.c.l.bf16 %v147_v51 }
   0xc   :  { %1605 = vmatprep.subr.mxu0 %v915_v28  ;;  %1676 = vmatprep.subr.mxu1 %v917_v29  ;;  %v114_v62 = vld [vmem:[%s5975_s1 + $0x200] sm:$0xff]  ;;  %v115_v63 = vld [vmem:[%s5975_s1 + $0x208] sm:$0xff]  ;;  %v723_v0 = vunpack.c.h.bf16 %v130_v56  ;;  %v725_v1 = vunpack.c.h.bf16 %v131_v57  ;;  %v722_v2 = vunpack.c.l.bf16 %v130_v56  ;;  %v724_v3 = vunpack.c.l.bf16 %v131_v57 }
   0xd   :  { %1606 = vmatpush1.msra.mxu0 %v914_v30  ;;  %1677 = vmatpush1.msra.mxu1 %v916_v31  ;;  %v98_v4 = vld [vmem:[%s5975_s1 + $0x180] sm:$0xff]  ;;  %v99_v5 = vld [vmem:[%s5975_s1 + $0x188] sm:$0xff]  ;;  %v691_v6 = vunpack.c.h.bf16 %v114_v62  ;;  %v693_v7 = vunpack.c.h.bf16 %v115_v63  ;;  %v690_v8 = vunpack.c.l.bf16 %v114_v62  ;;  %v692_v9 = vunpack.c.l.bf16 %v115_v63 }
   0xe   :  { %1607 = vmatprep.subr.mxu0 %v883_v34  ;;  %1678 = vmatprep.subr.mxu1 %v885_v35  ;;  %v82_v10 = vld [vmem:[%s5975_s1 + $0x100] sm:$0xff]  ;;  %v83_v11 = vld [vmem:[%s5975_s1 + $0x108] sm:$0xff]  ;;  %v659_v12 = vunpack.c.h.bf16 %v98_v4  ;;  %v661_v13 = vunpack.c.h.bf16 %v99_v5  ;;  %v658_v14 = vunpack.c.l.bf16 %v98_v4  ;;  %v660_v15 = vunpack.c.l.bf16 %v99_v5 }
   0xf   :  { %1608 = vmatpush1.msra.mxu0 %v882_v36  ;;  %1679 = vmatpush1.msra.mxu1 %v884_v37  ;;  %v66_v16 = vld [vmem:[%s5975_s1 + $0x80] sm:$0xff]  ;;  %v67_v17 = vld [vmem:[%s5975_s1 + $0x88] sm:$0xff]  ;;  %v627_v18 = vunpack.c.h.bf16 %v82_v10  ;;  %v629_v19 = vunpack.c.h.bf16 %v83_v11  ;;  %v626_v20 = vunpack.c.l.bf16 %v82_v10  ;;  %v628_v21 = vunpack.c.l.bf16 %v83_v11 }
  0x10   :  { %1609 = vmatprep.subr.mxu0 %v851_v40  ;;  %1680 = vmatprep.subr.mxu1 %v853_v41  ;;  %v50_v22 = vld [vmem:[%s5975_s1] sm:$0xff]  ;;  %v51_v23 = vld [vmem:[%s5975_s1 + $0x8] sm:$0xff]  ;;  %v595_v24 = vunpack.c.h.bf16 %v66_v16  ;;  %v597_v25 = vunpack.c.h.bf16 %v67_v17  ;;  %v594_v26 = vunpack.c.l.bf16 %v66_v16  ;;  %v596_v27 = vunpack.c.l.bf16 %v67_v17 }
  0x11   :  { %1610 = vmatpush1.msra.mxu0 %v850_v42  ;;  %1681 = vmatpush1.msra.mxu1 %v852_v43  ;;  %v546_v28 = vld [vmem:[%s5975_s1 + $0xf80] sm:$0xff]  ;;  %v547_v29 = vld [vmem:[%s5975_s1 + $0xf88] sm:$0xff]  ;;  %v563_v30 = vunpack.c.h.bf16 %v50_v22  ;;  %v565_v31 = vunpack.c.h.bf16 %v51_v23  ;;  %v562_v32 = vunpack.c.l.bf16 %v50_v22  ;;  %v564_v33 = vunpack.c.l.bf16 %v51_v23 }
  0x12   :  { %1611 = vmatprep.subr.mxu0 %v819_v46  ;;  %1682 = vmatprep.subr.mxu1 %v821_v47  ;;  %v530_v34 = vld [vmem:[%s5975_s1 + $0xf00] sm:$0xff]  ;;  %v531_v35 = vld [vmem:[%s5975_s1 + $0xf08] sm:$0xff]  ;;  %v1555_v36 = vunpack.c.h.bf16 %v546_v28  ;;  %v1557_v37 = vunpack.c.h.bf16 %v547_v29  ;;  %v1554_v38 = vunpack.c.l.bf16 %v546_v28  ;;  %v1556_v39 = vunpack.c.l.bf16 %v547_v29 }
  0x13   :  { %1612 = vmatpush1.msra.mxu0 %v818_v48  ;;  %1683 = vmatpush1.msra.mxu1 %v820_v49  ;;  %v514_v40 = vld [vmem:[%s5975_s1 + $0xe80] sm:$0xff]  ;;  %v515_v41 = vld [vmem:[%s5975_s1 + $0xe88] sm:$0xff]  ;;  %v1523_v42 = vunpack.c.h.bf16 %v530_v34  ;;  %v1525_v43 = vunpack.c.h.bf16 %v531_v35  ;;  %v1522_v44 = vunpack.c.l.bf16 %v530_v34  ;;  %v1524_v45 = vunpack.c.l.bf16 %v531_v35 }
  0x14   :  { %1613 = vmatprep.subr.mxu0 %v787_v52  ;;  %1684 = vmatprep.subr.mxu1 %v789_v53  ;;  %v498_v46 = vld [vmem:[%s5975_s1 + $0xe00] sm:$0xff]  ;;  %v499_v47 = vld [vmem:[%s5975_s1 + $0xe08] sm:$0xff]  ;;  %v1491_v48 = vunpack.c.h.bf16 %v514_v40  ;;  %v1493_v49 = vunpack.c.h.bf16 %v515_v41  ;;  %v1490_v50 = vunpack.c.l.bf16 %v514_v40  ;;  %v1492_v51 = vunpack.c.l.bf16 %v515_v41 }
  0x15   :  { %1614 = vmatpush1.msra.mxu0 %v786_v54  ;;  %1685 = vmatpush1.msra.mxu1 %v788_v55  ;;  %v482_v52 = vld [vmem:[%s5975_s1 + $0xd80] sm:$0xff]  ;;  %v483_v53 = vld [vmem:[%s5975_s1 + $0xd88] sm:$0xff]  ;;  %v1459_v54 = vunpack.c.h.bf16 %v498_v46  ;;  %v1461_v55 = vunpack.c.h.bf16 %v499_v47  ;;  %v1458_v56 = vunpack.c.l.bf16 %v498_v46  ;;  %v1460_v57 = vunpack.c.l.bf16 %v499_v47 }
  0x16   :  { %1615 = vmatprep.subr.mxu0 %v755_v58  ;;  %1686 = vmatprep.subr.mxu1 %v757_v59  ;;  %v466_v58 = vld [vmem:[%s5975_s1 + $0xd00] sm:$0xff]  ;;  %v467_v59 = vld [vmem:[%s5975_s1 + $0xd08] sm:$0xff]  ;;  %v1426_v62 = vunpack.c.l.bf16 %v482_v52  ;;  %v1428_v63 = vunpack.c.l.bf16 %v483_v53 }
  0x17   :  { %1616 = vmatpush1.msra.mxu0 %v754_v60  ;;  %1687 = vmatpush1.msra.mxu1 %v756_v61  ;;  %v1427_v60 = vunpack.c.h.bf16 %v482_v52  ;;  %v1429_v61 = vunpack.c.h.bf16 %v483_v53  ;;  %v1394_v4 = vunpack.c.l.bf16 %v466_v58  ;;  %v1396_v5 = vunpack.c.l.bf16 %v467_v59 }
  0x18   :  { %1617 = vmatprep.subr.mxu0 %v723_v0  ;;  %1688 = vmatprep.subr.mxu1 %v725_v1  ;;  %v450_v0 = vld [vmem:[%s5975_s1 + $0xc80] sm:$0xff]  ;;  %v451_v1 = vld [vmem:[%s5975_s1 + $0xc88] sm:$0xff] }
  0x19   :  { %1618 = vmatpush1.msra.mxu0 %v722_v2  ;;  %1689 = vmatpush1.msra.mxu1 %v724_v3  ;;  %v1395_v2 = vunpack.c.h.bf16 %v466_v58  ;;  %v1397_v3 = vunpack.c.h.bf16 %v467_v59  ;;  %v1362_v10 = vunpack.c.l.bf16 %v450_v0  ;;  %v1364_v11 = vunpack.c.l.bf16 %v451_v1  ;;  %v4214_v58 = vld.sshfl [vmem:[%s5976_s0] sm:$0x33 pattern:$0x76325410] }
  0x1a   :  { %1619 = vmatprep.subr.mxu0 %v691_v6  ;;  %1690 = vmatprep.subr.mxu1 %v693_v7  ;;  %v434_v6 = vld [vmem:[%s5975_s1 + $0xc00] sm:$0xff]  ;;  %v435_v7 = vld [vmem:[%s5975_s1 + $0xc08] sm:$0xff] }
  0x1b   :  { %1620 = vmatpush1.msra.mxu0 %v690_v8  ;;  %1691 = vmatpush1.msra.mxu1 %v692_v9  ;;  %v1363_v8 = vunpack.c.h.bf16 %v450_v0  ;;  %v1365_v9 = vunpack.c.h.bf16 %v451_v1  ;;  %v1330_v16 = vunpack.c.l.bf16 %v434_v6  ;;  %v1332_v17 = vunpack.c.l.bf16 %v435_v7  ;;  %v292_v1 = vld [vmem:[%s5975_s1 + $0x790] sm:$0xff] }
  0x1c   :  { %1621 = vmatprep.subr.mxu0 %v659_v12  ;;  %1692 = vmatprep.subr.mxu1 %v661_v13  ;;  %v418_v12 = vld [vmem:[%s5975_s1 + $0xb80] sm:$0xff]  ;;  %v419_v13 = vld [vmem:[%s5975_s1 + $0xb88] sm:$0xff]  ;;  %v4218_v0 = vcombine.high %v4214_v58, %v4214_v58 }
  0x1d   :  { %1622 = vmatpush1.msra.mxu0 %v658_v14  ;;  %1693 = vmatpush1.msra.mxu1 %v660_v15  ;;  %v1331_v14 = vunpack.c.h.bf16 %v434_v6  ;;  %v1333_v15 = vunpack.c.h.bf16 %v435_v7  ;;  %v1298_v22 = vunpack.c.l.bf16 %v418_v12  ;;  %v1300_v23 = vunpack.c.l.bf16 %v419_v13 }
  0x1e   :  { %1623 = vmatprep.subr.mxu0 %v627_v18  ;;  %1694 = vmatprep.subr.mxu1 %v629_v19  ;;  %v402_v18 = vld [vmem:[%s5975_s1 + $0xb00] sm:$0xff]  ;;  %v403_v19 = vld [vmem:[%s5975_s1 + $0xb08] sm:$0xff]  ;;  %v1047_v6 = vunpack.c.h.bf16 %v292_v1 }
  0x1f   :  { %1624 = vmatpush1.msra.mxu0 %v626_v20  ;;  %1695 = vmatpush1.msra.mxu1 %v628_v21  ;;  %v1299_v20 = vunpack.c.h.bf16 %v418_v12  ;;  %v1301_v21 = vunpack.c.h.bf16 %v419_v13  ;;  %v1266_v28 = vunpack.c.l.bf16 %v402_v18  ;;  %v1268_v29 = vunpack.c.l.bf16 %v403_v19 }
  0x20   :  { %1625 = vmatprep.subr.mxu0 %v595_v24  ;;  %1696 = vmatprep.subr.mxu1 %v597_v25  ;;  %v386_v24 = vld [vmem:[%s5975_s1 + $0xa80] sm:$0xff]  ;;  %v387_v25 = vld [vmem:[%s5975_s1 + $0xa88] sm:$0xff] }
  0x21   :  { %1626 = vmatpush1.msra.mxu0 %v594_v26  ;;  %1697 = vmatpush1.msra.mxu1 %v596_v27  ;;  %v1267_v26 = vunpack.c.h.bf16 %v402_v18  ;;  %v1269_v27 = vunpack.c.h.bf16 %v403_v19  ;;  %v1234_v34 = vunpack.c.l.bf16 %v386_v24  ;;  %v1236_v35 = vunpack.c.l.bf16 %v387_v25 }
  0x22   :  { %1627 = vmatprep.subr.mxu0 %v563_v30  ;;  %1698 = vmatprep.subr.mxu1 %v565_v31  ;;  %v370_v30 = vld [vmem:[%s5975_s1 + $0xa00] sm:$0xff]  ;;  %v371_v31 = vld [vmem:[%s5975_s1 + $0xa08] sm:$0xff] }
  0x23   :  { %1628 = vmatpush1.msra.mxu0 %v562_v32  ;;  %1699 = vmatpush1.msra.mxu1 %v564_v33  ;;  %v1235_v32 = vunpack.c.h.bf16 %v386_v24  ;;  %v1237_v33 = vunpack.c.h.bf16 %v387_v25  ;;  %v1202_v40 = vunpack.c.l.bf16 %v370_v30  ;;  %v1204_v41 = vunpack.c.l.bf16 %v371_v31 }
  0x24   :  { %1629 = vmatprep.subr.mxu0 %v1555_v36  ;;  %1700 = vmatprep.subr.mxu1 %v1557_v37  ;;  %v354_v36 = vld [vmem:[%s5975_s1 + $0x980] sm:$0xff]  ;;  %v355_v37 = vld [vmem:[%s5975_s1 + $0x988] sm:$0xff] }
  0x25   :  { %1630 = vmatpush2.msra.mxu0 %v1554_v38  ;;  %1701 = vmatpush2.msra.mxu1 %v1556_v39  ;;  %v1203_v38 = vunpack.c.h.bf16 %v370_v30  ;;  %v1205_v39 = vunpack.c.h.bf16 %v371_v31  ;;  %v1170_v46 = vunpack.c.l.bf16 %v354_v36  ;;  %v1172_v47 = vunpack.c.l.bf16 %v355_v37 }
  0x26   :  { %1631 = vmatprep.subr.mxu0 %v1523_v42  ;;  %1702 = vmatprep.subr.mxu1 %v1525_v43  ;;  %v338_v42 = vld [vmem:[%s5975_s1 + $0x900] sm:$0xff]  ;;  %v339_v43 = vld [vmem:[%s5975_s1 + $0x908] sm:$0xff] }
  0x27   :  { %1632 = vmatpush2.msra.mxu0 %v1522_v44  ;;  %1703 = vmatpush2.msra.mxu1 %v1524_v45  ;;  %v1171_v44 = vunpack.c.h.bf16 %v354_v36  ;;  %v1173_v45 = vunpack.c.h.bf16 %v355_v37  ;;  %v1138_v52 = vunpack.c.l.bf16 %v338_v42  ;;  %v1140_v53 = vunpack.c.l.bf16 %v339_v43 }
  0x28   :  { %1633 = vmatprep.subr.mxu0 %v1491_v48  ;;  %1704 = vmatprep.subr.mxu1 %v1493_v49  ;;  %v322_v48 = vld [vmem:[%s5975_s1 + $0x880] sm:$0xff]  ;;  %v323_v49 = vld [vmem:[%s5975_s1 + $0x888] sm:$0xff] }
  0x29   :  { %1634 = vmatpush2.msra.mxu0 %v1490_v50  ;;  %1705 = vmatpush2.msra.mxu1 %v1492_v51  ;;  %v1139_v50 = vunpack.c.h.bf16 %v338_v42  ;;  %v1141_v51 = vunpack.c.h.bf16 %v339_v43  ;;  %v1106_v59 = vunpack.c.l.bf16 %v322_v48 }
  0x2a   :  { %1635 = vmatprep.subr.mxu0 %v1459_v54  ;;  %1706 = vmatprep.subr.mxu1 %v1461_v55  ;;  %v306_v54 = vld [vmem:[%s5975_s1 + $0x800] sm:$0xff]  ;;  %v307_v55 = vld [vmem:[%s5975_s1 + $0x808] sm:$0xff] }
  0x2b   :  { %1636 = vmatpush2.msra.mxu0 %v1458_v56  ;;  %1707 = vmatpush2.msra.mxu1 %v1460_v57  ;;  %v1107_v56 = vunpack.c.h.bf16 %v322_v48  ;;  %v1109_v57 = vunpack.c.h.bf16 %v323_v49 }
  0x2c   :  { %1637 = vmatprep.subr.mxu0 %v1427_v60  ;;  %1708 = vmatprep.subr.mxu1 %v1429_v61  ;;  %v1108_v60 = vunpack.c.l.bf16 %v323_v49  ;;  %v1075_v61 = vunpack.c.h.bf16 %v306_v54 }
  0x2d   :  { %1638 = vmatpush2.msra.mxu0 %v1426_v62  ;;  %1709 = vmatpush2.msra.mxu1 %v1428_v63  ;;  %v1077_v62 = vunpack.c.h.bf16 %v307_v55  ;;  %v1074_v63 = vunpack.c.l.bf16 %v306_v54 }
  0x2e   :  { %1639 = vmatprep.subr.mxu0 %v1395_v2  ;;  %1710 = vmatprep.subr.mxu1 %v1397_v3  ;;  %v293_v2 = vld [vmem:[%s5975_s1 + $0x798] sm:$0xff]  ;;  %v1076_v3 = vunpack.c.l.bf16 %v307_v55 }
  0x2f   :  { %1640 = vmatpush2.msra.mxu0 %v1394_v4  ;;  %1711 = vmatpush2.msra.mxu1 %v1396_v5  ;;  %v276_v4 = vld [vmem:[%s5975_s1 + $0x710] sm:$0xff]  ;;  %v277_v5 = vld [vmem:[%s5975_s1 + $0x718] sm:$0xff]  ;;  %v1049_v7 = vunpack.c.h.bf16 %v293_v2 }
  0x30   :  { %1641 = vmatprep.subr.mxu0 %v1363_v8  ;;  %1712 = vmatprep.subr.mxu1 %v1365_v9  ;;  %v1046_v8 = vunpack.c.l.bf16 %v292_v1  ;;  %v1048_v9 = vunpack.c.l.bf16 %v293_v2  ;;  %v1015_v12 = vunpack.c.h.bf16 %v276_v4  ;;  %v1017_v13 = vunpack.c.h.bf16 %v277_v5  ;;  %v116_v2 = vld [vmem:[%s5975_s1 + $0x210] sm:$0xff] }
  0x31   :  { %1642 = vmatpush2.msra.mxu0 %v1362_v10  ;;  %1713 = vmatpush2.msra.mxu1 %v1364_v11  ;;  %v260_v10 = vld [vmem:[%s5975_s1 + $0x690] sm:$0xff]  ;;  %v261_v11 = vld [vmem:[%s5975_s1 + $0x698] sm:$0xff] }
  0x32   :  { %1643 = vmatprep.subr.mxu0 %v1331_v14  ;;  %1714 = vmatprep.subr.mxu1 %v1333_v15  ;;  %v1014_v14 = vunpack.c.l.bf16 %v276_v4  ;;  %v1016_v15 = vunpack.c.l.bf16 %v277_v5  ;;  %v983_v18 = vunpack.c.h.bf16 %v260_v10  ;;  %v985_v19 = vunpack.c.h.bf16 %v261_v11 }
  0x33   :  { %1644 = vmatpush2.msra.mxu0 %v1330_v16  ;;  %1715 = vmatpush2.msra.mxu1 %v1332_v17  ;;  %v244_v16 = vld [vmem:[%s5975_s1 + $0x610] sm:$0xff]  ;;  %v245_v17 = vld [vmem:[%s5975_s1 + $0x618] sm:$0xff] }
  0x34   :  { %1645 = vmatprep.subr.mxu0 %v1299_v20  ;;  %1716 = vmatprep.subr.mxu1 %v1301_v21  ;;  %v982_v20 = vunpack.c.l.bf16 %v260_v10  ;;  %v984_v21 = vunpack.c.l.bf16 %v261_v11  ;;  %v951_v24 = vunpack.c.h.bf16 %v244_v16  ;;  %v953_v25 = vunpack.c.h.bf16 %v245_v17 }
  0x35   :  { %1646 = vmatpush2.msra.mxu0 %v1298_v22  ;;  %1717 = vmatpush2.msra.mxu1 %v1300_v23  ;;  %v228_v22 = vld [vmem:[%s5975_s1 + $0x590] sm:$0xff]  ;;  %v229_v23 = vld [vmem:[%s5975_s1 + $0x598] sm:$0xff]  ;;  %v695_v10 = vunpack.c.h.bf16 %v116_v2 }
  0x36   :  { %1647 = vmatprep.subr.mxu0 %v1267_v26  ;;  %1718 = vmatprep.subr.mxu1 %v1269_v27  ;;  %v950_v26 = vunpack.c.l.bf16 %v244_v16  ;;  %v952_v27 = vunpack.c.l.bf16 %v245_v17  ;;  %v919_v30 = vunpack.c.h.bf16 %v228_v22  ;;  %v921_v31 = vunpack.c.h.bf16 %v229_v23 }
  0x37   :  { %1648 = vmatpush2.msra.mxu0 %v1266_v28  ;;  %1719 = vmatpush2.msra.mxu1 %v1268_v29  ;;  %v212_v28 = vld [vmem:[%s5975_s1 + $0x510] sm:$0xff]  ;;  %v213_v29 = vld [vmem:[%s5975_s1 + $0x518] sm:$0xff] }
  0x38   :  { %1649 = vmatprep.subr.mxu0 %v1235_v32  ;;  %1720 = vmatprep.subr.mxu1 %v1237_v33  ;;  %v918_v32 = vunpack.c.l.bf16 %v228_v22  ;;  %v920_v33 = vunpack.c.l.bf16 %v229_v23  ;;  %v887_v36 = vunpack.c.h.bf16 %v212_v28  ;;  %v889_v37 = vunpack.c.h.bf16 %v213_v29 }
  0x39   :  { %1650 = vmatpush2.msra.mxu0 %v1234_v34  ;;  %1721 = vmatpush2.msra.mxu1 %v1236_v35  ;;  %v196_v34 = vld [vmem:[%s5975_s1 + $0x490] sm:$0xff]  ;;  %v197_v35 = vld [vmem:[%s5975_s1 + $0x498] sm:$0xff] }
  0x3a   :  { %1651 = vmatprep.subr.mxu0 %v1203_v38  ;;  %1722 = vmatprep.subr.mxu1 %v1205_v39  ;;  %v886_v38 = vunpack.c.l.bf16 %v212_v28  ;;  %v888_v39 = vunpack.c.l.bf16 %v213_v29  ;;  %v855_v42 = vunpack.c.h.bf16 %v196_v34  ;;  %v857_v43 = vunpack.c.h.bf16 %v197_v35 }
  0x3b   :  { %1652 = vmatpush2.msra.mxu0 %v1202_v40  ;;  %1723 = vmatpush2.msra.mxu1 %v1204_v41  ;;  %v180_v40 = vld [vmem:[%s5975_s1 + $0x410] sm:$0xff]  ;;  %v181_v41 = vld [vmem:[%s5975_s1 + $0x418] sm:$0xff] }
  0x3c   :  { %1653 = vmatprep.subr.mxu0 %v1171_v44  ;;  %1724 = vmatprep.subr.mxu1 %v1173_v45  ;;  %v854_v44 = vunpack.c.l.bf16 %v196_v34  ;;  %v856_v45 = vunpack.c.l.bf16 %v197_v35  ;;  %v823_v48 = vunpack.c.h.bf16 %v180_v40  ;;  %v825_v49 = vunpack.c.h.bf16 %v181_v41 }
  0x3d   :  { %1654 = vmatpush2.msra.mxu0 %v1170_v46  ;;  %1725 = vmatpush2.msra.mxu1 %v1172_v47  ;;  %v164_v46 = vld [vmem:[%s5975_s1 + $0x390] sm:$0xff]  ;;  %v165_v47 = vld [vmem:[%s5975_s1 + $0x398] sm:$0xff] }
  0x3e   :  { %1655 = vmatprep.subr.mxu0 %v1139_v50  ;;  %1726 = vmatprep.subr.mxu1 %v1141_v51  ;;  %v822_v50 = vunpack.c.l.bf16 %v180_v40  ;;  %v824_v51 = vunpack.c.l.bf16 %v181_v41  ;;  %v791_v54 = vunpack.c.h.bf16 %v164_v46  ;;  %v793_v55 = vunpack.c.h.bf16 %v165_v47 }
  0x3f   :  { %1656 = vmatpush2.msra.mxu0 %v1138_v52  ;;  %1727 = vmatpush2.msra.mxu1 %v1140_v53  ;;  %v148_v52 = vld [vmem:[%s5975_s1 + $0x310] sm:$0xff]  ;;  %v149_v53 = vld [vmem:[%s5975_s1 + $0x318] sm:$0xff] }
  0x40   :  { %1657 = vmatprep.subr.mxu0 %v1107_v56  ;;  %1728 = vmatprep.subr.mxu1 %v1109_v57  ;;  %v790_v56 = vunpack.c.l.bf16 %v164_v46  ;;  %v792_v57 = vunpack.c.l.bf16 %v165_v47  ;;  %v760_v1 = vunpack.c.l.bf16 %v149_v53 }
  0x41   :  { %1658 = vmatpush2.msra.mxu0 %v1106_v59  ;;  %1729 = vmatpush2.msra.mxu1 %v1108_v60  ;;  %v132_v59 = vld [vmem:[%s5975_s1 + $0x290] sm:$0xff]  ;;  %v133_v60 = vld [vmem:[%s5975_s1 + $0x298] sm:$0xff] }
  0x42   :  { %1659 = vmatprep.subr.mxu0 %v1075_v61  ;;  %1730 = vmatprep.subr.mxu1 %v1077_v62  ;;  %v759_v61 = vunpack.c.h.bf16 %v148_v52  ;;  %v761_v62 = vunpack.c.h.bf16 %v149_v53  ;;  %v727_v4 = vunpack.c.h.bf16 %v132_v59  ;;  %v729_v5 = vunpack.c.h.bf16 %v133_v60 }
  0x43   :  { %1660 = vmatpush2.msra.mxu0 %v1074_v63  ;;  %1661 = vmatprep.mubr.f32.mxu0 %v4218_v0  ;;  %v758_v63 = vunpack.c.l.bf16 %v148_v52 }
  0x44   :  { %1731 = vmatpush2.msra.mxu1 %v1076_v3  ;;  %1732 = vmatprep.mubr.f32.mxu1 %v4218_v0  ;;  %v117_v3 = vld [vmem:[%s5975_s1 + $0x218] sm:$0xff] }
  0x45   :  { %1662 = vmatmul.mubr.f32.vlgmr.msra.gmra.mxu0 %v4214_v58  ;;  %1733 = vmatmul.mubr.f32.vlgmr.msra.gmra.mxu1 %v4214_v58  ;;  %v697_v11 = vunpack.c.h.bf16 %v117_v3 }
  0x46   :  { %1739 = vmatprep.subr.mxu0 %v1047_v6  ;;  %1810 = vmatprep.subr.mxu1 %v1049_v7  ;;  %v726_v6 = vunpack.c.l.bf16 %v132_v59  ;;  %v728_v7 = vunpack.c.l.bf16 %v133_v60 }
  0x47   :  { %1740 = vmatpush1.msra.mxu0 %v1046_v8  ;;  %1811 = vmatpush1.msra.mxu1 %v1048_v9  ;;  %v100_v8 = vld [vmem:[%s5975_s1 + $0x190] sm:$0xff]  ;;  %v101_v9 = vld [vmem:[%s5975_s1 + $0x198] sm:$0xff] }
  0x48   :  { %1741 = vmatprep.subr.mxu0 %v1015_v12  ;;  %1812 = vmatprep.subr.mxu1 %v1017_v13  ;;  %v694_v12 = vunpack.c.l.bf16 %v116_v2  ;;  %v696_v13 = vunpack.c.l.bf16 %v117_v3  ;;  %v663_v16 = vunpack.c.h.bf16 %v100_v8  ;;  %v665_v17 = vunpack.c.h.bf16 %v101_v9 }
  0x49   :  { %1742 = vmatpush1.msra.mxu0 %v1014_v14  ;;  %1813 = vmatpush1.msra.mxu1 %v1016_v15  ;;  %v84_v14 = vld [vmem:[%s5975_s1 + $0x110] sm:$0xff]  ;;  %v85_v15 = vld [vmem:[%s5975_s1 + $0x118] sm:$0xff] }
  0x4a   :  { %1743 = vmatprep.subr.mxu0 %v983_v18  ;;  %1814 = vmatprep.subr.mxu1 %v985_v19  ;;  %v662_v18 = vunpack.c.l.bf16 %v100_v8  ;;  %v664_v19 = vunpack.c.l.bf16 %v101_v9  ;;  %v631_v22 = vunpack.c.h.bf16 %v84_v14  ;;  %v633_v23 = vunpack.c.h.bf16 %v85_v15 }
  0x4b   :  { %1744 = vmatpush1.msra.mxu0 %v982_v20  ;;  %1815 = vmatpush1.msra.mxu1 %v984_v21  ;;  %v68_v20 = vld [vmem:[%s5975_s1 + $0x90] sm:$0xff]  ;;  %v69_v21 = vld [vmem:[%s5975_s1 + $0x98] sm:$0xff] }
  0x4c   :  { %1745 = vmatprep.subr.mxu0 %v951_v24  ;;  %1816 = vmatprep.subr.mxu1 %v953_v25  ;;  %v630_v24 = vunpack.c.l.bf16 %v84_v14  ;;  %v632_v25 = vunpack.c.l.bf16 %v85_v15  ;;  %v599_v28 = vunpack.c.h.bf16 %v68_v20  ;;  %v601_v29 = vunpack.c.h.bf16 %v69_v21 }
  0x4d   :  { %1746 = vmatpush1.msra.mxu0 %v950_v26  ;;  %1817 = vmatpush1.msra.mxu1 %v952_v27  ;;  %v52_v26 = vld [vmem:[%s5975_s1 + $0x10] sm:$0xff]  ;;  %v53_v27 = vld [vmem:[%s5975_s1 + $0x18] sm:$0xff] }
  0x4e   :  { %1747 = vmatprep.subr.mxu0 %v919_v30  ;;  %1818 = vmatprep.subr.mxu1 %v921_v31  ;;  %v598_v30 = vunpack.c.l.bf16 %v68_v20  ;;  %v600_v31 = vunpack.c.l.bf16 %v69_v21  ;;  %v567_v34 = vunpack.c.h.bf16 %v52_v26  ;;  %v569_v35 = vunpack.c.h.bf16 %v53_v27 }
  0x4f   :  { %1748 = vmatpush1.msra.mxu0 %v918_v32  ;;  %1819 = vmatpush1.msra.mxu1 %v920_v33  ;;  %v548_v32 = vld [vmem:[%s5975_s1 + $0xf90] sm:$0xff]  ;;  %v549_v33 = vld [vmem:[%s5975_s1 + $0xf98] sm:$0xff] }
  0x50   :  { %1749 = vmatprep.subr.mxu0 %v887_v36  ;;  %1820 = vmatprep.subr.mxu1 %v889_v37  ;;  %v566_v36 = vunpack.c.l.bf16 %v52_v26  ;;  %v568_v37 = vunpack.c.l.bf16 %v53_v27  ;;  %v1559_v40 = vunpack.c.h.bf16 %v548_v32  ;;  %v1561_v41 = vunpack.c.h.bf16 %v549_v33 }
  0x51   :  { %1750 = vmatpush1.msra.mxu0 %v886_v38  ;;  %1821 = vmatpush1.msra.mxu1 %v888_v39  ;;  %v532_v38 = vld [vmem:[%s5975_s1 + $0xf10] sm:$0xff]  ;;  %v533_v39 = vld [vmem:[%s5975_s1 + $0xf18] sm:$0xff] }
  0x52   :  { %1751 = vmatprep.subr.mxu0 %v855_v42  ;;  %1822 = vmatprep.subr.mxu1 %v857_v43  ;;  %v1558_v42 = vunpack.c.l.bf16 %v548_v32  ;;  %v1560_v43 = vunpack.c.l.bf16 %v549_v33  ;;  %v1527_v46 = vunpack.c.h.bf16 %v532_v38  ;;  %v1529_v47 = vunpack.c.h.bf16 %v533_v39 }
  0x53   :  { %1752 = vmatpush1.msra.mxu0 %v854_v44  ;;  %1823 = vmatpush1.msra.mxu1 %v856_v45  ;;  %v516_v44 = vld [vmem:[%s5975_s1 + $0xe90] sm:$0xff]  ;;  %v517_v45 = vld [vmem:[%s5975_s1 + $0xe98] sm:$0xff] }
  0x54   :  { %1753 = vmatprep.subr.mxu0 %v823_v48  ;;  %1824 = vmatprep.subr.mxu1 %v825_v49  ;;  %v1526_v48 = vunpack.c.l.bf16 %v532_v38  ;;  %v1528_v49 = vunpack.c.l.bf16 %v533_v39  ;;  %v1495_v52 = vunpack.c.h.bf16 %v516_v44  ;;  %v1497_v53 = vunpack.c.h.bf16 %v517_v45 }
  0x55   :  { %1754 = vmatpush1.msra.mxu0 %v822_v50  ;;  %1825 = vmatpush1.msra.mxu1 %v824_v51  ;;  %v500_v50 = vld [vmem:[%s5975_s1 + $0xe10] sm:$0xff]  ;;  %v501_v51 = vld [vmem:[%s5975_s1 + $0xe18] sm:$0xff] }
  0x56   :  { %1755 = vmatprep.subr.mxu0 %v791_v54  ;;  %1826 = vmatprep.subr.mxu1 %v793_v55  ;;  %v1494_v54 = vunpack.c.l.bf16 %v516_v44  ;;  %v1496_v55 = vunpack.c.l.bf16 %v517_v45  ;;  %v1463_v59 = vunpack.c.h.bf16 %v500_v50  ;;  %v1465_v60 = vunpack.c.h.bf16 %v501_v51 }
  0x57   :  { %1756 = vmatpush1.msra.mxu0 %v790_v56  ;;  %1827 = vmatpush1.msra.mxu1 %v792_v57  ;;  %v484_v56 = vld [vmem:[%s5975_s1 + $0xd90] sm:$0xff]  ;;  %v485_v57 = vld [vmem:[%s5975_s1 + $0xd98] sm:$0xff] }
  0x58   :  { %1757 = vmatprep.subr.mxu0 %v759_v61  ;;  %1828 = vmatprep.subr.mxu1 %v761_v62  ;;  %v1462_v61 = vunpack.c.l.bf16 %v500_v50  ;;  %v1464_v62 = vunpack.c.l.bf16 %v501_v51  ;;  %v1431_v2 = vunpack.c.h.bf16 %v484_v56  ;;  %v1433_v3 = vunpack.c.h.bf16 %v485_v57 }
  0x59   :  { %1758 = vmatpush1.msra.mxu0 %v758_v63  ;;  %1829 = vmatpush1.msra.mxu1 %v760_v1  ;;  %v468_v63 = vld [vmem:[%s5975_s1 + $0xd10] sm:$0xff]  ;;  %v469_v1 = vld [vmem:[%s5975_s1 + $0xd18] sm:$0xff] }
  0x5a   :  { %1759 = vmatprep.subr.mxu0 %v727_v4  ;;  %1830 = vmatprep.subr.mxu1 %v729_v5  ;;  %v1430_v4 = vunpack.c.l.bf16 %v484_v56  ;;  %v1432_v5 = vunpack.c.l.bf16 %v485_v57  ;;  %v1399_v8 = vunpack.c.h.bf16 %v468_v63  ;;  %v1401_v9 = vunpack.c.h.bf16 %v469_v1 }
  0x5b   :  { %1760 = vmatpush1.msra.mxu0 %v726_v6  ;;  %1831 = vmatpush1.msra.mxu1 %v728_v7  ;;  %v452_v6 = vld [vmem:[%s5975_s1 + $0xc90] sm:$0xff]  ;;  %v453_v7 = vld [vmem:[%s5975_s1 + $0xc98] sm:$0xff] }
  0x5c   :  { %1761 = vmatprep.subr.mxu0 %v695_v10  ;;  %1832 = vmatprep.subr.mxu1 %v697_v11  ;;  %v1398_v10 = vunpack.c.l.bf16 %v468_v63  ;;  %v1400_v11 = vunpack.c.l.bf16 %v469_v1  ;;  %v1367_v14 = vunpack.c.h.bf16 %v452_v6  ;;  %v1369_v15 = vunpack.c.h.bf16 %v453_v7 }
  0x5d   :  { %1762 = vmatpush1.msra.mxu0 %v694_v12  ;;  %1833 = vmatpush1.msra.mxu1 %v696_v13  ;;  %v436_v12 = vld [vmem:[%s5975_s1 + $0xc10] sm:$0xff]  ;;  %v437_v13 = vld [vmem:[%s5975_s1 + $0xc18] sm:$0xff] }
  0x5e   :  { %1763 = vmatprep.subr.mxu0 %v663_v16  ;;  %1834 = vmatprep.subr.mxu1 %v665_v17  ;;  %v1366_v16 = vunpack.c.l.bf16 %v452_v6  ;;  %v1368_v17 = vunpack.c.l.bf16 %v453_v7  ;;  %v1335_v20 = vunpack.c.h.bf16 %v436_v12  ;;  %v1337_v21 = vunpack.c.h.bf16 %v437_v13  ;;  %v294_v7 = vld [vmem:[%s5975_s1 + $0x7a0] sm:$0xff] }
  0x5f   :  { %1764 = vmatpush1.msra.mxu0 %v662_v18  ;;  %1835 = vmatpush1.msra.mxu1 %v664_v19  ;;  %v420_v18 = vld [vmem:[%s5975_s1 + $0xb90] sm:$0xff]  ;;  %v421_v19 = vld [vmem:[%s5975_s1 + $0xb98] sm:$0xff] }
  0x60   :  { %1765 = vmatprep.subr.mxu0 %v631_v22  ;;  %1836 = vmatprep.subr.mxu1 %v633_v23  ;;  %v1334_v22 = vunpack.c.l.bf16 %v436_v12  ;;  %v1336_v23 = vunpack.c.l.bf16 %v437_v13  ;;  %v1303_v26 = vunpack.c.h.bf16 %v420_v18  ;;  %v1305_v27 = vunpack.c.h.bf16 %v421_v19 }
  0x61   :  { %1766 = vmatpush1.msra.mxu0 %v630_v24  ;;  %1837 = vmatpush1.msra.mxu1 %v632_v25  ;;  %v404_v24 = vld [vmem:[%s5975_s1 + $0xb10] sm:$0xff]  ;;  %v405_v25 = vld [vmem:[%s5975_s1 + $0xb18] sm:$0xff]  ;;  %v1051_v12 = vunpack.c.h.bf16 %v294_v7 }
  0x62   :  { %1767 = vmatprep.subr.mxu0 %v599_v28  ;;  %1838 = vmatprep.subr.mxu1 %v601_v29  ;;  %v1302_v28 = vunpack.c.l.bf16 %v420_v18  ;;  %v1304_v29 = vunpack.c.l.bf16 %v421_v19  ;;  %v1271_v32 = vunpack.c.h.bf16 %v404_v24  ;;  %v1273_v33 = vunpack.c.h.bf16 %v405_v25 }
  0x63   :  { %1768 = vmatpush1.msra.mxu0 %v598_v30  ;;  %1839 = vmatpush1.msra.mxu1 %v600_v31  ;;  %v388_v30 = vld [vmem:[%s5975_s1 + $0xa90] sm:$0xff]  ;;  %v389_v31 = vld [vmem:[%s5975_s1 + $0xa98] sm:$0xff] }
  0x64   :  { %1769 = vmatprep.subr.mxu0 %v567_v34  ;;  %1840 = vmatprep.subr.mxu1 %v569_v35  ;;  %v1270_v34 = vunpack.c.l.bf16 %v404_v24  ;;  %v1272_v35 = vunpack.c.l.bf16 %v405_v25  ;;  %v1239_v38 = vunpack.c.h.bf16 %v388_v30  ;;  %v1241_v39 = vunpack.c.h.bf16 %v389_v31 }
  0x65   :  { %1770 = vmatpush1.msra.mxu0 %v566_v36  ;;  %1841 = vmatpush1.msra.mxu1 %v568_v37  ;;  %v372_v36 = vld [vmem:[%s5975_s1 + $0xa10] sm:$0xff]  ;;  %v373_v37 = vld [vmem:[%s5975_s1 + $0xa18] sm:$0xff] }
  0x66   :  { %1771 = vmatprep.subr.mxu0 %v1559_v40  ;;  %1842 = vmatprep.subr.mxu1 %v1561_v41  ;;  %v1238_v40 = vunpack.c.l.bf16 %v388_v30  ;;  %v1240_v41 = vunpack.c.l.bf16 %v389_v31  ;;  %v1207_v44 = vunpack.c.h.bf16 %v372_v36  ;;  %v1209_v45 = vunpack.c.h.bf16 %v373_v37 }
  0x67   :  { %1772 = vmatpush2.msra.mxu0 %v1558_v42  ;;  %1843 = vmatpush2.msra.mxu1 %v1560_v43  ;;  %v356_v42 = vld [vmem:[%s5975_s1 + $0x990] sm:$0xff]  ;;  %v357_v43 = vld [vmem:[%s5975_s1 + $0x998] sm:$0xff] }
  0x68   :  { %1773 = vmatprep.subr.mxu0 %v1527_v46  ;;  %1844 = vmatprep.subr.mxu1 %v1529_v47  ;;  %v1206_v46 = vunpack.c.l.bf16 %v372_v36  ;;  %v1208_v47 = vunpack.c.l.bf16 %v373_v37  ;;  %v1175_v50 = vunpack.c.h.bf16 %v356_v42  ;;  %v1177_v51 = vunpack.c.h.bf16 %v357_v43 }
  0x69   :  { %1774 = vmatpush2.msra.mxu0 %v1526_v48  ;;  %1845 = vmatpush2.msra.mxu1 %v1528_v49  ;;  %v340_v48 = vld [vmem:[%s5975_s1 + $0x910] sm:$0xff]  ;;  %v341_v49 = vld [vmem:[%s5975_s1 + $0x918] sm:$0xff] }
  0x6a   :  { %1775 = vmatprep.subr.mxu0 %v1495_v52  ;;  %1846 = vmatprep.subr.mxu1 %v1497_v53  ;;  %v1174_v52 = vunpack.c.l.bf16 %v356_v42  ;;  %v1176_v53 = vunpack.c.l.bf16 %v357_v43  ;;  %v1143_v56 = vunpack.c.h.bf16 %v340_v48  ;;  %v1145_v57 = vunpack.c.h.bf16 %v341_v49 }
  0x6b   :  { %1776 = vmatpush2.msra.mxu0 %v1494_v54  ;;  %1847 = vmatpush2.msra.mxu1 %v1496_v55  ;;  %v324_v54 = vld [vmem:[%s5975_s1 + $0x890] sm:$0xff]  ;;  %v325_v55 = vld [vmem:[%s5975_s1 + $0x898] sm:$0xff] }
  0x6c   :  { %1777 = vmatprep.subr.mxu0 %v1463_v59  ;;  %1848 = vmatprep.subr.mxu1 %v1465_v60  ;;  %v1142_v59 = vunpack.c.l.bf16 %v340_v48  ;;  %v1144_v60 = vunpack.c.l.bf16 %v341_v49  ;;  %v1111_v63 = vunpack.c.h.bf16 %v324_v54  ;;  %v1113_v1 = vunpack.c.h.bf16 %v325_v55 }
  0x6d   :  { %1778 = vmatpush2.msra.mxu0 %v1462_v61  ;;  %1849 = vmatpush2.msra.mxu1 %v1464_v62  ;;  %v308_v61 = vld [vmem:[%s5975_s1 + $0x810] sm:$0xff]  ;;  %v309_v62 = vld [vmem:[%s5975_s1 + $0x818] sm:$0xff] }
  0x6e   :  { %1779 = vmatprep.subr.mxu0 %v1431_v2  ;;  %1850 = vmatprep.subr.mxu1 %v1433_v3  ;;  %v1110_v2 = vunpack.c.l.bf16 %v324_v54  ;;  %v1112_v3 = vunpack.c.l.bf16 %v325_v55  ;;  %v1078_v6 = vunpack.c.l.bf16 %v308_v61 }
  0x6f   :  { %1780 = vmatpush2.msra.mxu0 %v1430_v4  ;;  %1851 = vmatpush2.msra.mxu1 %v1432_v5  ;;  %v1079_v4 = vunpack.c.h.bf16 %v308_v61  ;;  %v1081_v5 = vunpack.c.h.bf16 %v309_v62 }
  0x70   :  { %1781 = vmatprep.subr.mxu0 %v1399_v8  ;;  %1852 = vmatprep.subr.mxu1 %v1401_v9  ;;  %v295_v8 = vld [vmem:[%s5975_s1 + $0x7a8] sm:$0xff]  ;;  %v1080_v9 = vunpack.c.l.bf16 %v309_v62 }
  0x71   :  { %1782 = vmatpush2.msra.mxu0 %v1398_v10  ;;  %1853 = vmatpush2.msra.mxu1 %v1400_v11  ;;  %v278_v10 = vld [vmem:[%s5975_s1 + $0x720] sm:$0xff]  ;;  %v279_v11 = vld [vmem:[%s5975_s1 + $0x728] sm:$0xff]  ;;  %v1053_v13 = vunpack.c.h.bf16 %v295_v8 }
  0x72   :  { %1783 = vmatprep.subr.mxu0 %v1367_v14  ;;  %1854 = vmatprep.subr.mxu1 %v1369_v15  ;;  %v1050_v14 = vunpack.c.l.bf16 %v294_v7  ;;  %v1052_v15 = vunpack.c.l.bf16 %v295_v8  ;;  %v1019_v18 = vunpack.c.h.bf16 %v278_v10  ;;  %v1021_v19 = vunpack.c.h.bf16 %v279_v11  ;;  %v118_v7 = vld [vmem:[%s5975_s1 + $0x220] sm:$0xff]  ;;  %v119_v8 = vld [vmem:[%s5975_s1 + $0x228] sm:$0xff] }
  0x73   :  { %1784 = vmatpush2.msra.mxu0 %v1366_v16  ;;  %1855 = vmatpush2.msra.mxu1 %v1368_v17  ;;  %v262_v16 = vld [vmem:[%s5975_s1 + $0x6a0] sm:$0xff]  ;;  %v263_v17 = vld [vmem:[%s5975_s1 + $0x6a8] sm:$0xff] }
  0x74   :  { %1785 = vmatprep.subr.mxu0 %v1335_v20  ;;  %1856 = vmatprep.subr.mxu1 %v1337_v21  ;;  %v1018_v20 = vunpack.c.l.bf16 %v278_v10  ;;  %v1020_v21 = vunpack.c.l.bf16 %v279_v11  ;;  %v987_v24 = vunpack.c.h.bf16 %v262_v16  ;;  %v989_v25 = vunpack.c.h.bf16 %v263_v17 }
  0x75   :  { %1786 = vmatpush2.msra.mxu0 %v1334_v22  ;;  %1857 = vmatpush2.msra.mxu1 %v1336_v23  ;;  %v246_v22 = vld [vmem:[%s5975_s1 + $0x620] sm:$0xff]  ;;  %v247_v23 = vld [vmem:[%s5975_s1 + $0x628] sm:$0xff] }
  0x76   :  { %1787 = vmatprep.subr.mxu0 %v1303_v26  ;;  %1858 = vmatprep.subr.mxu1 %v1305_v27  ;;  %v986_v26 = vunpack.c.l.bf16 %v262_v16  ;;  %v988_v27 = vunpack.c.l.bf16 %v263_v17  ;;  %v957_v30 = vunpack.c.h.bf16 %v247_v23  ;;  %v954_v31 = vunpack.c.l.bf16 %v246_v22 }
  0x77   :  { %1788 = vmatpush2.msra.mxu0 %v1302_v28  ;;  %1859 = vmatpush2.msra.mxu1 %v1304_v29  ;;  %v231_v28 = vld [vmem:[%s5975_s1 + $0x5a8] sm:$0xff]  ;;  %v955_v29 = vunpack.c.h.bf16 %v246_v22  ;;  %v701_v16 = vunpack.c.h.bf16 %v119_v8  ;;  %v698_v17 = vunpack.c.l.bf16 %v118_v7 }
  0x78   :  { %1789 = vmatprep.subr.mxu0 %v1271_v32  ;;  %1860 = vmatprep.subr.mxu1 %v1273_v33  ;;  %v956_v32 = vunpack.c.l.bf16 %v247_v23  ;;  %v214_v33 = vld [vmem:[%s5975_s1 + $0x520] sm:$0xff]  ;;  %v925_v36 = vunpack.c.h.bf16 %v231_v28 }
  0x79   :  { %1790 = vmatpush2.msra.mxu0 %v1270_v34  ;;  %1861 = vmatpush2.msra.mxu1 %v1272_v35  ;;  %v215_v34 = vld [vmem:[%s5975_s1 + $0x528] sm:$0xff]  ;;  %v890_v43 = vunpack.c.l.bf16 %v214_v33 }
  0x7a   :  { %1791 = vmatprep.subr.mxu0 %v1239_v38  ;;  %1862 = vmatprep.subr.mxu1 %v1241_v39  ;;  %v924_v38 = vunpack.c.l.bf16 %v231_v28  ;;  %v198_v39 = vld [vmem:[%s5975_s1 + $0x4a0] sm:$0xff]  ;;  %v893_v42 = vunpack.c.h.bf16 %v215_v34 }
  0x7b   :  { %1792 = vmatpush2.msra.mxu0 %v1238_v40  ;;  %1863 = vmatpush2.msra.mxu1 %v1240_v41  ;;  %v199_v40 = vld [vmem:[%s5975_s1 + $0x4a8] sm:$0xff]  ;;  %v891_v41 = vunpack.c.h.bf16 %v214_v33  ;;  %v858_v49 = vunpack.c.l.bf16 %v198_v39 }
  0x7c   :  { %1793 = vmatprep.subr.mxu0 %v1207_v44  ;;  %1864 = vmatprep.subr.mxu1 %v1209_v45  ;;  %v892_v44 = vunpack.c.l.bf16 %v215_v34  ;;  %v182_v45 = vld [vmem:[%s5975_s1 + $0x420] sm:$0xff]  ;;  %v861_v48 = vunpack.c.h.bf16 %v199_v40 }
  0x7d   :  { %1794 = vmatpush2.msra.mxu0 %v1206_v46  ;;  %1865 = vmatpush2.msra.mxu1 %v1208_v47  ;;  %v183_v46 = vld [vmem:[%s5975_s1 + $0x428] sm:$0xff]  ;;  %v859_v47 = vunpack.c.h.bf16 %v198_v39  ;;  %v826_v55 = vunpack.c.l.bf16 %v182_v45 }
  0x7e   :  { %1795 = vmatprep.subr.mxu0 %v1175_v50  ;;  %1866 = vmatprep.subr.mxu1 %v1177_v51  ;;  %v860_v50 = vunpack.c.l.bf16 %v199_v40  ;;  %v166_v51 = vld [vmem:[%s5975_s1 + $0x3a0] sm:$0xff]  ;;  %v829_v54 = vunpack.c.h.bf16 %v183_v46 }
  0x7f   :  { %1796 = vmatpush2.msra.mxu0 %v1174_v52  ;;  %1867 = vmatpush2.msra.mxu1 %v1176_v53  ;;  %v167_v52 = vld [vmem:[%s5975_s1 + $0x3a8] sm:$0xff]  ;;  %v827_v53 = vunpack.c.h.bf16 %v182_v45  ;;  %v794_v62 = vunpack.c.l.bf16 %v166_v51 }
  0x80   :  { %1797 = vmatprep.subr.mxu0 %v1143_v56  ;;  %1868 = vmatprep.subr.mxu1 %v1145_v57  ;;  %v828_v56 = vunpack.c.l.bf16 %v183_v46  ;;  %v150_v57 = vld [vmem:[%s5975_s1 + $0x320] sm:$0xff]  ;;  %v797_v61 = vunpack.c.h.bf16 %v167_v52 }
  0x81   :  { %1798 = vmatpush2.msra.mxu0 %v1142_v59  ;;  %1869 = vmatpush2.msra.mxu1 %v1144_v60  ;;  %v151_v59 = vld [vmem:[%s5975_s1 + $0x328] sm:$0xff]  ;;  %v795_v60 = vunpack.c.h.bf16 %v166_v51 }
  0x82   :  { %1799 = vmatprep.subr.mxu0 %v1111_v63  ;;  %1870 = vmatprep.subr.mxu1 %v1113_v1  ;;  %v796_v63 = vunpack.c.l.bf16 %v167_v52  ;;  %v134_v1 = vld [vmem:[%s5975_s1 + $0x2a0] sm:$0xff] }
  0x83   :  { %1800 = vmatpush2.msra.mxu0 %v1110_v2  ;;  %1871 = vmatpush2.msra.mxu1 %v1112_v3  ;;  %v135_v2 = vld [vmem:[%s5975_s1 + $0x2a8] sm:$0xff]  ;;  %v763_v3 = vunpack.c.h.bf16 %v150_v57  ;;  %v730_v11 = vunpack.c.l.bf16 %v134_v1 }
  0x84   :  { %1801 = vmatprep.subr.mxu0 %v1079_v4  ;;  %1872 = vmatprep.subr.mxu1 %v1081_v5  ;;  %v765_v4 = vunpack.c.h.bf16 %v151_v59  ;;  %v762_v5 = vunpack.c.l.bf16 %v150_v57  ;;  %v733_v10 = vunpack.c.h.bf16 %v135_v2 }
  0x85   :  { %1802 = vmatpush2.msra.mxu0 %v1078_v6  ;;  %1803 = vmatprep.mubr.f32.mxu0 %v4218_v0  ;;  %v764_v6 = vunpack.c.l.bf16 %v151_v59 }
  0x86   :  { %1873 = vmatpush2.msra.mxu1 %v1080_v9  ;;  %1874 = vmatprep.mubr.f32.mxu1 %v4218_v0  ;;  %v731_v9 = vunpack.c.h.bf16 %v134_v1 }
  0x87   :  { %1804 = vmatmul.mubr.f32.vlgmr.msra.gmra.mxu0 %v4214_v58  ;;  %1875 = vmatmul.mubr.f32.vlgmr.msra.gmra.mxu1 %v4214_v58  ;;  %v230_v58 = vld [vmem:[%s5975_s1 + $0x5a0] sm:$0xff] }
  0x88   :  { %1881 = vmatprep.subr.mxu0 %v1051_v12  ;;  %1952 = vmatprep.subr.mxu1 %v1053_v13  ;;  %v923_v35 = vunpack.c.h.bf16 %v230_v58  ;;  %v922_v37 = vunpack.c.l.bf16 %v230_v58  ;;  %v732_v12 = vunpack.c.l.bf16 %v135_v2  ;;  %v102_v13 = vld [vmem:[%s5975_s1 + $0x1a0] sm:$0xff] }
  0x89   :  { %1882 = vmatpush1.msra.mxu0 %v1050_v14  ;;  %1953 = vmatpush1.msra.mxu1 %v1052_v15  ;;  %v103_v14 = vld [vmem:[%s5975_s1 + $0x1a8] sm:$0xff]  ;;  %v699_v15 = vunpack.c.h.bf16 %v118_v7  ;;  %v666_v23 = vunpack.c.l.bf16 %v102_v13 }
  0x8a   :  { %1883 = vmatprep.subr.mxu0 %v1019_v18  ;;  %1954 = vmatprep.subr.mxu1 %v1021_v19  ;;  %v700_v18 = vunpack.c.l.bf16 %v119_v8  ;;  %v86_v19 = vld [vmem:[%s5975_s1 + $0x120] sm:$0xff]  ;;  %v669_v22 = vunpack.c.h.bf16 %v103_v14 }
  0x8b   :  { %1884 = vmatpush1.msra.mxu0 %v1018_v20  ;;  %1955 = vmatpush1.msra.mxu1 %v1020_v21  ;;  %v87_v20 = vld [vmem:[%s5975_s1 + $0x128] sm:$0xff]  ;;  %v667_v21 = vunpack.c.h.bf16 %v102_v13  ;;  %v634_v28 = vunpack.c.l.bf16 %v86_v19 }
  0x8c   :  { %1885 = vmatprep.subr.mxu0 %v987_v24  ;;  %1956 = vmatprep.subr.mxu1 %v989_v25  ;;  %v668_v24 = vunpack.c.l.bf16 %v103_v14  ;;  %v70_v25 = vld [vmem:[%s5975_s1 + $0xa0] sm:$0xff]  ;;  %v637_v58 = vunpack.c.h.bf16 %v87_v20 }
  0x8d   :  { %1886 = vmatpush1.msra.mxu0 %v986_v26  ;;  %1957 = vmatpush1.msra.mxu1 %v988_v27  ;;  %v71_v26 = vld [vmem:[%s5975_s1 + $0xa8] sm:$0xff]  ;;  %v635_v27 = vunpack.c.h.bf16 %v86_v19  ;;  %v602_v34 = vunpack.c.l.bf16 %v70_v25 }
  0x8e   :  { %1887 = vmatprep.subr.mxu0 %v955_v29  ;;  %1958 = vmatprep.subr.mxu1 %v957_v30  ;;  %v636_v29 = vunpack.c.l.bf16 %v87_v20  ;;  %v54_v30 = vld [vmem:[%s5975_s1 + $0x20] sm:$0xff]  ;;  %v605_v33 = vunpack.c.h.bf16 %v71_v26 }
  0x8f   :  { %1888 = vmatpush1.msra.mxu0 %v954_v31  ;;  %1959 = vmatpush1.msra.mxu1 %v956_v32  ;;  %v55_v31 = vld [vmem:[%s5975_s1 + $0x28] sm:$0xff]  ;;  %v603_v32 = vunpack.c.h.bf16 %v70_v25  ;;  %v570_v40 = vunpack.c.l.bf16 %v54_v30 }
  0x90   :  { %1889 = vmatprep.subr.mxu0 %v923_v35  ;;  %1960 = vmatprep.subr.mxu1 %v925_v36  ;;  %v604_v35 = vunpack.c.l.bf16 %v71_v26  ;;  %v550_v36 = vld [vmem:[%s5975_s1 + $0xfa0] sm:$0xff]  ;;  %v573_v39 = vunpack.c.h.bf16 %v55_v31 }
  0x91   :  { %1890 = vmatpush1.msra.mxu0 %v922_v37  ;;  %1961 = vmatpush1.msra.mxu1 %v924_v38  ;;  %v551_v37 = vld [vmem:[%s5975_s1 + $0xfa8] sm:$0xff]  ;;  %v571_v38 = vunpack.c.h.bf16 %v54_v30  ;;  %v1562_v46 = vunpack.c.l.bf16 %v550_v36 }
  0x92   :  { %1891 = vmatprep.subr.mxu0 %v891_v41  ;;  %1962 = vmatprep.subr.mxu1 %v893_v42  ;;  %v572_v41 = vunpack.c.l.bf16 %v55_v31  ;;  %v534_v42 = vld [vmem:[%s5975_s1 + $0xf20] sm:$0xff]  ;;  %v1565_v45 = vunpack.c.h.bf16 %v551_v37 }
  0x93   :  { %1892 = vmatpush1.msra.mxu0 %v890_v43  ;;  %1963 = vmatpush1.msra.mxu1 %v892_v44  ;;  %v535_v43 = vld [vmem:[%s5975_s1 + $0xf28] sm:$0xff]  ;;  %v1563_v44 = vunpack.c.h.bf16 %v550_v36  ;;  %v1530_v52 = vunpack.c.l.bf16 %v534_v42 }
  0x94   :  { %1893 = vmatprep.subr.mxu0 %v859_v47  ;;  %1964 = vmatprep.subr.mxu1 %v861_v48  ;;  %v1564_v47 = vunpack.c.l.bf16 %v551_v37  ;;  %v518_v48 = vld [vmem:[%s5975_s1 + $0xea0] sm:$0xff]  ;;  %v1533_v51 = vunpack.c.h.bf16 %v535_v43 }
  0x95   :  { %1894 = vmatpush1.msra.mxu0 %v858_v49  ;;  %1965 = vmatpush1.msra.mxu1 %v860_v50  ;;  %v519_v49 = vld [vmem:[%s5975_s1 + $0xea8] sm:$0xff]  ;;  %v1531_v50 = vunpack.c.h.bf16 %v534_v42  ;;  %v1498_v59 = vunpack.c.l.bf16 %v518_v48 }
  0x96   :  { %1895 = vmatprep.subr.mxu0 %v827_v53  ;;  %1966 = vmatprep.subr.mxu1 %v829_v54  ;;  %v1532_v53 = vunpack.c.l.bf16 %v535_v43  ;;  %v502_v54 = vld [vmem:[%s5975_s1 + $0xe20] sm:$0xff]  ;;  %v1501_v57 = vunpack.c.h.bf16 %v519_v49 }
  0x97   :  { %1896 = vmatpush1.msra.mxu0 %v826_v55  ;;  %1967 = vmatpush1.msra.mxu1 %v828_v56  ;;  %v503_v55 = vld [vmem:[%s5975_s1 + $0xe28] sm:$0xff]  ;;  %v1499_v56 = vunpack.c.h.bf16 %v518_v48  ;;  %v1466_v2 = vunpack.c.l.bf16 %v502_v54 }
  0x98   :  { %1897 = vmatprep.subr.mxu0 %v795_v60  ;;  %1968 = vmatprep.subr.mxu1 %v797_v61  ;;  %v1500_v60 = vunpack.c.l.bf16 %v519_v49  ;;  %v486_v61 = vld [vmem:[%s5975_s1 + $0xda0] sm:$0xff]  ;;  %v1469_v1 = vunpack.c.h.bf16 %v503_v55 }
  0x99   :  { %1898 = vmatpush1.msra.mxu0 %v794_v62  ;;  %1969 = vmatpush1.msra.mxu1 %v796_v63  ;;  %v487_v62 = vld [vmem:[%s5975_s1 + $0xda8] sm:$0xff]  ;;  %v1467_v63 = vunpack.c.h.bf16 %v502_v54  ;;  %v1434_v8 = vunpack.c.l.bf16 %v486_v61 }
  0x9a   :  { %1899 = vmatprep.subr.mxu0 %v763_v3  ;;  %1970 = vmatprep.subr.mxu1 %v765_v4  ;;  %v1468_v3 = vunpack.c.l.bf16 %v503_v55  ;;  %v470_v4 = vld [vmem:[%s5975_s1 + $0xd20] sm:$0xff]  ;;  %v1437_v7 = vunpack.c.h.bf16 %v487_v62 }
  0x9b   :  { %1900 = vmatpush1.msra.mxu0 %v762_v5  ;;  %1971 = vmatpush1.msra.mxu1 %v764_v6  ;;  %v471_v5 = vld [vmem:[%s5975_s1 + $0xd28] sm:$0xff]  ;;  %v1435_v6 = vunpack.c.h.bf16 %v486_v61  ;;  %v1402_v14 = vunpack.c.l.bf16 %v470_v4 }
  0x9c   :  { %1901 = vmatprep.subr.mxu0 %v731_v9  ;;  %1972 = vmatprep.subr.mxu1 %v733_v10  ;;  %v1436_v9 = vunpack.c.l.bf16 %v487_v62  ;;  %v454_v10 = vld [vmem:[%s5975_s1 + $0xca0] sm:$0xff]  ;;  %v1405_v13 = vunpack.c.h.bf16 %v471_v5 }
  0x9d   :  { %1902 = vmatpush1.msra.mxu0 %v730_v11  ;;  %1973 = vmatpush1.msra.mxu1 %v732_v12  ;;  %v455_v11 = vld [vmem:[%s5975_s1 + $0xca8] sm:$0xff]  ;;  %v1403_v12 = vunpack.c.h.bf16 %v470_v4  ;;  %v1370_v20 = vunpack.c.l.bf16 %v454_v10 }
  0x9e   :  { %1903 = vmatprep.subr.mxu0 %v699_v15  ;;  %1974 = vmatprep.subr.mxu1 %v701_v16  ;;  %v1404_v15 = vunpack.c.l.bf16 %v471_v5  ;;  %v438_v16 = vld [vmem:[%s5975_s1 + $0xc20] sm:$0xff]  ;;  %v1373_v19 = vunpack.c.h.bf16 %v455_v11 }
  0x9f   :  { %1904 = vmatpush1.msra.mxu0 %v698_v17  ;;  %1975 = vmatpush1.msra.mxu1 %v700_v18  ;;  %v439_v17 = vld [vmem:[%s5975_s1 + $0xc28] sm:$0xff]  ;;  %v1371_v18 = vunpack.c.h.bf16 %v454_v10  ;;  %v1338_v26 = vunpack.c.l.bf16 %v438_v16  ;;  %v296_v10 = vld [vmem:[%s5975_s1 + $0x7b0] sm:$0xff] }
  0xa0   :  { %1905 = vmatprep.subr.mxu0 %v667_v21  ;;  %1976 = vmatprep.subr.mxu1 %v669_v22  ;;  %v1372_v21 = vunpack.c.l.bf16 %v455_v11  ;;  %v422_v22 = vld [vmem:[%s5975_s1 + $0xba0] sm:$0xff]  ;;  %v1341_v25 = vunpack.c.h.bf16 %v439_v17  ;;  %v297_v11 = vld [vmem:[%s5975_s1 + $0x7b8] sm:$0xff] }
  0xa1   :  { %1906 = vmatpush1.msra.mxu0 %v666_v23  ;;  %1977 = vmatpush1.msra.mxu1 %v668_v24  ;;  %v423_v23 = vld [vmem:[%s5975_s1 + $0xba8] sm:$0xff]  ;;  %v1339_v24 = vunpack.c.h.bf16 %v438_v16  ;;  %v1306_v31 = vunpack.c.l.bf16 %v422_v22  ;;  %v1057_v16 = vunpack.c.h.bf16 %v297_v11 }
  0xa2   :  { %1907 = vmatprep.subr.mxu0 %v635_v27  ;;  %1978 = vmatprep.subr.mxu1 %v637_v58  ;;  %v1340_v27 = vunpack.c.l.bf16 %v439_v17  ;;  %v406_v58 = vld [vmem:[%s5975_s1 + $0xb20] sm:$0xff]  ;;  %v1309_v30 = vunpack.c.h.bf16 %v423_v23  ;;  %v1054_v17 = vunpack.c.l.bf16 %v296_v10 }
  0xa3   :  { %1908 = vmatpush1.msra.mxu0 %v634_v28  ;;  %1979 = vmatpush1.msra.mxu1 %v636_v29  ;;  %v407_v28 = vld [vmem:[%s5975_s1 + $0xb28] sm:$0xff]  ;;  %v1307_v29 = vunpack.c.h.bf16 %v422_v22  ;;  %v1274_v37 = vunpack.c.l.bf16 %v406_v58 }
  0xa4   :  { %1909 = vmatprep.subr.mxu0 %v603_v32  ;;  %1980 = vmatprep.subr.mxu1 %v605_v33  ;;  %v1308_v32 = vunpack.c.l.bf16 %v423_v23  ;;  %v390_v33 = vld [vmem:[%s5975_s1 + $0xaa0] sm:$0xff]  ;;  %v1277_v36 = vunpack.c.h.bf16 %v407_v28 }
  0xa5   :  { %1910 = vmatpush1.msra.mxu0 %v602_v34  ;;  %1981 = vmatpush1.msra.mxu1 %v604_v35  ;;  %v391_v34 = vld [vmem:[%s5975_s1 + $0xaa8] sm:$0xff]  ;;  %v1275_v35 = vunpack.c.h.bf16 %v406_v58  ;;  %v1242_v43 = vunpack.c.l.bf16 %v390_v33  ;;  %v4635_v23 = vld.sshfl [vmem:[%s5976_s0] sm:$0x33 pattern:$0x76325410] }
  0xa6   :  { %1911 = vmatprep.subr.mxu0 %v571_v38  ;;  %1982 = vmatprep.subr.mxu1 %v573_v39  ;;  %v1276_v38 = vunpack.c.l.bf16 %v407_v28  ;;  %v374_v39 = vld [vmem:[%s5975_s1 + $0xa20] sm:$0xff]  ;;  %v1245_v42 = vunpack.c.h.bf16 %v391_v34 }
  0xa7   :  { %1912 = vmatpush1.msra.mxu0 %v570_v40  ;;  %1983 = vmatpush1.msra.mxu1 %v572_v41  ;;  %v375_v40 = vld [vmem:[%s5975_s1 + $0xa28] sm:$0xff]  ;;  %v1243_v41 = vunpack.c.h.bf16 %v390_v33  ;;  %v1210_v49 = vunpack.c.l.bf16 %v374_v39 }
  0xa8   :  { %1913 = vmatprep.subr.mxu0 %v1563_v44  ;;  %1984 = vmatprep.subr.mxu1 %v1565_v45  ;;  %v1244_v44 = vunpack.c.l.bf16 %v391_v34  ;;  %v358_v45 = vld [vmem:[%s5975_s1 + $0x9a0] sm:$0xff]  ;;  %v1213_v48 = vunpack.c.h.bf16 %v375_v40 }
  0xa9   :  { %1914 = vmatpush2.msra.mxu0 %v1562_v46  ;;  %1985 = vmatpush2.msra.mxu1 %v1564_v47  ;;  %v359_v46 = vld [vmem:[%s5975_s1 + $0x9a8] sm:$0xff]  ;;  %v1211_v47 = vunpack.c.h.bf16 %v374_v39  ;;  %v1178_v55 = vunpack.c.l.bf16 %v358_v45 }
  0xaa   :  { %1915 = vmatprep.subr.mxu0 %v1531_v50  ;;  %1986 = vmatprep.subr.mxu1 %v1533_v51  ;;  %v1212_v50 = vunpack.c.l.bf16 %v375_v40  ;;  %v342_v51 = vld [vmem:[%s5975_s1 + $0x920] sm:$0xff]  ;;  %v1181_v54 = vunpack.c.h.bf16 %v359_v46 }
  0xab   :  { %1916 = vmatpush2.msra.mxu0 %v1530_v52  ;;  %1987 = vmatpush2.msra.mxu1 %v1532_v53  ;;  %v343_v52 = vld [vmem:[%s5975_s1 + $0x928] sm:$0xff]  ;;  %v1179_v53 = vunpack.c.h.bf16 %v358_v45  ;;  %v1146_v62 = vunpack.c.l.bf16 %v342_v51 }
  0xac   :  { %1917 = vmatprep.subr.mxu0 %v1499_v56  ;;  %1988 = vmatprep.subr.mxu1 %v1501_v57  ;;  %v1180_v56 = vunpack.c.l.bf16 %v359_v46  ;;  %v326_v57 = vld [vmem:[%s5975_s1 + $0x8a0] sm:$0xff]  ;;  %v1149_v61 = vunpack.c.h.bf16 %v343_v52 }
  0xad   :  { %1918 = vmatpush2.msra.mxu0 %v1498_v59  ;;  %1989 = vmatpush2.msra.mxu1 %v1500_v60  ;;  %v327_v59 = vld [vmem:[%s5975_s1 + $0x8a8] sm:$0xff]  ;;  %v1147_v60 = vunpack.c.h.bf16 %v342_v51  ;;  %v1114_v5 = vunpack.c.l.bf16 %v326_v57 }
  0xae   :  { %1919 = vmatprep.subr.mxu0 %v1467_v63  ;;  %1990 = vmatprep.subr.mxu1 %v1469_v1  ;;  %v1148_v63 = vunpack.c.l.bf16 %v343_v52  ;;  %v310_v1 = vld [vmem:[%s5975_s1 + $0x820] sm:$0xff]  ;;  %v1117_v4 = vunpack.c.h.bf16 %v327_v59 }
  0xaf   :  { %1920 = vmatpush2.msra.mxu0 %v1466_v2  ;;  %1991 = vmatpush2.msra.mxu1 %v1468_v3  ;;  %v311_v2 = vld [vmem:[%s5975_s1 + $0x828] sm:$0xff]  ;;  %v1115_v3 = vunpack.c.h.bf16 %v326_v57 }
  0xb0   :  { %1921 = vmatprep.subr.mxu0 %v1435_v6  ;;  %1992 = vmatprep.subr.mxu1 %v1437_v7  ;;  %v1116_v6 = vunpack.c.l.bf16 %v327_v59  ;;  %v1083_v7 = vunpack.c.h.bf16 %v310_v1 }
  0xb1   :  { %1922 = vmatpush2.msra.mxu0 %v1434_v8  ;;  %1993 = vmatpush2.msra.mxu1 %v1436_v9  ;;  %v1085_v8 = vunpack.c.h.bf16 %v311_v2  ;;  %v1082_v9 = vunpack.c.l.bf16 %v310_v1 }
  0xb2   :  { %1923 = vmatprep.subr.mxu0 %v1403_v12  ;;  %1994 = vmatprep.subr.mxu1 %v1405_v13  ;;  %v1084_v12 = vunpack.c.l.bf16 %v311_v2  ;;  %v280_v13 = vld [vmem:[%s5975_s1 + $0x730] sm:$0xff] }
  0xb3   :  { %1924 = vmatpush2.msra.mxu0 %v1402_v14  ;;  %1995 = vmatpush2.msra.mxu1 %v1404_v15  ;;  %v281_v14 = vld [vmem:[%s5975_s1 + $0x738] sm:$0xff]  ;;  %v1055_v15 = vunpack.c.h.bf16 %v296_v10 }
  0xb4   :  { %1925 = vmatprep.subr.mxu0 %v1371_v18  ;;  %1996 = vmatprep.subr.mxu1 %v1373_v19  ;;  %v1056_v18 = vunpack.c.l.bf16 %v297_v11  ;;  %v264_v19 = vld [vmem:[%s5975_s1 + $0x6b0] sm:$0xff]  ;;  %v1025_v22 = vunpack.c.h.bf16 %v281_v14 }
  0xb5   :  { %1926 = vmatpush2.msra.mxu0 %v1370_v20  ;;  %1997 = vmatpush2.msra.mxu1 %v1372_v21  ;;  %v265_v20 = vld [vmem:[%s5975_s1 + $0x6b8] sm:$0xff]  ;;  %v1023_v21 = vunpack.c.h.bf16 %v280_v13  ;;  %v991_v58 = vunpack.c.h.bf16 %v264_v19  ;;  %v120_v11 = vld [vmem:[%s5975_s1 + $0x230] sm:$0xff] }
  0xb6   :  { %1927 = vmatprep.subr.mxu0 %v1339_v24  ;;  %1998 = vmatprep.subr.mxu1 %v1341_v25  ;;  %v1022_v24 = vunpack.c.l.bf16 %v280_v13  ;;  %v1024_v25 = vunpack.c.l.bf16 %v281_v14  ;;  %v993_v28 = vunpack.c.h.bf16 %v265_v20 }
  0xb7   :  { %1928 = vmatpush2.msra.mxu0 %v1338_v26  ;;  %1999 = vmatpush2.msra.mxu1 %v1340_v27  ;;  %v248_v26 = vld [vmem:[%s5975_s1 + $0x630] sm:$0xff]  ;;  %v249_v27 = vld [vmem:[%s5975_s1 + $0x638] sm:$0xff] }
  0xb8   :  { %1929 = vmatprep.subr.mxu0 %v1307_v29  ;;  %2000 = vmatprep.subr.mxu1 %v1309_v30  ;;  %v990_v29 = vunpack.c.l.bf16 %v264_v19  ;;  %v992_v30 = vunpack.c.l.bf16 %v265_v20  ;;  %v959_v33 = vunpack.c.h.bf16 %v248_v26  ;;  %v961_v34 = vunpack.c.h.bf16 %v249_v27 }
  0xb9   :  { %1930 = vmatpush2.msra.mxu0 %v1306_v31  ;;  %2001 = vmatpush2.msra.mxu1 %v1308_v32  ;;  %v232_v31 = vld [vmem:[%s5975_s1 + $0x5b0] sm:$0xff]  ;;  %v233_v32 = vld [vmem:[%s5975_s1 + $0x5b8] sm:$0xff]  ;;  %v703_v19 = vunpack.c.h.bf16 %v120_v11 }
  0xba   :  { %1931 = vmatprep.subr.mxu0 %v1275_v35  ;;  %2002 = vmatprep.subr.mxu1 %v1277_v36  ;;  %v958_v35 = vunpack.c.l.bf16 %v248_v26  ;;  %v960_v36 = vunpack.c.l.bf16 %v249_v27  ;;  %v927_v39 = vunpack.c.h.bf16 %v232_v31  ;;  %v929_v40 = vunpack.c.h.bf16 %v233_v32 }
  0xbb   :  { %1932 = vmatpush2.msra.mxu0 %v1274_v37  ;;  %2003 = vmatpush2.msra.mxu1 %v1276_v38  ;;  %v216_v37 = vld [vmem:[%s5975_s1 + $0x530] sm:$0xff]  ;;  %v217_v38 = vld [vmem:[%s5975_s1 + $0x538] sm:$0xff] }
  0xbc   :  { %1933 = vmatprep.subr.mxu0 %v1243_v41  ;;  %2004 = vmatprep.subr.mxu1 %v1245_v42  ;;  %v926_v41 = vunpack.c.l.bf16 %v232_v31  ;;  %v928_v42 = vunpack.c.l.bf16 %v233_v32  ;;  %v895_v45 = vunpack.c.h.bf16 %v216_v37  ;;  %v897_v46 = vunpack.c.h.bf16 %v217_v38 }
  0xbd   :  { %1934 = vmatpush2.msra.mxu0 %v1242_v43  ;;  %2005 = vmatpush2.msra.mxu1 %v1244_v44  ;;  %v200_v43 = vld [vmem:[%s5975_s1 + $0x4b0] sm:$0xff]  ;;  %v201_v44 = vld [vmem:[%s5975_s1 + $0x4b8] sm:$0xff] }
  0xbe   :  { %1935 = vmatprep.subr.mxu0 %v1211_v47  ;;  %2006 = vmatprep.subr.mxu1 %v1213_v48  ;;  %v894_v47 = vunpack.c.l.bf16 %v216_v37  ;;  %v896_v48 = vunpack.c.l.bf16 %v217_v38  ;;  %v863_v51 = vunpack.c.h.bf16 %v200_v43  ;;  %v865_v52 = vunpack.c.h.bf16 %v201_v44 }
  0xbf   :  { %1936 = vmatpush2.msra.mxu0 %v1210_v49  ;;  %2007 = vmatpush2.msra.mxu1 %v1212_v50  ;;  %v184_v49 = vld [vmem:[%s5975_s1 + $0x430] sm:$0xff]  ;;  %v185_v50 = vld [vmem:[%s5975_s1 + $0x438] sm:$0xff] }
  0xc0   :  { %1937 = vmatprep.subr.mxu0 %v1179_v53  ;;  %2008 = vmatprep.subr.mxu1 %v1181_v54  ;;  %v862_v53 = vunpack.c.l.bf16 %v200_v43  ;;  %v864_v54 = vunpack.c.l.bf16 %v201_v44  ;;  %v831_v57 = vunpack.c.h.bf16 %v184_v49  ;;  %v833_v59 = vunpack.c.h.bf16 %v185_v50 }
  0xc1   :  { %1938 = vmatpush2.msra.mxu0 %v1178_v55  ;;  %2009 = vmatpush2.msra.mxu1 %v1180_v56  ;;  %v168_v55 = vld [vmem:[%s5975_s1 + $0x3b0] sm:$0xff]  ;;  %v169_v56 = vld [vmem:[%s5975_s1 + $0x3b8] sm:$0xff] }
  0xc2   :  { %1939 = vmatprep.subr.mxu0 %v1147_v60  ;;  %2010 = vmatprep.subr.mxu1 %v1149_v61  ;;  %v830_v60 = vunpack.c.l.bf16 %v184_v49  ;;  %v832_v61 = vunpack.c.l.bf16 %v185_v50  ;;  %v799_v1 = vunpack.c.h.bf16 %v168_v55  ;;  %v801_v2 = vunpack.c.h.bf16 %v169_v56 }
  0xc3   :  { %1940 = vmatpush2.msra.mxu0 %v1146_v62  ;;  %2011 = vmatpush2.msra.mxu1 %v1148_v63  ;;  %v152_v62 = vld [vmem:[%s5975_s1 + $0x330] sm:$0xff]  ;;  %v153_v63 = vld [vmem:[%s5975_s1 + $0x338] sm:$0xff] }
  0xc4   :  { %1941 = vmatprep.subr.mxu0 %v1115_v3  ;;  %2012 = vmatprep.subr.mxu1 %v1117_v4  ;;  %v798_v3 = vunpack.c.l.bf16 %v168_v55  ;;  %v800_v4 = vunpack.c.l.bf16 %v169_v56  ;;  %v768_v10 = vunpack.c.l.bf16 %v153_v63 }
  0xc5   :  { %1942 = vmatpush2.msra.mxu0 %v1114_v5  ;;  %2013 = vmatpush2.msra.mxu1 %v1116_v6  ;;  %v136_v5 = vld [vmem:[%s5975_s1 + $0x2b0] sm:$0xff]  ;;  %v137_v6 = vld [vmem:[%s5975_s1 + $0x2b8] sm:$0xff] }
  0xc6   :  { %1943 = vmatprep.subr.mxu0 %v1083_v7  ;;  %2014 = vmatprep.subr.mxu1 %v1085_v8  ;;  %v767_v7 = vunpack.c.h.bf16 %v152_v62  ;;  %v769_v8 = vunpack.c.h.bf16 %v153_v63  ;;  %v735_v13 = vunpack.c.h.bf16 %v136_v5  ;;  %v737_v14 = vunpack.c.h.bf16 %v137_v6 }
  0xc7   :  { %1944 = vmatpush2.msra.mxu0 %v1082_v9  ;;  %1945 = vmatprep.mubr.f32.mxu0 %v4218_v0  ;;  %v766_v9 = vunpack.c.l.bf16 %v152_v62 }
  0xc8   :  { %2015 = vmatpush2.msra.mxu1 %v1084_v12  ;;  %2016 = vmatprep.mubr.f32.mxu1 %v4218_v0  ;;  %v121_v12 = vld [vmem:[%s5975_s1 + $0x238] sm:$0xff] }
  0xc9   :  { %1946 = vmatmul.mubr.f32.vlgmr.msra.gmra.mxu0 %v4635_v23  ;;  %2017 = vmatmul.mubr.f32.vlgmr.msra.gmra.mxu1 %v4635_v23  ;;  %v705_v20 = vunpack.c.h.bf16 %v121_v12 }
  0xca   :  { %2023 = vmatprep.subr.mxu0 %v1055_v15  ;;  %2094 = vmatprep.subr.mxu1 %v1057_v16  ;;  %v734_v15 = vunpack.c.l.bf16 %v136_v5  ;;  %v736_v16 = vunpack.c.l.bf16 %v137_v6 }
  0xcb   :  { %2024 = vmatpush1.msra.mxu0 %v1054_v17  ;;  %2095 = vmatpush1.msra.mxu1 %v1056_v18  ;;  %v104_v17 = vld [vmem:[%s5975_s1 + $0x1b0] sm:$0xff]  ;;  %v105_v18 = vld [vmem:[%s5975_s1 + $0x1b8] sm:$0xff] }
  0xcc   :  { %2025 = vmatprep.subr.mxu0 %v1023_v21  ;;  %2096 = vmatprep.subr.mxu1 %v1025_v22  ;;  %v702_v21 = vunpack.c.l.bf16 %v120_v11  ;;  %v704_v22 = vunpack.c.l.bf16 %v121_v12  ;;  %v671_v26 = vunpack.c.h.bf16 %v104_v17  ;;  %v673_v27 = vunpack.c.h.bf16 %v105_v18 }
  0xcd   :  { %2026 = vmatpush1.msra.mxu0 %v1022_v24  ;;  %2097 = vmatpush1.msra.mxu1 %v1024_v25  ;;  %v88_v24 = vld [vmem:[%s5975_s1 + $0x130] sm:$0xff]  ;;  %v89_v25 = vld [vmem:[%s5975_s1 + $0x138] sm:$0xff] }
  0xce   :  { %2027 = vmatprep.subr.mxu0 %v991_v58  ;;  %2098 = vmatprep.subr.mxu1 %v993_v28  ;;  %v670_v58 = vunpack.c.l.bf16 %v104_v17  ;;  %v672_v28 = vunpack.c.l.bf16 %v105_v18  ;;  %v639_v31 = vunpack.c.h.bf16 %v88_v24  ;;  %v641_v32 = vunpack.c.h.bf16 %v89_v25 }
  0xcf   :  { %2028 = vmatpush1.msra.mxu0 %v990_v29  ;;  %2099 = vmatpush1.msra.mxu1 %v992_v30  ;;  %v72_v29 = vld [vmem:[%s5975_s1 + $0xb0] sm:$0xff]  ;;  %v73_v30 = vld [vmem:[%s5975_s1 + $0xb8] sm:$0xff] }
  0xd0   :  { %2029 = vmatprep.subr.mxu0 %v959_v33  ;;  %2100 = vmatprep.subr.mxu1 %v961_v34  ;;  %v638_v33 = vunpack.c.l.bf16 %v88_v24  ;;  %v640_v34 = vunpack.c.l.bf16 %v89_v25  ;;  %v607_v37 = vunpack.c.h.bf16 %v72_v29  ;;  %v609_v38 = vunpack.c.h.bf16 %v73_v30 }
  0xd1   :  { %2030 = vmatpush1.msra.mxu0 %v958_v35  ;;  %2101 = vmatpush1.msra.mxu1 %v960_v36  ;;  %v56_v35 = vld [vmem:[%s5975_s1 + $0x30] sm:$0xff]  ;;  %v57_v36 = vld [vmem:[%s5975_s1 + $0x38] sm:$0xff] }
  0xd2   :  { %2031 = vmatprep.subr.mxu0 %v927_v39  ;;  %2102 = vmatprep.subr.mxu1 %v929_v40  ;;  %v606_v39 = vunpack.c.l.bf16 %v72_v29  ;;  %v608_v40 = vunpack.c.l.bf16 %v73_v30  ;;  %v575_v43 = vunpack.c.h.bf16 %v56_v35  ;;  %v577_v44 = vunpack.c.h.bf16 %v57_v36 }
  0xd3   :  { %2032 = vmatpush1.msra.mxu0 %v926_v41  ;;  %2103 = vmatpush1.msra.mxu1 %v928_v42  ;;  %v552_v41 = vld [vmem:[%s5975_s1 + $0xfb0] sm:$0xff]  ;;  %v553_v42 = vld [vmem:[%s5975_s1 + $0xfb8] sm:$0xff] }
  0xd4   :  { %2033 = vmatprep.subr.mxu0 %v895_v45  ;;  %2104 = vmatprep.subr.mxu1 %v897_v46  ;;  %v574_v45 = vunpack.c.l.bf16 %v56_v35  ;;  %v576_v46 = vunpack.c.l.bf16 %v57_v36  ;;  %v1567_v49 = vunpack.c.h.bf16 %v552_v41  ;;  %v1569_v50 = vunpack.c.h.bf16 %v553_v42 }
  0xd5   :  { %2034 = vmatpush1.msra.mxu0 %v894_v47  ;;  %2105 = vmatpush1.msra.mxu1 %v896_v48  ;;  %v536_v47 = vld [vmem:[%s5975_s1 + $0xf30] sm:$0xff]  ;;  %v537_v48 = vld [vmem:[%s5975_s1 + $0xf38] sm:$0xff] }
  0xd6   :  { %2035 = vmatprep.subr.mxu0 %v863_v51  ;;  %2106 = vmatprep.subr.mxu1 %v865_v52  ;;  %v1566_v51 = vunpack.c.l.bf16 %v552_v41  ;;  %v1568_v52 = vunpack.c.l.bf16 %v553_v42  ;;  %v1535_v55 = vunpack.c.h.bf16 %v536_v47  ;;  %v1537_v56 = vunpack.c.h.bf16 %v537_v48 }
  0xd7   :  { %2036 = vmatpush1.msra.mxu0 %v862_v53  ;;  %2107 = vmatpush1.msra.mxu1 %v864_v54  ;;  %v520_v53 = vld [vmem:[%s5975_s1 + $0xeb0] sm:$0xff]  ;;  %v521_v54 = vld [vmem:[%s5975_s1 + $0xeb8] sm:$0xff] }
  0xd8   :  { %2037 = vmatprep.subr.mxu0 %v831_v57  ;;  %2108 = vmatprep.subr.mxu1 %v833_v59  ;;  %v1534_v57 = vunpack.c.l.bf16 %v536_v47  ;;  %v1536_v59 = vunpack.c.l.bf16 %v537_v48  ;;  %v1503_v62 = vunpack.c.h.bf16 %v520_v53  ;;  %v1505_v63 = vunpack.c.h.bf16 %v521_v54 }
  0xd9   :  { %2038 = vmatpush1.msra.mxu0 %v830_v60  ;;  %2109 = vmatpush1.msra.mxu1 %v832_v61  ;;  %v504_v60 = vld [vmem:[%s5975_s1 + $0xe30] sm:$0xff]  ;;  %v505_v61 = vld [vmem:[%s5975_s1 + $0xe38] sm:$0xff] }
  0xda   :  { %2039 = vmatprep.subr.mxu0 %v799_v1  ;;  %2110 = vmatprep.subr.mxu1 %v801_v2  ;;  %v1502_v1 = vunpack.c.l.bf16 %v520_v53  ;;  %v1504_v2 = vunpack.c.l.bf16 %v521_v54  ;;  %v1471_v5 = vunpack.c.h.bf16 %v504_v60  ;;  %v1473_v6 = vunpack.c.h.bf16 %v505_v61 }
  0xdb   :  { %2040 = vmatpush1.msra.mxu0 %v798_v3  ;;  %2111 = vmatpush1.msra.mxu1 %v800_v4  ;;  %v488_v3 = vld [vmem:[%s5975_s1 + $0xdb0] sm:$0xff]  ;;  %v489_v4 = vld [vmem:[%s5975_s1 + $0xdb8] sm:$0xff] }
  0xdc   :  { %2041 = vmatprep.subr.mxu0 %v767_v7  ;;  %2112 = vmatprep.subr.mxu1 %v769_v8  ;;  %v1470_v7 = vunpack.c.l.bf16 %v504_v60  ;;  %v1472_v8 = vunpack.c.l.bf16 %v505_v61  ;;  %v1439_v11 = vunpack.c.h.bf16 %v488_v3  ;;  %v1441_v12 = vunpack.c.h.bf16 %v489_v4 }
  0xdd   :  { %2042 = vmatpush1.msra.mxu0 %v766_v9  ;;  %2113 = vmatpush1.msra.mxu1 %v768_v10  ;;  %v472_v9 = vld [vmem:[%s5975_s1 + $0xd30] sm:$0xff]  ;;  %v473_v10 = vld [vmem:[%s5975_s1 + $0xd38] sm:$0xff] }
  0xde   :  { %2043 = vmatprep.subr.mxu0 %v735_v13  ;;  %2114 = vmatprep.subr.mxu1 %v737_v14  ;;  %v1438_v13 = vunpack.c.l.bf16 %v488_v3  ;;  %v1440_v14 = vunpack.c.l.bf16 %v489_v4  ;;  %v1407_v17 = vunpack.c.h.bf16 %v472_v9  ;;  %v1409_v18 = vunpack.c.h.bf16 %v473_v10  ;;  %v328_v3 = vld [vmem:[%s5975_s1 + $0x8b0] sm:$0xff]  ;;  %v329_v4 = vld [vmem:[%s5975_s1 + $0x8b8] sm:$0xff] }
  0xdf   :  { %2044 = vmatpush1.msra.mxu0 %v734_v15  ;;  %2115 = vmatpush1.msra.mxu1 %v736_v16  ;;  %v456_v15 = vld [vmem:[%s5975_s1 + $0xcb0] sm:$0xff]  ;;  %v457_v16 = vld [vmem:[%s5975_s1 + $0xcb8] sm:$0xff] }
  0xe0   :  { %2045 = vmatprep.subr.mxu0 %v703_v19  ;;  %2116 = vmatprep.subr.mxu1 %v705_v20  ;;  %v1406_v19 = vunpack.c.l.bf16 %v472_v9  ;;  %v1408_v20 = vunpack.c.l.bf16 %v473_v10  ;;  %v1375_v24 = vunpack.c.h.bf16 %v456_v15  ;;  %v1377_v25 = vunpack.c.h.bf16 %v457_v16  ;;  %v312_v10 = vld [vmem:[%s5975_s1 + $0x830] sm:$0xff] }
  0xe1   :  { %2046 = vmatpush1.msra.mxu0 %v702_v21  ;;  %2117 = vmatpush1.msra.mxu1 %v704_v22  ;;  %v440_v21 = vld [vmem:[%s5975_s1 + $0xc30] sm:$0xff]  ;;  %v441_v22 = vld [vmem:[%s5975_s1 + $0xc38] sm:$0xff] }
  0xe2   :  { %2047 = vmatprep.subr.mxu0 %v671_v26  ;;  %2118 = vmatprep.subr.mxu1 %v673_v27  ;;  %v1374_v26 = vunpack.c.l.bf16 %v456_v15  ;;  %v1376_v27 = vunpack.c.l.bf16 %v457_v16  ;;  %v1343_v29 = vunpack.c.h.bf16 %v440_v21  ;;  %v1345_v30 = vunpack.c.h.bf16 %v441_v22 }
  0xe3   :  { %2048 = vmatpush1.msra.mxu0 %v670_v58  ;;  %2119 = vmatpush1.msra.mxu1 %v672_v28  ;;  %v424_v58 = vld [vmem:[%s5975_s1 + $0xbb0] sm:$0xff]  ;;  %v425_v28 = vld [vmem:[%s5975_s1 + $0xbb8] sm:$0xff]  ;;  %v1118_v15 = vunpack.c.l.bf16 %v328_v3  ;;  %v1120_v16 = vunpack.c.l.bf16 %v329_v4 }
  0xe4   :  { %2049 = vmatprep.subr.mxu0 %v639_v31  ;;  %2120 = vmatprep.subr.mxu1 %v641_v32  ;;  %v1342_v31 = vunpack.c.l.bf16 %v440_v21  ;;  %v1344_v32 = vunpack.c.l.bf16 %v441_v22  ;;  %v1311_v35 = vunpack.c.h.bf16 %v424_v58  ;;  %v1313_v36 = vunpack.c.h.bf16 %v425_v28 }
  0xe5   :  { %2050 = vmatpush1.msra.mxu0 %v638_v33  ;;  %2121 = vmatpush1.msra.mxu1 %v640_v34  ;;  %v408_v33 = vld [vmem:[%s5975_s1 + $0xb30] sm:$0xff]  ;;  %v409_v34 = vld [vmem:[%s5975_s1 + $0xb38] sm:$0xff] }
  0xe6   :  { %2051 = vmatprep.subr.mxu0 %v607_v37  ;;  %2122 = vmatprep.subr.mxu1 %v609_v38  ;;  %v1310_v37 = vunpack.c.l.bf16 %v424_v58  ;;  %v1312_v38 = vunpack.c.l.bf16 %v425_v28  ;;  %v1279_v41 = vunpack.c.h.bf16 %v408_v33  ;;  %v1281_v42 = vunpack.c.h.bf16 %v409_v34 }
  0xe7   :  { %2052 = vmatpush1.msra.mxu0 %v606_v39  ;;  %2123 = vmatpush1.msra.mxu1 %v608_v40  ;;  %v392_v39 = vld [vmem:[%s5975_s1 + $0xab0] sm:$0xff]  ;;  %v393_v40 = vld [vmem:[%s5975_s1 + $0xab8] sm:$0xff] }
  0xe8   :  { %2053 = vmatprep.subr.mxu0 %v575_v43  ;;  %2124 = vmatprep.subr.mxu1 %v577_v44  ;;  %v1278_v43 = vunpack.c.l.bf16 %v408_v33  ;;  %v1280_v44 = vunpack.c.l.bf16 %v409_v34  ;;  %v1247_v47 = vunpack.c.h.bf16 %v392_v39  ;;  %v1249_v48 = vunpack.c.h.bf16 %v393_v40 }
  0xe9   :  { %2054 = vmatpush1.msra.mxu0 %v574_v45  ;;  %2125 = vmatpush1.msra.mxu1 %v576_v46  ;;  %v376_v45 = vld [vmem:[%s5975_s1 + $0xa30] sm:$0xff]  ;;  %v377_v46 = vld [vmem:[%s5975_s1 + $0xa38] sm:$0xff] }
  0xea   :  { %2055 = vmatprep.subr.mxu0 %v1567_v49  ;;  %2126 = vmatprep.subr.mxu1 %v1569_v50  ;;  %v1246_v49 = vunpack.c.l.bf16 %v392_v39  ;;  %v1248_v50 = vunpack.c.l.bf16 %v393_v40  ;;  %v1215_v53 = vunpack.c.h.bf16 %v376_v45  ;;  %v1217_v54 = vunpack.c.h.bf16 %v377_v46 }
  0xeb   :  { %2056 = vmatpush2.msra.mxu0 %v1566_v51  ;;  %2127 = vmatpush2.msra.mxu1 %v1568_v52  ;;  %v360_v51 = vld [vmem:[%s5975_s1 + $0x9b0] sm:$0xff]  ;;  %v361_v52 = vld [vmem:[%s5975_s1 + $0x9b8] sm:$0xff] }
  0xec   :  { %2057 = vmatprep.subr.mxu0 %v1535_v55  ;;  %2128 = vmatprep.subr.mxu1 %v1537_v56  ;;  %v1214_v55 = vunpack.c.l.bf16 %v376_v45  ;;  %v1216_v56 = vunpack.c.l.bf16 %v377_v46  ;;  %v1183_v60 = vunpack.c.h.bf16 %v360_v51  ;;  %v1185_v61 = vunpack.c.h.bf16 %v361_v52  ;;  %v250_v45 = vld [vmem:[%s5975_s1 + $0x640] sm:$0xff]  ;;  %v251_v46 = vld [vmem:[%s5975_s1 + $0x648] sm:$0xff] }
  0xed   :  { %2058 = vmatpush2.msra.mxu0 %v1534_v57  ;;  %2129 = vmatpush2.msra.mxu1 %v1536_v59  ;;  %v344_v57 = vld [vmem:[%s5975_s1 + $0x930] sm:$0xff]  ;;  %v345_v59 = vld [vmem:[%s5975_s1 + $0x938] sm:$0xff] }
  0xee   :  { %2059 = vmatprep.subr.mxu0 %v1503_v62  ;;  %2130 = vmatprep.subr.mxu1 %v1505_v63  ;;  %v3987_v62 = vmov 1983009808   ;;  %v1152_v9 = vunpack.c.l.bf16 %v345_v59 }
  0xef   :  { %2060 = vmatpush2.msra.mxu0 %v1502_v1  ;;  %2131 = vmatpush2.msra.mxu1 %v1504_v2  ;;  %v2768_v63 = vunpack.c.l.s4 %v3987_v62  ;;  %v1182_v1 = vunpack.c.l.bf16 %v360_v51  ;;  %v1184_v2 = vunpack.c.l.bf16 %v361_v52  ;;  %v234_v51 = vld [vmem:[%s5975_s1 + $0x5c0] sm:$0xff]  ;;  %v235_v52 = vld [vmem:[%s5975_s1 + $0x5c8] sm:$0xff] }
  0xf0   :  { %2061 = vmatprep.subr.mxu0 %v1471_v5  ;;  %2132 = vmatprep.subr.mxu1 %v1473_v6  ;;  %v1151_v5 = vunpack.c.h.bf16 %v344_v57  ;;  %v1153_v6 = vunpack.c.h.bf16 %v345_v59  ;;  %v219_v59 = vld [vmem:[%s5975_s1 + $0x548] sm:$0xff]  ;;  %v930_v62 = vunpack.c.l.bf16 %v234_v51 }
  0xf1   :  { %2062 = vmatpush2.msra.mxu0 %v1470_v7  ;;  %2133 = vmatpush2.msra.mxu1 %v1472_v8  ;;  %v2770_v7 = vlaneseq  ;;  %v1150_v8 = vunpack.c.l.bf16 %v344_v57  ;;  %v218_v57 = vld [vmem:[%s5975_s1 + $0x540] sm:$0xff] }
  0xf2   :  { %2063 = vmatprep.subr.mxu0 %v1439_v11  ;;  %2134 = vmatprep.subr.mxu1 %v1441_v12  ;;  %v313_v11 = vld [vmem:[%s5975_s1 + $0x838] sm:$0xff]  ;;  %v1119_v12 = vunpack.c.h.bf16 %v328_v3  ;;  %v899_v3 = vunpack.c.h.bf16 %v218_v57 }
  0xf3   :  { %2064 = vmatpush2.msra.mxu0 %v1438_v13  ;;  %2135 = vmatpush2.msra.mxu1 %v1440_v14  ;;  %v1121_v13 = vunpack.c.h.bf16 %v329_v4  ;;  %v2769_v14 = vunpack.c.0.s8 %v2768_v63  ;;  %v932_v63 = vunpack.c.l.bf16 %v235_v52  ;;  %v901_v4 = vunpack.c.h.bf16 %v219_v59 }
  0xf4   :  { %2065 = vmatprep.subr.mxu0 %v1407_v17  ;;  %2136 = vmatprep.subr.mxu1 %v1409_v18  ;;  %v1087_v17 = vunpack.c.h.bf16 %v312_v10  ;;  %v1089_v18 = vunpack.c.h.bf16 %v313_v11 }
  0xf5   :  { %2066 = vmatpush2.msra.mxu0 %v1406_v19  ;;  %2137 = vmatpush2.msra.mxu1 %v1408_v20  ;;  %v4813_v19 = vshrl.u32 %v2770_v7, 7  ;;  %v1086_v20 = vunpack.c.l.bf16 %v312_v10  ;;  %v186_v7 = vld [vmem:[%s5975_s1 + $0x440] sm:$0xff] }
  0xf6   :  { %2067 = vmatprep.subr.mxu0 %v1375_v24  ;;  %2138 = vmatprep.subr.mxu1 %v1377_v25  ;;  %v298_v24 = vld [vmem:[%s5975_s1 + $0x7c0] sm:$0xff]  ;;  %v299_v25 = vld [vmem:[%s5975_s1 + $0x7c8] sm:$0xff] }
  0xf7   :  { %2068 = vmatpush2.msra.mxu0 %v1374_v26  ;;  %2139 = vmatpush2.msra.mxu1 %v1376_v27  ;;  %v1088_v26 = vunpack.c.l.bf16 %v313_v11  ;;  %v4822_v27 = vsub.s32 %v2769_v14, %v4813_v19  ;;  %v171_v14 = vld [vmem:[%s5975_s1 + $0x3c8] sm:$0xff] }
  0xf8   :  { %2069 = vmatprep.subr.mxu0 %v1343_v29  ;;  %2140 = vmatprep.subr.mxu1 %v1345_v30  ;;  %v282_v29 = vld [vmem:[%s5975_s1 + $0x740] sm:$0xff]  ;;  %v283_v30 = vld [vmem:[%s5975_s1 + $0x748] sm:$0xff] }
  0xf9   :  { %2070 = vmatpush2.msra.mxu0 %v1342_v31  ;;  %2141 = vmatpush2.msra.mxu1 %v1344_v32  ;;  %v1059_v31 = vunpack.c.h.bf16 %v298_v24  ;;  %v1061_v32 = vunpack.c.h.bf16 %v299_v25 }
  0xfa   :  { %2071 = vmatprep.subr.mxu0 %v1311_v35  ;;  %2142 = vmatprep.subr.mxu1 %v1313_v36  ;;  %v1058_v35 = vunpack.c.l.bf16 %v298_v24  ;;  %v1060_v36 = vunpack.c.l.bf16 %v299_v25  ;;  %v805_v24 = vunpack.c.h.bf16 %v171_v14 }
  0xfb   :  { %2072 = vmatpush2.msra.mxu0 %v1310_v37  ;;  %2143 = vmatpush2.msra.mxu1 %v1312_v38  ;;  %v266_v37 = vld [vmem:[%s5975_s1 + $0x6c0] sm:$0xff]  ;;  %v267_v38 = vld [vmem:[%s5975_s1 + $0x6c8] sm:$0xff] }
  0xfc   :  { %2073 = vmatprep.subr.mxu0 %v1279_v41  ;;  %2144 = vmatprep.subr.mxu1 %v1281_v42  ;;  %v1027_v41 = vunpack.c.h.bf16 %v282_v29  ;;  %v1029_v42 = vunpack.c.h.bf16 %v283_v30 }
  0xfd   :  { %2074 = vmatpush2.msra.mxu0 %v1278_v43  ;;  %2145 = vmatpush2.msra.mxu1 %v1280_v44  ;;  %v1026_v43 = vunpack.c.l.bf16 %v282_v29  ;;  %v1028_v44 = vunpack.c.l.bf16 %v283_v30 }
  0xfe   :  { %2075 = vmatprep.subr.mxu0 %v1247_v47  ;;  %2146 = vmatprep.subr.mxu1 %v1249_v48  ;;  %v995_v48 = vunpack.c.h.bf16 %v266_v37 }
  0xff   :  { %2076 = vmatpush2.msra.mxu0 %v1246_v49  ;;  %2147 = vmatpush2.msra.mxu1 %v1248_v50  ;;  %v997_v49 = vunpack.c.h.bf16 %v267_v38  ;;  %v996_v50 = vunpack.c.l.bf16 %v267_v38 }
 0x100   :  { %2077 = vmatprep.subr.mxu0 %v1215_v53  ;;  %2148 = vmatprep.subr.mxu1 %v1217_v54  ;;  %v963_v53 = vunpack.c.h.bf16 %v250_v45  ;;  %v965_v54 = vunpack.c.h.bf16 %v251_v46 }
 0x101   :  { %2078 = vmatpush2.msra.mxu0 %v1214_v55  ;;  %2149 = vmatpush2.msra.mxu1 %v1216_v56  ;;  %v962_v55 = vunpack.c.l.bf16 %v250_v45  ;;  %v964_v56 = vunpack.c.l.bf16 %v251_v46 }
 0x102   :  { %2079 = vmatprep.subr.mxu0 %v1183_v60  ;;  %2150 = vmatprep.subr.mxu1 %v1185_v61  ;;  %v931_v60 = vunpack.c.h.bf16 %v234_v51  ;;  %v933_v61 = vunpack.c.h.bf16 %v235_v52 }
 0x103   :  { %2080 = vmatpush2.msra.mxu0 %v1182_v1  ;;  %2151 = vmatpush2.msra.mxu1 %v1184_v2  ;;  %v202_v1 = vld [vmem:[%s5975_s1 + $0x4c0] sm:$0xff]  ;;  %v203_v2 = vld [vmem:[%s5975_s1 + $0x4c8] sm:$0xff] }
 0x104   :  { %2081 = vmatprep.subr.mxu0 %v1151_v5  ;;  %2152 = vmatprep.subr.mxu1 %v1153_v6  ;;  %v898_v5 = vunpack.c.l.bf16 %v218_v57  ;;  %v900_v6 = vunpack.c.l.bf16 %v219_v59  ;;  %v869_v10 = vunpack.c.h.bf16 %v203_v2  ;;  %v866_v11 = vunpack.c.l.bf16 %v202_v1 }
 0x105   :  { %2082 = vmatpush2.msra.mxu0 %v1150_v8  ;;  %2153 = vmatpush2.msra.mxu1 %v1152_v9  ;;  %v1663_v21 = vpop.f32.mrf.mxu0  ;;  %v1734_v22 = vpop.f32.mrf.mxu1  ;;  %v187_v8 = vld [vmem:[%s5975_s1 + $0x448] sm:$0xff]  ;;  %v867_v9 = vunpack.c.h.bf16 %v202_v1 }
 0x106   :  { %2083 = vmatprep.subr.mxu0 %v1119_v12  ;;  %2154 = vmatprep.subr.mxu1 %v1121_v13  ;;  %v868_v12 = vunpack.c.l.bf16 %v203_v2  ;;  %v170_v13 = vld [vmem:[%s5975_s1 + $0x3c0] sm:$0xff] }
 0x107   :  { %2084 = vmatpush2.msra.mxu0 %v1118_v15  ;;  %2155 = vmatpush2.msra.mxu1 %v1120_v16  ;;  %v1665_v58 = vpop.f32.mrf.mxu0  ;;  %v1736_v28 = vpop.f32.mrf.mxu1  ;;  %v835_v15 = vunpack.c.h.bf16 %v186_v7  ;;  %v837_v16 = vunpack.c.h.bf16 %v187_v8  ;;  %v802_v25 = vunpack.c.l.bf16 %v170_v13 }
 0x108   :  { %2085 = vmatprep.subr.mxu0 %v1087_v17  ;;  %2156 = vmatprep.subr.mxu1 %v1089_v18  ;;  %v2765_v33 = vcombine.low %v1663_v21, %v1665_v58  ;;  %v2766_v34 = vcombine.low %v1734_v22, %v1736_v28  ;;  %v834_v17 = vunpack.c.l.bf16 %v186_v7  ;;  %v836_v18 = vunpack.c.l.bf16 %v187_v8  ;;  %v155_v21 = vld [vmem:[%s5975_s1 + $0x348] sm:$0xff]  ;;  %v138_v58 = vld [vmem:[%s5975_s1 + $0x2c0] sm:$0xff] }
 0x109   :  { %2086 = vmatpush2.msra.mxu0 %v1086_v20  ;;  %2087 = vmatprep.mubr.f32.mxu0 %v4218_v0  ;;  %v154_v20 = vld [vmem:[%s5975_s1 + $0x340] sm:$0xff]  ;;  %v803_v22 = vunpack.c.h.bf16 %v170_v13  ;;  %v139_v28 = vld [vmem:[%s5975_s1 + $0x2c8] sm:$0xff]  ;;  %v773_v30 = vunpack.c.h.bf16 %v155_v21 }
 0x10a   :  { %2157 = vmatpush2.msra.mxu1 %v1088_v26  ;;  %2158 = vmatprep.mubr.f32.mxu1 %v4218_v0  ;;  %v4839_v39 = vrot.slane %v2765_v33, %v4822_v27  ;;  %v4842_v40 = vrot.slane %v2766_v34, %v4822_v27  ;;  %v804_v26 = vunpack.c.l.bf16 %v171_v14  ;;  %v771_v29 = vunpack.c.h.bf16 %v154_v20  ;;  %v122_v33 = vld [vmem:[%s5975_s1 + $0x240] sm:$0xff]  ;;  %v123_v34 = vld [vmem:[%s5975_s1 + $0x248] sm:$0xff] }
 0x10b   :  { %2088 = vmatmul.mubr.f32.vlgmr.msra.gmra.mxu0 %v4635_v23  ;;  %2159 = vmatmul.mubr.f32.vlgmr.msra.gmra.mxu1 %v4635_v23  ;;  %v994_v23 = vunpack.c.l.bf16 %v266_v37  ;;  %v738_v37 = vunpack.c.l.bf16 %v138_v58  ;;  %v740_v38 = vunpack.c.l.bf16 %v139_v28  ;;  %v706_v45 = vunpack.c.l.bf16 %v122_v33 }
 0x10c   :  { %2165 = vmatprep.subr.mxu0 %v1059_v31  ;;  %2236 = vmatprep.subr.mxu1 %v1061_v32  ;;  %v2781_v47 = vcombine.low %v4839_v39, %v4842_v40  ;;  %v770_v31 = vunpack.c.l.bf16 %v154_v20  ;;  %v772_v32 = vunpack.c.l.bf16 %v155_v21  ;;  %v708_v46 = vunpack.c.l.bf16 %v123_v34 }
 0x10d   :  { %2166 = vmatpush1.msra.mxu0 %v1058_v35  ;;  %2237 = vmatpush1.msra.mxu1 %v1060_v36  ;;  %v739_v35 = vunpack.c.h.bf16 %v138_v58  ;;  %v741_v36 = vunpack.c.h.bf16 %v139_v28 }
 0x10e   :  { %2167 = vmatprep.subr.mxu0 %v1027_v41  ;;  %2238 = vmatprep.subr.mxu1 %v1029_v42  ;;  %v106_v41 = vld [vmem:[%s5975_s1 + $0x1c0] sm:$0xff]  ;;  %v107_v42 = vld [vmem:[%s5975_s1 + $0x1c8] sm:$0xff] }
 0x10f   :  { %2168 = vmatpush1.msra.mxu0 %v1026_v43  ;;  %2239 = vmatpush1.msra.mxu1 %v1028_v44  ;;  %v707_v43 = vunpack.c.h.bf16 %v122_v33  ;;  %v709_v44 = vunpack.c.h.bf16 %v123_v34  ;;  %v674_v51 = vunpack.c.l.bf16 %v106_v41  ;;  %v676_v52 = vunpack.c.l.bf16 %v107_v42  ;;  %v4959_v33 = vld [vmem:[%s5977_s3] sm:$0xff] }
 0x110   :  { %2169 = vmatprep.subr.mxu0 %v995_v48  ;;  %2240 = vmatprep.subr.mxu1 %v997_v49  ;;  %v90_v48 = vld [vmem:[%s5975_s1 + $0x140] sm:$0xff]  ;;  %v91_v49 = vld [vmem:[%s5975_s1 + $0x148] sm:$0xff] }
 0x111   :  { %2170 = vmatpush1.msra.mxu0 %v994_v23  ;;  %2241 = vmatpush1.msra.mxu1 %v996_v50  ;;  %v675_v23 = vunpack.c.h.bf16 %v106_v41  ;;  %v677_v50 = vunpack.c.h.bf16 %v107_v42  ;;  %v642_v57 = vunpack.c.l.bf16 %v90_v48  ;;  %v644_v59 = vunpack.c.l.bf16 %v91_v49 }
 0x112   :  { %2171 = vmatprep.subr.mxu0 %v963_v53  ;;  %2242 = vmatprep.subr.mxu1 %v965_v54  ;;  %v74_v53 = vld [vmem:[%s5975_s1 + $0xc0] sm:$0xff]  ;;  %v75_v54 = vld [vmem:[%s5975_s1 + $0xc8] sm:$0xff]  ;;  %v4971_v41 = vsub.s32 1, %v4813_v19 }
 0x113   :  { %2172 = vmatpush1.msra.mxu0 %v962_v55  ;;  %2243 = vmatpush1.msra.mxu1 %v964_v56  ;;  %v643_v55 = vunpack.c.h.bf16 %v90_v48  ;;  %v645_v56 = vunpack.c.h.bf16 %v91_v49  ;;  %v610_v1 = vunpack.c.l.bf16 %v74_v53  ;;  %v612_v2 = vunpack.c.l.bf16 %v75_v54 }
 0x114   :  { %2173 = vmatprep.subr.mxu0 %v931_v60  ;;  %2244 = vmatprep.subr.mxu1 %v933_v61  ;;  %v58_v60 = vld [vmem:[%s5975_s1 + $0x40] sm:$0xff]  ;;  %v59_v61 = vld [vmem:[%s5975_s1 + $0x48] sm:$0xff] }
 0x115   :  { %2174 = vmatpush1.msra.mxu0 %v930_v62  ;;  %2245 = vmatpush1.msra.mxu1 %v932_v63  ;;  %v611_v62 = vunpack.c.h.bf16 %v74_v53  ;;  %v613_v63 = vunpack.c.h.bf16 %v75_v54  ;;  %v578_v7 = vunpack.c.l.bf16 %v58_v60  ;;  %v580_v8 = vunpack.c.l.bf16 %v59_v61 }
 0x116   :  { %2175 = vmatprep.subr.mxu0 %v899_v3  ;;  %2246 = vmatprep.subr.mxu1 %v901_v4  ;;  %v554_v3 = vld [vmem:[%s5975_s1 + $0xfc0] sm:$0xff]  ;;  %v555_v4 = vld [vmem:[%s5975_s1 + $0xfc8] sm:$0xff]  ;;  %v4992_v54 = vsub.s32 4, %v4813_v19 }
 0x117   :  { %2176 = vmatpush1.msra.mxu0 %v898_v5  ;;  %2247 = vmatpush1.msra.mxu1 %v900_v6  ;;  %v579_v5 = vunpack.c.h.bf16 %v58_v60  ;;  %v581_v6 = vunpack.c.h.bf16 %v59_v61  ;;  %v1570_v13 = vunpack.c.l.bf16 %v554_v3  ;;  %v1572_v14 = vunpack.c.l.bf16 %v555_v4  ;;  %v443_v60 = vld [vmem:[%s5975_s1 + $0xc48] sm:$0xff] }
 0x118   :  { %2177 = vmatprep.subr.mxu0 %v867_v9  ;;  %2248 = vmatprep.subr.mxu1 %v869_v10  ;;  %v538_v9 = vld [vmem:[%s5975_s1 + $0xf40] sm:$0xff]  ;;  %v539_v10 = vld [vmem:[%s5975_s1 + $0xf48] sm:$0xff] }
 0x119   :  { %2178 = vmatpush1.msra.mxu0 %v866_v11  ;;  %2249 = vmatpush1.msra.mxu1 %v868_v12  ;;  %v1571_v11 = vunpack.c.h.bf16 %v554_v3  ;;  %v1573_v12 = vunpack.c.h.bf16 %v555_v4  ;;  %v1538_v20 = vunpack.c.l.bf16 %v538_v9  ;;  %v1540_v21 = vunpack.c.l.bf16 %v539_v10 }
 0x11a   :  { %2179 = vmatprep.subr.mxu0 %v835_v15  ;;  %2250 = vmatprep.subr.mxu1 %v837_v16  ;;  %v522_v15 = vld [vmem:[%s5975_s1 + $0xec0] sm:$0xff]  ;;  %v523_v16 = vld [vmem:[%s5975_s1 + $0xec8] sm:$0xff] }
 0x11b   :  { %2180 = vmatpush1.msra.mxu0 %v834_v17  ;;  %2251 = vmatpush1.msra.mxu1 %v836_v18  ;;  %v1539_v17 = vunpack.c.h.bf16 %v538_v9  ;;  %v1541_v18 = vunpack.c.h.bf16 %v539_v10  ;;  %v1506_v58 = vunpack.c.l.bf16 %v522_v15  ;;  %v1508_v28 = vunpack.c.l.bf16 %v523_v16 }
 0x11c   :  { %2181 = vmatprep.subr.mxu0 %v803_v22  ;;  %2252 = vmatprep.subr.mxu1 %v805_v24  ;;  %v506_v22 = vld [vmem:[%s5975_s1 + $0xe40] sm:$0xff]  ;;  %v507_v24 = vld [vmem:[%s5975_s1 + $0xe48] sm:$0xff] }
 0x11d   :  { %2182 = vmatpush1.msra.mxu0 %v802_v25  ;;  %2253 = vmatpush1.msra.mxu1 %v804_v26  ;;  %v1507_v25 = vunpack.c.h.bf16 %v522_v15  ;;  %v1509_v26 = vunpack.c.h.bf16 %v523_v16  ;;  %v1474_v34 = vunpack.c.l.bf16 %v506_v22  ;;  %v1348_v15 = vunpack.c.l.bf16 %v443_v60  ;;  %v410_v16 = vld [vmem:[%s5975_s1 + $0xb40] sm:$0xff] }
 0x11e   :  { %2183 = vmatprep.subr.mxu0 %v771_v29  ;;  %2254 = vmatprep.subr.mxu1 %v773_v30  ;;  %v490_v29 = vld [vmem:[%s5975_s1 + $0xdc0] sm:$0xff]  ;;  %v491_v30 = vld [vmem:[%s5975_s1 + $0xdc8] sm:$0xff] }
 0x11f   :  { %2184 = vmatpush1.msra.mxu0 %v770_v31  ;;  %2255 = vmatpush1.msra.mxu1 %v772_v32  ;;  %v1475_v31 = vunpack.c.h.bf16 %v506_v22  ;;  %v1477_v32 = vunpack.c.h.bf16 %v507_v24  ;;  %v1443_v42 = vunpack.c.h.bf16 %v490_v29  ;;  %v1442_v48 = vunpack.c.l.bf16 %v490_v29 }
 0x120   :  { %2185 = vmatprep.subr.mxu0 %v739_v35  ;;  %2256 = vmatprep.subr.mxu1 %v741_v36  ;;  %v1476_v35 = vunpack.c.l.bf16 %v507_v24  ;;  %v474_v36 = vld [vmem:[%s5975_s1 + $0xd40] sm:$0xff]  ;;  %v1444_v49 = vunpack.c.l.bf16 %v491_v30 }
 0x121   :  { %2186 = vmatpush1.msra.mxu0 %v738_v37  ;;  %2257 = vmatpush1.msra.mxu1 %v740_v38  ;;  %v475_v37 = vld [vmem:[%s5975_s1 + $0xd48] sm:$0xff]  ;;  %v4968_v38 = vsub.s32 0, %v4813_v19 }
 0x122   :  { %2187 = vmatprep.subr.mxu0 %v707_v43  ;;  %2258 = vmatprep.subr.mxu1 %v709_v44  ;;  %v1445_v43 = vunpack.c.h.bf16 %v491_v30  ;;  %v4976_v44 = vld [vmem:[%s5978_s2] sm:$0xff]  ;;  %v1413_v53 = vunpack.c.h.bf16 %v475_v37  ;;  %v1283_v30 = vunpack.c.h.bf16 %v410_v16 }
 0x123   :  { %2188 = vmatpush1.msra.mxu0 %v706_v45  ;;  %2259 = vmatpush1.msra.mxu1 %v708_v46  ;;  %v4979_v45 = vsub.s32 2, %v4813_v19  ;;  %v4982_v46 = vsub.s32 3, %v4813_v19  ;;  %v2954_v61 = vrot.slane %v4976_v44, %v4968_v38 }
 0x124   :  { %2189 = vmatprep.subr.mxu0 %v675_v23  ;;  %2260 = vmatprep.subr.mxu1 %v677_v50  ;;  %v458_v23 = vld [vmem:[%s5975_s1 + $0xcc0] sm:$0xff]  ;;  %v459_v50 = vld [vmem:[%s5975_s1 + $0xcc8] sm:$0xff] }
 0x125   :  { %2190 = vmatpush1.msra.mxu0 %v674_v51  ;;  %2261 = vmatpush1.msra.mxu1 %v676_v52  ;;  %v3235_v51 = vunpack.c.l.bf16 %v4959_v33  ;;  %v1411_v52 = vunpack.c.h.bf16 %v474_v36  ;;  %v2966_v3 = vrot.slane %v4976_v44, %v4982_v46  ;;  %v1378_v4 = vunpack.c.l.bf16 %v458_v23 }
 0x126   :  { %2191 = vmatprep.subr.mxu0 %v643_v55  ;;  %2262 = vmatprep.subr.mxu1 %v645_v56  ;;  %v4995_v55 = vsub.s32 6, %v4813_v19  ;;  %v1410_v56 = vunpack.c.l.bf16 %v474_v36 }
 0x127   :  { %2192 = vmatpush1.msra.mxu0 %v642_v57  ;;  %2263 = vmatpush1.msra.mxu1 %v644_v59  ;;  %v1412_v57 = vunpack.c.l.bf16 %v475_v37  ;;  %v442_v59 = vld [vmem:[%s5975_s1 + $0xc40] sm:$0xff]  ;;  %v3258_v9 = vrot.slane %v3235_v51, %v4979_v45 }
 0x128   :  { %2193 = vmatprep.subr.mxu0 %v611_v62  ;;  %2264 = vmatprep.subr.mxu1 %v613_v63  ;;  %v2958_v62 = vrot.slane %v4976_v44, %v4971_v41  ;;  %v1379_v63 = vunpack.c.h.bf16 %v458_v23  ;;  %v1347_v10 = vunpack.c.h.bf16 %v442_v59  ;;  %v378_v37 = vld [vmem:[%s5975_s1 + $0xa40] sm:$0xff] }
 0x129   :  { %2194 = vmatpush1.msra.mxu0 %v610_v1  ;;  %2265 = vmatpush1.msra.mxu1 %v612_v2  ;;  %v1381_v1 = vunpack.c.h.bf16 %v459_v50  ;;  %v2962_v2 = vrot.slane %v4976_v44, %v4979_v45  ;;  %v3418_v29 = vrot.slane %v3258_v9, %v4968_v38  ;;  %v331_v9 = vld [vmem:[%s5975_s1 + $0x8c8] sm:$0xff] }
 0x12a   :  { %2195 = vmatprep.subr.mxu0 %v579_v5  ;;  %2266 = vmatprep.subr.mxu1 %v581_v6  ;;  %v1380_v5 = vunpack.c.l.bf16 %v459_v50  ;;  %v426_v6 = vld [vmem:[%s5975_s1 + $0xbc0] sm:$0xff] }
 0x12b   :  { %2196 = vmatpush1.msra.mxu0 %v578_v7  ;;  %2267 = vmatpush1.msra.mxu1 %v580_v8  ;;  %v427_v7 = vld [vmem:[%s5975_s1 + $0xbc8] sm:$0xff]  ;;  %v3254_v8 = vrot.slane %v3235_v51, %v4968_v38  ;;  %v3080_v22 = vcombine.low %v2962_v2, %v2966_v3  ;;  %v1314_v24 = vunpack.c.l.bf16 %v426_v6 }
 0x12c   :  { %2197 = vmatprep.subr.mxu0 %v1571_v11  ;;  %2268 = vmatprep.subr.mxu1 %v1573_v12  ;;  %v1349_v11 = vunpack.c.h.bf16 %v443_v60  ;;  %v3262_v12 = vrot.slane %v3235_v51, %v4992_v54 }
 0x12d   :  { %2198 = vmatpush2.msra.mxu0 %v1570_v13  ;;  %2269 = vmatpush2.msra.mxu1 %v1572_v14  ;;  %v3266_v13 = vrot.slane %v3235_v51, %v4995_v55  ;;  %v1346_v14 = vunpack.c.l.bf16 %v442_v59  ;;  %v3094_v23 = vrot.slane %v3080_v22, %v4822_v27  ;;  %v2970_v22 = vrot.slane %v4976_v44, %v4992_v54 }
 0x12e   :  { %2199 = vmatprep.subr.mxu0 %v1539_v17  ;;  %2270 = vmatprep.subr.mxu1 %v1541_v18  ;;  %v411_v17 = vld [vmem:[%s5975_s1 + $0xb48] sm:$0xff]  ;;  %v1315_v18 = vunpack.c.h.bf16 %v426_v6 }
 0x12f   :  { %2200 = vmatpush2.msra.mxu0 %v1538_v20  ;;  %2271 = vmatpush2.msra.mxu1 %v1540_v21  ;;  %v1317_v20 = vunpack.c.h.bf16 %v427_v7  ;;  %v3079_v21 = vcombine.low %v2954_v61, %v2958_v62  ;;  %v1284_v36 = vunpack.c.l.bf16 %v411_v17  ;;  %v1218_v61 = vunpack.c.l.bf16 %v378_v37 }
 0x130   :  { %2201 = vmatprep.subr.mxu0 %v1507_v25  ;;  %2272 = vmatprep.subr.mxu1 %v1509_v26  ;;  %v1316_v25 = vunpack.c.l.bf16 %v427_v7  ;;  %v394_v26 = vld [vmem:[%s5975_s1 + $0xac0] sm:$0xff] }
 0x131   :  { %2202 = vmatpush2.msra.mxu0 %v1506_v58  ;;  %2273 = vmatpush2.msra.mxu1 %v1508_v28  ;;  %v395_v58 = vld [vmem:[%s5975_s1 + $0xac8] sm:$0xff]  ;;  %v3414_v28 = vrot.slane %v3254_v8, %v4968_v38  ;;  %v1250_v50 = vunpack.c.l.bf16 %v394_v26 }
 0x132   :  { %2203 = vmatprep.subr.mxu0 %v1475_v31  ;;  %2274 = vmatprep.subr.mxu1 %v1477_v32  ;;  %v1285_v31 = vunpack.c.h.bf16 %v411_v17  ;;  %v3422_v32 = vrot.slane %v3262_v12, %v4968_v38  ;;  %v1252_v51 = vunpack.c.l.bf16 %v395_v58 }
 0x133   :  { %2204 = vmatpush2.msra.mxu0 %v1474_v34  ;;  %2275 = vmatpush2.msra.mxu1 %v1476_v35  ;;  %v3426_v34 = vrot.slane %v3266_v13, %v4968_v38  ;;  %v1282_v35 = vunpack.c.l.bf16 %v410_v16  ;;  %v3571_v59 = vcombine.low %v3414_v28, %v3418_v29 }
 0x134   :  { %2205 = vmatprep.subr.mxu0 %v1443_v42  ;;  %2276 = vmatprep.subr.mxu1 %v1445_v43  ;;  %v379_v42 = vld [vmem:[%s5975_s1 + $0xa48] sm:$0xff]  ;;  %v1251_v43 = vunpack.c.h.bf16 %v394_v26  ;;  %v5087_v26 = vld [vmem:[%s5975_s1 + $0x7d0] sm:$0xff] }
 0x135   :  { %2206 = vmatpush2.msra.mxu0 %v1442_v48  ;;  %2277 = vmatpush2.msra.mxu1 %v1444_v49  ;;  %v1253_v48 = vunpack.c.h.bf16 %v395_v58  ;;  %v3087_v49 = vrot.slane %v3079_v21, %v4822_v27  ;;  %v3572_v60 = vcombine.low %v3422_v32, %v3426_v34  ;;  %v1220_v62 = vunpack.c.l.bf16 %v379_v42 }
 0x136   :  { %2207 = vmatprep.subr.mxu0 %v1411_v52  ;;  %2278 = vmatprep.subr.mxu1 %v1413_v53  ;;  %v362_v52 = vld [vmem:[%s5975_s1 + $0x9c0] sm:$0xff]  ;;  %v363_v53 = vld [vmem:[%s5975_s1 + $0x9c8] sm:$0xff]  ;;  %v1125_v21 = vunpack.c.h.bf16 %v331_v9  ;;  %v2978_v58 = vrot.slane %v4976_v44, %v4995_v55 }
 0x137   :  { %2208 = vmatpush2.msra.mxu0 %v1410_v56  ;;  %2279 = vmatpush2.msra.mxu1 %v1412_v57  ;;  %v1219_v56 = vunpack.c.h.bf16 %v378_v37  ;;  %v1221_v57 = vunpack.c.h.bf16 %v379_v42  ;;  %v1187_v2 = vunpack.c.h.bf16 %v362_v52  ;;  %v1189_v3 = vunpack.c.h.bf16 %v363_v53 }
 0x138   :  { %2209 = vmatprep.subr.mxu0 %v1379_v63  ;;  %2280 = vmatprep.subr.mxu1 %v1381_v1  ;;  %v346_v63 = vld [vmem:[%s5975_s1 + $0x940] sm:$0xff]  ;;  %v347_v1 = vld [vmem:[%s5975_s1 + $0x948] sm:$0xff]  ;;  %v3095_v6 = vcombine.low %v3087_v49, %v3094_v23  ;;  %v1186_v7 = vunpack.c.l.bf16 %v362_v52  ;;  %v1188_v8 = vunpack.c.l.bf16 %v363_v53 }
 0x139   :  { %2210 = vmatpush2.msra.mxu0 %v1378_v4  ;;  %2281 = vmatpush2.msra.mxu1 %v1380_v5  ;;  %v330_v4 = vld [vmem:[%s5975_s1 + $0x8c0] sm:$0xff]  ;;  %v5061_v5 = vsub.s32 5, %v4813_v19  ;;  %v1155_v12 = vunpack.c.h.bf16 %v346_v63  ;;  %v1157_v13 = vunpack.c.h.bf16 %v347_v1  ;;  %v1154_v16 = vunpack.c.l.bf16 %v346_v63 }
 0x13a   :  { %2211 = vmatprep.subr.mxu0 %v1347_v10  ;;  %2282 = vmatprep.subr.mxu1 %v1349_v11  ;;  %v5067_v10 = vsub.s32 7, %v4813_v19  ;;  %v5070_v11 = vunpack.c.h.bf16 %v4959_v33  ;;  %v1156_v17 = vunpack.c.l.bf16 %v347_v1  ;;  %v314_v19 = vld [vmem:[%s5975_s1 + $0x840] sm:$0xff]  ;;  %v315_v33 = vld [vmem:[%s5975_s1 + $0x848] sm:$0xff]  ;;  %v3223_v32 = vadd.f32 %v3095_v6, %v2781_v47 }
 0x13b   :  { %2212 = vmatpush2.msra.mxu0 %v1346_v14  ;;  %2283 = vmatpush2.msra.mxu1 %v1348_v15  ;;  %v3579_v14 = vrot.slane %v3571_v59, %v4822_v27  ;;  %v3586_v15 = vrot.slane %v3572_v60, %v4822_v27  ;;  %v1092_v40 = vunpack.c.l.bf16 %v315_v33  ;;  %v1063_v47 = vunpack.c.h.bf16 %v5087_v26 }
 0x13c   :  { %2213 = vmatprep.subr.mxu0 %v1315_v18  ;;  %2284 = vmatprep.subr.mxu1 %v1317_v20  ;;  %v1123_v18 = vunpack.c.h.bf16 %v330_v4  ;;  %v1122_v20 = vunpack.c.l.bf16 %v330_v4  ;;  %v2982_v28 = vrot.slane %v4976_v44, %v5067_v10  ;;  %v3270_v29 = vrot.slane %v5070_v11, %v4968_v38 }
 0x13d   :  { %2214 = vmatpush2.msra.mxu0 %v1314_v24  ;;  %2285 = vmatpush2.msra.mxu1 %v1316_v25  ;;  %v2974_v24 = vrot.slane %v4976_v44, %v5061_v5  ;;  %v1124_v25 = vunpack.c.l.bf16 %v331_v9  ;;  %v3587_v34 = vcombine.low %v3579_v14, %v3586_v15  ;;  %v301_v44 = vld [vmem:[%s5975_s1 + $0x7d8] sm:$0xff]  ;;  %v3274_v42 = vrot.slane %v5070_v11, %v4979_v45 }
 0x13e   :  { %2215 = vmatprep.subr.mxu0 %v1283_v30  ;;  %2286 = vmatprep.subr.mxu1 %v1285_v31  ;;  %v1091_v30 = vunpack.c.h.bf16 %v314_v19  ;;  %v1093_v31 = vunpack.c.h.bf16 %v315_v33  ;;  %v3282_v39 = vrot.slane %v5070_v11, %v4995_v55  ;;  %v5117_v53 = vcombine.low %v2978_v58, %v2982_v28 }
 0x13f   :  { %2216 = vmatpush2.msra.mxu0 %v1282_v35  ;;  %2287 = vmatpush2.msra.mxu1 %v1284_v36  ;;  %v1090_v35 = vunpack.c.l.bf16 %v314_v19  ;;  %v5115_v52 = vcombine.low %v2970_v22, %v2974_v24  ;;  %v5128_v63 = vmul.f32 %v3587_v34, %v3223_v32  ;;  %v1064_v1 = vunpack.c.l.bf16 %v301_v44  ;;  %v236_v22 = vld [vmem:[%s5975_s1 + $0x5d0] sm:$0xff]  ;;  %v237_v24 = vld [vmem:[%s5975_s1 + $0x5d8] sm:$0xff] }
 0x140   :  { %2217 = vmatprep.subr.mxu0 %v1251_v43  ;;  %2288 = vmatprep.subr.mxu1 %v1253_v48  ;;  %v3278_v43 = vrot.slane %v5070_v11, %v4992_v54  ;;  %v1062_v48 = vunpack.c.l.bf16 %v5087_v26  ;;  %v3442_v4 = vrot.slane %v3282_v39, %v4968_v38  ;;  %v5144_v11 = vld.sshfl [vmem:[%s5976_s0] sm:$0x33 pattern:$0x76325410]  ;;  %v220_v32 = vld [vmem:[%s5975_s1 + $0x550] sm:$0xff]  ;;  %v221_v34 = vld [vmem:[%s5975_s1 + $0x558] sm:$0xff] }
 0x141   :  { %2218 = vmatpush2.msra.mxu0 %v1250_v50  ;;  %2289 = vmatpush2.msra.mxu1 %v1252_v51  ;;  %v284_v50 = vld [vmem:[%s5975_s1 + $0x750] sm:$0xff]  ;;  %v285_v51 = vld [vmem:[%s5975_s1 + $0x758] sm:$0xff]  ;;  %v3104_v33 = vrot.slane %v5115_v52, %v4822_v27  ;;  %v904_v52 = vunpack.c.l.bf16 %v221_v34 }
 0x142   :  { %2219 = vmatprep.subr.mxu0 %v1219_v56  ;;  %2290 = vmatprep.subr.mxu1 %v1221_v57  ;;  %v5120_v56 = vrot.slane %v3270_v29, %v4968_v38  ;;  %v1065_v57 = vunpack.c.h.bf16 %v301_v44  ;;  %v1033_v9 = vunpack.c.h.bf16 %v285_v51  ;;  %v205_v39 = vld [vmem:[%s5975_s1 + $0x4d8] sm:$0xff] }
 0x143   :  { %2220 = vmatpush2.msra.mxu0 %v1218_v61  ;;  %2291 = vmatpush2.msra.mxu1 %v1220_v62  ;;  %v268_v61 = vld [vmem:[%s5975_s1 + $0x6d0] sm:$0xff]  ;;  %v269_v62 = vld [vmem:[%s5975_s1 + $0x6d8] sm:$0xff] }
 0x144   :  { %2221 = vmatprep.subr.mxu0 %v1187_v2  ;;  %2292 = vmatprep.subr.mxu1 %v1189_v3  ;;  %v3434_v2 = vrot.slane %v3274_v42, %v4968_v38  ;;  %v3438_v3 = vrot.slane %v3278_v43, %v4968_v38  ;;  %v999_v14 = vunpack.c.h.bf16 %v268_v61  ;;  %v1001_v15 = vunpack.c.h.bf16 %v269_v62  ;;  %v204_v43 = vld [vmem:[%s5975_s1 + $0x4d0] sm:$0xff] }
 0x145   :  { %2222 = vmatpush2.msra.mxu0 %v1186_v7  ;;  %2293 = vmatpush2.msra.mxu1 %v1188_v8  ;;  %v1031_v8 = vunpack.c.h.bf16 %v284_v50  ;;  %v998_v19 = vunpack.c.l.bf16 %v268_v61  ;;  %v936_v42 = vunpack.c.l.bf16 %v237_v24  ;;  %v870_v61 = vunpack.c.l.bf16 %v204_v43 }
 0x146   :  { %2223 = vmatprep.subr.mxu0 %v1155_v12  ;;  %2294 = vmatprep.subr.mxu1 %v1157_v13  ;;  %v1030_v12 = vunpack.c.l.bf16 %v284_v50  ;;  %v1032_v13 = vunpack.c.l.bf16 %v285_v51  ;;  %v3588_v26 = vcombine.low %v5120_v56, %v3434_v2  ;;  %v3589_v58 = vcombine.low %v3438_v3, %v3442_v4  ;;  %v189_v56 = vld [vmem:[%s5975_s1 + $0x458] sm:$0xff] }
 0x147   :  { %2224 = vmatpush2.msra.mxu0 %v1154_v16  ;;  %2295 = vmatpush2.msra.mxu1 %v1156_v17  ;;  %v1805_v36 = vpop.f32.mrf.mxu0  ;;  %v1876_v37 = vpop.f32.mrf.mxu1  ;;  %v252_v16 = vld [vmem:[%s5975_s1 + $0x650] sm:$0xff]  ;;  %v253_v17 = vld [vmem:[%s5975_s1 + $0x658] sm:$0xff]  ;;  %v3731_v50 = vcombine.high %v5128_v63, %v5128_v63  ;;  %v902_v51 = vunpack.c.l.bf16 %v220_v32 }
 0x148   :  { %2225 = vmatprep.subr.mxu0 %v1123_v18  ;;  %2296 = vmatprep.subr.mxu1 %v1125_v21  ;;  %v1000_v21 = vunpack.c.l.bf16 %v269_v62  ;;  %v967_v28 = vunpack.c.h.bf16 %v252_v16  ;;  %v969_v29 = vunpack.c.h.bf16 %v253_v17  ;;  %v872_v62 = vunpack.c.l.bf16 %v205_v39 }
 0x149   :  { %2226 = vmatpush2.msra.mxu0 %v1122_v20  ;;  %2297 = vmatpush2.msra.mxu1 %v1124_v25  ;;  %v1807_v49 = vpop.f32.mrf.mxu0  ;;  %v1878_v23 = vpop.f32.mrf.mxu1  ;;  %v5160_v20 = vrot.slane %v5128_v63, %v4822_v27  ;;  %v3111_v25 = vrot.slane %v5117_v53, %v4822_v27  ;;  %v188_v53 = vld [vmem:[%s5975_s1 + $0x450] sm:$0xff] }
 0x14a   :  { %2227 = vmatprep.subr.mxu0 %v1091_v30  ;;  %2298 = vmatprep.subr.mxu1 %v1093_v31  ;;  %v2782_v59 = vcombine.low %v1805_v36, %v1807_v49  ;;  %v2783_v60 = vcombine.low %v1876_v37, %v1878_v23  ;;  %v966_v30 = vunpack.c.l.bf16 %v252_v16  ;;  %v968_v31 = vunpack.c.l.bf16 %v253_v17  ;;  %v172_v63 = vld [vmem:[%s5975_s1 + $0x3d0] sm:$0xff] }
 0x14b   :  { %2228 = vmatpush2.msra.mxu0 %v1090_v35  ;;  %2229 = vmatprep.mubr.f32.mxu0 %v4218_v0  ;;  %v934_v35 = vunpack.c.l.bf16 %v236_v22  ;;  %v935_v36 = vunpack.c.h.bf16 %v236_v22  ;;  %v937_v37 = vunpack.c.h.bf16 %v237_v24  ;;  %v3746_v44 = vcombine.high %v5160_v20, %v5160_v20 }
 0x14c   :  { %2299 = vmatpush2.msra.mxu1 %v1092_v40  ;;  %2300 = vmatprep.mubr.f32.mxu1 %v4218_v0  ;;  %v5136_v6 = vrot.slane %v2782_v59, %v4822_v27  ;;  %v5139_v7 = vrot.slane %v2783_v60, %v4822_v27  ;;  %v3112_v40 = vcombine.low %v3104_v33, %v3111_v25  ;;  %v903_v49 = vunpack.c.h.bf16 %v220_v32  ;;  %v140_v33 = vld [vmem:[%s5975_s1 + $0x2d0] sm:$0xff] }
 0x14d   :  { %2230 = vmatmul.mubr.f32.vlgmr.msra.gmra.mxu0 %v5144_v11  ;;  %2301 = vmatmul.mubr.f32.vlgmr.msra.gmra.mxu1 %v5144_v11  ;;  %v905_v23 = vunpack.c.h.bf16 %v221_v34  ;;  %v873_v59 = vunpack.c.h.bf16 %v205_v39  ;;  %v3900_v60 = vsel %vm33_vm0, %v3746_v44, 0.0  ;;  %v839_v4 = vunpack.c.h.bf16 %v188_v53  ;;  %v109_v44 = vld [vmem:[%s5975_s1 + $0x1d8] sm:$0xff] }
 0x14e   :  { %2307 = vmatprep.subr.mxu0 %v1063_v47  ;;  %2378 = vmatprep.subr.mxu1 %v1065_v57  ;;  %v2798_v18 = vcombine.low %v5136_v6, %v5139_v7  ;;  %v3596_v47 = vrot.slane %v3588_v26, %v4822_v27  ;;  %v871_v57 = vunpack.c.h.bf16 %v204_v43  ;;  %v841_v6 = vunpack.c.h.bf16 %v189_v56 }
 0x14f   :  { %2308 = vmatpush1.msra.mxu0 %v1062_v48  ;;  %2379 = vmatpush1.msra.mxu1 %v1064_v1  ;;  %v3603_v48 = vrot.slane %v3589_v58, %v4822_v27  ;;  %v173_v1 = vld [vmem:[%s5975_s1 + $0x3d8] sm:$0xff]  ;;  %v3745_v7 = vrot.slane %v3731_v50, %v4822_v27  ;;  %v807_v16 = vunpack.c.h.bf16 %v172_v63  ;;  %v743_v32 = vunpack.c.h.bf16 %v140_v33 }
 0x150   :  { %2309 = vmatprep.subr.mxu0 %v1031_v8  ;;  %2380 = vmatprep.subr.mxu1 %v1033_v9  ;;  %v3224_v2 = vadd.f32 %v3112_v40, %v2798_v18  ;;  %v3899_v8 = vsel %vm33_vm0, %v5160_v20, 0.0  ;;  %v838_v9 = vunpack.c.l.bf16 %v188_v53  ;;  %v809_v17 = vunpack.c.h.bf16 %v173_v1  ;;  %v141_v20 = vld [vmem:[%s5975_s1 + $0x2d8] sm:$0xff] }
 0x151   :  { %2310 = vmatpush1.msra.mxu0 %v1030_v12  ;;  %2381 = vmatpush1.msra.mxu1 %v1032_v13  ;;  %v3604_v3 = vcombine.low %v3596_v47, %v3603_v48  ;;  %v840_v12 = vunpack.c.l.bf16 %v189_v56  ;;  %v156_v13 = vld [vmem:[%s5975_s1 + $0x350] sm:$0xff]  ;;  %v806_v18 = vunpack.c.l.bf16 %v172_v63  ;;  %v3747_v25 = vcombine.high %v3745_v7, %v3745_v7  ;;  %v93_v50 = vld [vmem:[%s5975_s1 + $0x158] sm:$0xff] }
 0x152   :  { %2311 = vmatprep.subr.mxu0 %v999_v14  ;;  %2382 = vmatprep.subr.mxu1 %v1001_v15  ;;  %v157_v14 = vld [vmem:[%s5975_s1 + $0x358] sm:$0xff]  ;;  %v3901_v15 = vadd.f32 %v3900_v60, %v3899_v8  ;;  %v775_v22 = vunpack.c.h.bf16 %v156_v13  ;;  %v3902_v26 = vsel %vm33_vm0, %v3745_v7, 0.0  ;;  %v774_v58 = vunpack.c.l.bf16 %v156_v13 }
 0x153   :  { %2312 = vmatpush1.msra.mxu0 %v998_v19  ;;  %2383 = vmatpush1.msra.mxu1 %v1000_v21  ;;  %v808_v19 = vunpack.c.l.bf16 %v173_v1  ;;  %v3716_v21 = vmul.f32 %v3604_v3, %v3224_v2  ;;  %v777_v24 = vunpack.c.h.bf16 %v157_v14  ;;  %v745_v34 = vunpack.c.h.bf16 %v141_v20  ;;  %v77_v63 = vld [vmem:[%s5975_s1 + $0xd8] sm:$0xff] }
 0x154   :  { %2313 = vmatprep.subr.mxu0 %v967_v28  ;;  %2384 = vmatprep.subr.mxu1 %v969_v29  ;;  %v776_v28 = vunpack.c.l.bf16 %v157_v14  ;;  %v124_v29 = vld [vmem:[%s5975_s1 + $0x250] sm:$0xff]  ;;  %v3904_v48 = vsel %vm33_vm0, %v3747_v25, 0.0  ;;  %v649_v3 = vunpack.c.h.bf16 %v93_v50  ;;  %v648_v8 = vunpack.c.l.bf16 %v93_v50 }
 0x155   :  { %2314 = vmatpush1.msra.mxu0 %v966_v30  ;;  %2385 = vmatpush1.msra.mxu1 %v968_v31  ;;  %v125_v30 = vld [vmem:[%s5975_s1 + $0x258] sm:$0xff]  ;;  %v3903_v31 = vadd.f32 %v3902_v26, %v3901_v15  ;;  %v3755_v43 = vrot.slane %v3716_v21, %v4822_v27  ;;  %v710_v39 = vunpack.c.l.bf16 %v124_v29  ;;  %v711_v40 = vunpack.c.h.bf16 %v124_v29  ;;  %v492_v50 = vld [vmem:[%s5975_s1 + $0xdd0] sm:$0xff] }
 0x156   :  { %2315 = vmatprep.subr.mxu0 %v935_v36  ;;  %2386 = vmatprep.subr.mxu1 %v937_v37  ;;  %v744_v36 = vunpack.c.l.bf16 %v141_v20  ;;  %v108_v37 = vld [vmem:[%s5975_s1 + $0x1d0] sm:$0xff]  ;;  %v713_v47 = vunpack.c.h.bf16 %v125_v30  ;;  %v617_v15 = vunpack.c.h.bf16 %v77_v63 }
 0x157   :  { %2316 = vmatpush1.msra.mxu0 %v934_v35  ;;  %2387 = vmatpush1.msra.mxu1 %v936_v42  ;;  %v742_v35 = vunpack.c.l.bf16 %v140_v33  ;;  %v3748_v42 = vcombine.high %v3716_v21, %v3716_v21  ;;  %v3905_v53 = vadd.f32 %v3904_v48, %v3903_v31  ;;  %v679_v56 = vunpack.c.h.bf16 %v108_v37  ;;  %v557_v33 = vld [vmem:[%s5975_s1 + $0xfd8] sm:$0xff] }
 0x158   :  { %2317 = vmatprep.subr.mxu0 %v903_v49  ;;  %2388 = vmatprep.subr.mxu1 %v905_v23  ;;  %v712_v49 = vunpack.c.l.bf16 %v125_v30  ;;  %v92_v23 = vld [vmem:[%s5975_s1 + $0x150] sm:$0xff]  ;;  %v678_v60 = vunpack.c.l.bf16 %v108_v37  ;;  %v1577_v31 = vunpack.c.h.bf16 %v557_v33 }
 0x159   :  { %2318 = vmatpush1.msra.mxu0 %v902_v51  ;;  %2389 = vmatpush1.msra.mxu1 %v904_v52  ;;  %v3762_v51 = vrot.slane %v3748_v42, %v4822_v27  ;;  %v3763_v52 = vcombine.high %v3755_v43, %v3755_v43  ;;  %v647_v2 = vunpack.c.h.bf16 %v92_v23  ;;  %v646_v7 = vunpack.c.l.bf16 %v92_v23 }
 0x15a   :  { %2319 = vmatprep.subr.mxu0 %v871_v57  ;;  %2390 = vmatprep.subr.mxu1 %v873_v59  ;;  %v681_v57 = vunpack.c.h.bf16 %v109_v44  ;;  %v3906_v59 = vsel %vm33_vm0, %v3755_v43, 0.0 }
 0x15b   :  { %2320 = vmatpush1.msra.mxu0 %v870_v61  ;;  %2391 = vmatpush1.msra.mxu1 %v872_v62  ;;  %v680_v61 = vunpack.c.l.bf16 %v109_v44  ;;  %v76_v62 = vld [vmem:[%s5975_s1 + $0xd0] sm:$0xff]  ;;  %v3907_v1 = vadd.f32 %v3906_v59, %v3905_v53 }
 0x15c   :  { %2321 = vmatprep.subr.mxu0 %v839_v4  ;;  %2392 = vmatprep.subr.mxu1 %v841_v6  ;;  %v3764_v4 = vcombine.high %v3762_v51, %v3762_v51  ;;  %v3908_v6 = vsel %vm33_vm0, %v3763_v52, 0.0  ;;  %v615_v14 = vunpack.c.h.bf16 %v76_v62  ;;  %v476_v59 = vld [vmem:[%s5975_s1 + $0xd50] sm:$0xff] }
 0x15d   :  { %2322 = vmatpush1.msra.mxu0 %v838_v9  ;;  %2393 = vmatpush1.msra.mxu1 %v840_v12  ;;  %v60_v9 = vld [vmem:[%s5975_s1 + $0x50] sm:$0xff]  ;;  %v61_v12 = vld [vmem:[%s5975_s1 + $0x58] sm:$0xff]  ;;  %v3909_v13 = vadd.f32 %v3908_v6, %v3907_v1 }
 0x15e   :  { %2323 = vmatprep.subr.mxu0 %v807_v16  ;;  %2394 = vmatprep.subr.mxu1 %v809_v17  ;;  %v3910_v16 = vsel %vm33_vm0, %v3762_v51, 0.0  ;;  %v614_v17 = vunpack.c.l.bf16 %v76_v62  ;;  %v583_v21 = vunpack.c.h.bf16 %v60_v9  ;;  %v582_v25 = vunpack.c.l.bf16 %v60_v9  ;;  %v493_v51 = vld [vmem:[%s5975_s1 + $0xdd8] sm:$0xff]  ;;  %v444_v9 = vld [vmem:[%s5975_s1 + $0xc50] sm:$0xff] }
 0x15f   :  { %2324 = vmatpush1.msra.mxu0 %v806_v18  ;;  %2395 = vmatpush1.msra.mxu1 %v808_v19  ;;  %v616_v18 = vunpack.c.l.bf16 %v77_v63  ;;  %v556_v19 = vld [vmem:[%s5975_s1 + $0xfd0] sm:$0xff]  ;;  %v3911_v20 = vadd.f32 %v3910_v16, %v3909_v13  ;;  %v584_v26 = vunpack.c.l.bf16 %v61_v12  ;;  %v1449_v62 = vunpack.c.h.bf16 %v493_v51 }
 0x160   :  { %2325 = vmatprep.subr.mxu0 %v775_v22  ;;  %2396 = vmatprep.subr.mxu1 %v777_v24  ;;  %v585_v22 = vunpack.c.h.bf16 %v61_v12  ;;  %v3912_v24 = vsel %vm33_vm0, %v3764_v4, 0.0  ;;  %v1575_v30 = vunpack.c.h.bf16 %v556_v19  ;;  %v1446_v63 = vunpack.c.l.bf16 %v492_v50  ;;  %v445_v12 = vld [vmem:[%s5975_s1 + $0xc58] sm:$0xff] }
 0x161   :  { %2326 = vmatpush1.msra.mxu0 %v774_v58  ;;  %2397 = vmatpush1.msra.mxu1 %v776_v28  ;;  %v540_v58 = vld [vmem:[%s5975_s1 + $0xf50] sm:$0xff]  ;;  %v541_v28 = vld [vmem:[%s5975_s1 + $0xf58] sm:$0xff]  ;;  %v5267_v29 = vadd.f32 %v3912_v24, %v3911_v20  ;;  %v1448_v1 = vunpack.c.l.bf16 %v493_v51  ;;  %v1415_v4 = vunpack.c.h.bf16 %v476_v59  ;;  %v1350_v20 = vunpack.c.l.bf16 %v444_v9 }
 0x162   :  { %2327 = vmatprep.subr.mxu0 %v743_v32  ;;  %2398 = vmatprep.subr.mxu1 %v745_v34  ;;  %v1574_v32 = vunpack.c.l.bf16 %v556_v19  ;;  %v1576_v34 = vunpack.c.l.bf16 %v557_v33  ;;  %v1543_v37 = vunpack.c.h.bf16 %v540_v58  ;;  %v1545_v44 = vunpack.c.h.bf16 %v541_v28  ;;  %v413_v24 = vld [vmem:[%s5975_s1 + $0xb58] sm:$0xff] }
 0x163   :  { %2328 = vmatpush1.msra.mxu0 %v742_v35  ;;  %2399 = vmatpush1.msra.mxu1 %v744_v36  ;;  %v524_v35 = vld [vmem:[%s5975_s1 + $0xed0] sm:$0xff]  ;;  %v525_v36 = vld [vmem:[%s5975_s1 + $0xed8] sm:$0xff]  ;;  %v1542_v42 = vunpack.c.l.bf16 %v540_v58  ;;  %v1544_v43 = vunpack.c.l.bf16 %v541_v28  ;;  %v1351_v19 = vunpack.c.h.bf16 %v444_v9  ;;  %v1353_v33 = vunpack.c.h.bf16 %v445_v12 }
 0x164   :  { %2329 = vmatprep.subr.mxu0 %v711_v40  ;;  %2400 = vmatprep.subr.mxu1 %v713_v47  ;;  %v509_v40 = vld [vmem:[%s5975_s1 + $0xe58] sm:$0xff]  ;;  %v1511_v47 = vunpack.c.h.bf16 %v524_v35  ;;  %v1513_v48 = vunpack.c.h.bf16 %v525_v36  ;;  %v1512_v23 = vunpack.c.l.bf16 %v525_v36  ;;  %v1288_v36 = vunpack.c.l.bf16 %v413_v24 }
 0x165   :  { %2330 = vmatpush1.msra.mxu0 %v710_v39  ;;  %2401 = vmatpush1.msra.mxu1 %v712_v49  ;;  %v508_v39 = vld [vmem:[%s5975_s1 + $0xe50] sm:$0xff]  ;;  %v1510_v49 = vunpack.c.l.bf16 %v524_v35  ;;  %v1481_v53 = vunpack.c.h.bf16 %v509_v40 }
 0x166   :  { %2331 = vmatprep.subr.mxu0 %v679_v56  ;;  %2402 = vmatprep.subr.mxu1 %v681_v57  ;;  %v1479_v52 = vunpack.c.h.bf16 %v508_v39  ;;  %v1478_v56 = vunpack.c.l.bf16 %v508_v39  ;;  %v1480_v57 = vunpack.c.l.bf16 %v509_v40 }
 0x167   :  { %2332 = vmatpush1.msra.mxu0 %v678_v60  ;;  %2403 = vmatpush1.msra.mxu1 %v680_v61  ;;  %v477_v60 = vld [vmem:[%s5975_s1 + $0xd58] sm:$0xff]  ;;  %v1447_v61 = vunpack.c.h.bf16 %v492_v50 }
 0x168   :  { %2333 = vmatprep.subr.mxu0 %v647_v2  ;;  %2404 = vmatprep.subr.mxu1 %v649_v3  ;;  %v460_v2 = vld [vmem:[%s5975_s1 + $0xcd0] sm:$0xff]  ;;  %v461_v3 = vld [vmem:[%s5975_s1 + $0xcd8] sm:$0xff]  ;;  %v1417_v6 = vunpack.c.h.bf16 %v477_v60 }
 0x169   :  { %2334 = vmatpush1.msra.mxu0 %v646_v7  ;;  %2405 = vmatpush1.msra.mxu1 %v648_v8  ;;  %v1414_v7 = vunpack.c.l.bf16 %v476_v59  ;;  %v1416_v8 = vunpack.c.l.bf16 %v477_v60  ;;  %v1383_v13 = vunpack.c.h.bf16 %v460_v2  ;;  %v1384_v16 = vunpack.c.l.bf16 %v461_v3  ;;  %v332_v60 = vld [vmem:[%s5975_s1 + $0x8d0] sm:$0xff] }
 0x16a   :  { %2335 = vmatprep.subr.mxu0 %v615_v14  ;;  %2406 = vmatprep.subr.mxu1 %v617_v15  ;;  %v1385_v14 = vunpack.c.h.bf16 %v461_v3  ;;  %v1382_v15 = vunpack.c.l.bf16 %v460_v2 }
 0x16b   :  { %2336 = vmatpush1.msra.mxu0 %v614_v17  ;;  %2407 = vmatpush1.msra.mxu1 %v616_v18  ;;  %v428_v17 = vld [vmem:[%s5975_s1 + $0xbd0] sm:$0xff]  ;;  %v429_v18 = vld [vmem:[%s5975_s1 + $0xbd8] sm:$0xff] }
 0x16c   :  { %2337 = vmatprep.subr.mxu0 %v583_v21  ;;  %2408 = vmatprep.subr.mxu1 %v585_v22  ;;  %v1352_v21 = vunpack.c.l.bf16 %v445_v12  ;;  %v412_v22 = vld [vmem:[%s5975_s1 + $0xb50] sm:$0xff]  ;;  %v1318_v58 = vunpack.c.l.bf16 %v428_v17  ;;  %v1320_v28 = vunpack.c.l.bf16 %v429_v18 }
 0x16d   :  { %2338 = vmatpush1.msra.mxu0 %v582_v25  ;;  %2409 = vmatpush1.msra.mxu1 %v584_v26  ;;  %v1319_v25 = vunpack.c.h.bf16 %v428_v17  ;;  %v1321_v26 = vunpack.c.h.bf16 %v429_v18  ;;  %v1286_v35 = vunpack.c.l.bf16 %v412_v22  ;;  %v316_v12 = vld [vmem:[%s5975_s1 + $0x850] sm:$0xff] }
 0x16e   :  { %2339 = vmatprep.subr.mxu0 %v1575_v30  ;;  %2410 = vmatprep.subr.mxu1 %v1577_v31  ;;  %v396_v30 = vld [vmem:[%s5975_s1 + $0xad0] sm:$0xff]  ;;  %v397_v31 = vld [vmem:[%s5975_s1 + $0xad8] sm:$0xff] }
 0x16f   :  { %2340 = vmatpush2.msra.mxu0 %v1574_v32  ;;  %2411 = vmatpush2.msra.mxu1 %v1576_v34  ;;  %v1287_v32 = vunpack.c.h.bf16 %v412_v22  ;;  %v1289_v34 = vunpack.c.h.bf16 %v413_v24  ;;  %v1254_v39 = vunpack.c.l.bf16 %v396_v30  ;;  %v1256_v40 = vunpack.c.l.bf16 %v397_v31 }
 0x170   :  { %2341 = vmatprep.subr.mxu0 %v1543_v37  ;;  %2412 = vmatprep.subr.mxu1 %v1545_v44  ;;  %v380_v37 = vld [vmem:[%s5975_s1 + $0xa50] sm:$0xff]  ;;  %v381_v44 = vld [vmem:[%s5975_s1 + $0xa58] sm:$0xff]  ;;  %v1095_v24 = vunpack.c.h.bf16 %v316_v12 }
 0x171   :  { %2342 = vmatpush2.msra.mxu0 %v1542_v42  ;;  %2413 = vmatpush2.msra.mxu1 %v1544_v43  ;;  %v1255_v42 = vunpack.c.h.bf16 %v396_v30  ;;  %v1257_v43 = vunpack.c.h.bf16 %v397_v31  ;;  %v1225_v50 = vunpack.c.h.bf16 %v381_v44  ;;  %v1222_v51 = vunpack.c.l.bf16 %v380_v37  ;;  %v302_v30 = vld [vmem:[%s5975_s1 + $0x7e0] sm:$0xff]  ;;  %v303_v31 = vld [vmem:[%s5975_s1 + $0x7e8] sm:$0xff] }
 0x172   :  { %2343 = vmatprep.subr.mxu0 %v1511_v47  ;;  %2414 = vmatprep.subr.mxu1 %v1513_v48  ;;  %v364_v47 = vld [vmem:[%s5975_s1 + $0x9d0] sm:$0xff]  ;;  %v365_v48 = vld [vmem:[%s5975_s1 + $0x9d8] sm:$0xff] }
 0x173   :  { %2344 = vmatpush2.msra.mxu0 %v1510_v49  ;;  %2415 = vmatpush2.msra.mxu1 %v1512_v23  ;;  %v5338_v49 = vld [vmem:[%s5977_s3 + $0x8] sm:$0xff]  ;;  %v1223_v23 = vunpack.c.h.bf16 %v380_v37  ;;  %v1193_v59 = vunpack.c.h.bf16 %v365_v48  ;;  %v1192_v2 = vunpack.c.l.bf16 %v365_v48  ;;  %v1067_v48 = vunpack.c.h.bf16 %v302_v30 }
 0x174   :  { %2345 = vmatprep.subr.mxu0 %v1479_v52  ;;  %2416 = vmatprep.subr.mxu1 %v1481_v53  ;;  %v1224_v52 = vunpack.c.l.bf16 %v381_v44  ;;  %v348_v53 = vld [vmem:[%s5975_s1 + $0x950] sm:$0xff] }
 0x175   :  { %2346 = vmatpush2.msra.mxu0 %v1478_v56  ;;  %2417 = vmatpush2.msra.mxu1 %v1480_v57  ;;  %v349_v56 = vld [vmem:[%s5975_s1 + $0x958] sm:$0xff]  ;;  %v1191_v57 = vunpack.c.h.bf16 %v364_v47  ;;  %v1158_v3 = vunpack.c.l.bf16 %v348_v53 }
 0x176   :  { %2347 = vmatprep.subr.mxu0 %v1447_v61  ;;  %2418 = vmatprep.subr.mxu1 %v1449_v62  ;;  %v333_v61 = vld [vmem:[%s5975_s1 + $0x8d8] sm:$0xff]  ;;  %v5355_v62 = vld [vmem:[%s5978_s2 + $0x8] sm:$0xff] }
 0x177   :  { %2348 = vmatpush2.msra.mxu0 %v1446_v63  ;;  %2419 = vmatpush2.msra.mxu1 %v1448_v1  ;;  %v3237_v63 = vunpack.c.l.bf16 %v5338_v49  ;;  %v1190_v1 = vunpack.c.l.bf16 %v364_v47  ;;  %v1129_v9 = vunpack.c.h.bf16 %v333_v61  ;;  %v2994_v17 = vrot.slane %v5355_v62, %v4979_v45 }
 0x178   :  { %2349 = vmatprep.subr.mxu0 %v1415_v4  ;;  %2420 = vmatprep.subr.mxu1 %v1417_v6  ;;  %v1159_v4 = vunpack.c.h.bf16 %v348_v53  ;;  %v1160_v6 = vunpack.c.l.bf16 %v349_v56  ;;  %v2998_v18 = vrot.slane %v5355_v62, %v4982_v46  ;;  %v1068_v53 = vunpack.c.l.bf16 %v303_v31 }
 0x179   :  { %2350 = vmatpush2.msra.mxu0 %v1414_v7  ;;  %2421 = vmatpush2.msra.mxu1 %v1416_v8  ;;  %v1161_v7 = vunpack.c.h.bf16 %v349_v56  ;;  %v1127_v8 = vunpack.c.h.bf16 %v332_v60  ;;  %v3298_v22 = vrot.slane %v3237_v63, %v4995_v55 }
 0x17a   :  { %2351 = vmatprep.subr.mxu0 %v1383_v13  ;;  %2422 = vmatprep.subr.mxu1 %v1385_v14  ;;  %v317_v13 = vld [vmem:[%s5975_s1 + $0x858] sm:$0xff]  ;;  %v2986_v14 = vrot.slane %v5355_v62, %v4968_v38  ;;  %v3114_v37 = vcombine.low %v2994_v17, %v2998_v18  ;;  %v239_v17 = vld [vmem:[%s5975_s1 + $0x5e8] sm:$0xff] }
 0x17b   :  { %2352 = vmatpush2.msra.mxu0 %v1382_v15  ;;  %2423 = vmatpush2.msra.mxu1 %v1384_v16  ;;  %v2990_v15 = vrot.slane %v5355_v62, %v4971_v41  ;;  %v1126_v16 = vunpack.c.l.bf16 %v332_v60  ;;  %v3458_v47 = vrot.slane %v3298_v22, %v4968_v38  ;;  %v271_v60 = vld [vmem:[%s5975_s1 + $0x6e8] sm:$0xff] }
 0x17c   :  { %2353 = vmatprep.subr.mxu0 %v1351_v19  ;;  %2424 = vmatprep.subr.mxu1 %v1353_v33  ;;  %v3286_v19 = vrot.slane %v3237_v63, %v4968_v38  ;;  %v1128_v33 = vunpack.c.l.bf16 %v333_v61  ;;  %v223_v22 = vld [vmem:[%s5975_s1 + $0x568] sm:$0xff] }
 0x17d   :  { %2354 = vmatpush2.msra.mxu0 %v1350_v20  ;;  %2425 = vmatpush2.msra.mxu1 %v1352_v21  ;;  %v3290_v20 = vrot.slane %v3237_v63, %v4979_v45  ;;  %v3294_v21 = vrot.slane %v3237_v63, %v4992_v54 }
 0x17e   :  { %2355 = vmatprep.subr.mxu0 %v1319_v25  ;;  %2426 = vmatprep.subr.mxu1 %v1321_v26  ;;  %v1097_v25 = vunpack.c.h.bf16 %v317_v13  ;;  %v1094_v26 = vunpack.c.l.bf16 %v316_v12  ;;  %v3446_v44 = vrot.slane %v3286_v19, %v4968_v38 }
 0x17f   :  { %2356 = vmatpush2.msra.mxu0 %v1318_v58  ;;  %2427 = vmatpush2.msra.mxu1 %v1320_v28 }
 0x180   :  { %2357 = vmatprep.subr.mxu0 %v1287_v32  ;;  %2428 = vmatprep.subr.mxu1 %v1289_v34  ;;  %v1096_v32 = vunpack.c.l.bf16 %v317_v13  ;;  %v286_v34 = vld [vmem:[%s5975_s1 + $0x760] sm:$0xff] }
 0x181   :  { %2358 = vmatpush2.msra.mxu0 %v1286_v35  ;;  %2429 = vmatpush2.msra.mxu1 %v1288_v36  ;;  %v287_v35 = vld [vmem:[%s5975_s1 + $0x768] sm:$0xff]  ;;  %v3113_v36 = vcombine.low %v2986_v14, %v2990_v15  ;;  %v1035_v56 = vunpack.c.h.bf16 %v286_v34  ;;  %v1005_v14 = vunpack.c.h.bf16 %v271_v60  ;;  %v1004_v15 = vunpack.c.l.bf16 %v271_v60  ;;  %v158_v60 = vld [vmem:[%s5975_s1 + $0x360] sm:$0xff] }
 0x182   :  { %2359 = vmatprep.subr.mxu0 %v1255_v42  ;;  %2430 = vmatprep.subr.mxu1 %v1257_v43 }
 0x183   :  { %2360 = vmatpush2.msra.mxu0 %v1254_v39  ;;  %2431 = vmatpush2.msra.mxu1 %v1256_v40  ;;  %v3450_v39 = vrot.slane %v3290_v20, %v4968_v38  ;;  %v3454_v40 = vrot.slane %v3294_v21, %v4968_v38  ;;  %v222_v21 = vld [vmem:[%s5975_s1 + $0x560] sm:$0xff] }
 0x184   :  { %2361 = vmatprep.subr.mxu0 %v1223_v23  ;;  %2432 = vmatprep.subr.mxu1 %v1225_v50  ;;  %v1069_v23 = vunpack.c.h.bf16 %v303_v31  ;;  %v940_v31 = vunpack.c.l.bf16 %v239_v17 }
 0x185   :  { %2362 = vmatpush2.msra.mxu0 %v1222_v51  ;;  %2433 = vmatpush2.msra.mxu1 %v1224_v52  ;;  %v1066_v52 = vunpack.c.l.bf16 %v302_v30 }
 0x186   :  { %2363 = vmatprep.subr.mxu0 %v1191_v57  ;;  %2434 = vmatprep.subr.mxu1 %v1193_v59  ;;  %v1037_v57 = vunpack.c.h.bf16 %v287_v35  ;;  %v270_v59 = vld [vmem:[%s5975_s1 + $0x6e0] sm:$0xff] }
 0x187   :  { %2364 = vmatpush2.msra.mxu0 %v1190_v1  ;;  %2435 = vmatpush2.msra.mxu1 %v1192_v2  ;;  %v1034_v1 = vunpack.c.l.bf16 %v286_v34  ;;  %v3121_v2 = vrot.slane %v3113_v36, %v4822_v27  ;;  %v1003_v13 = vunpack.c.h.bf16 %v270_v59  ;;  %v207_v34 = vld [vmem:[%s5975_s1 + $0x4e8] sm:$0xff]  ;;  %v909_v36 = vunpack.c.h.bf16 %v223_v22 }
 0x188   :  { %2365 = vmatprep.subr.mxu0 %v1159_v4  ;;  %2436 = vmatprep.subr.mxu1 %v1161_v7  ;;  %v254_v4 = vld [vmem:[%s5975_s1 + $0x660] sm:$0xff]  ;;  %v3128_v7 = vrot.slane %v3114_v37, %v4822_v27  ;;  %v906_v37 = vunpack.c.l.bf16 %v222_v21 }
 0x189   :  { %2366 = vmatpush2.msra.mxu0 %v1158_v3  ;;  %2437 = vmatpush2.msra.mxu1 %v1160_v6  ;;  %v1947_v58 = vpop.f32.mrf.mxu0  ;;  %v2018_v28 = vpop.f32.mrf.mxu1  ;;  %v1036_v3 = vunpack.c.l.bf16 %v287_v35  ;;  %v255_v6 = vld [vmem:[%s5975_s1 + $0x668] sm:$0xff]  ;;  %v970_v18 = vunpack.c.l.bf16 %v254_v4  ;;  %v971_v19 = vunpack.c.h.bf16 %v254_v4  ;;  %v907_v35 = vunpack.c.h.bf16 %v222_v21 }
 0x18a   :  { %2367 = vmatprep.subr.mxu0 %v1127_v8  ;;  %2438 = vmatprep.subr.mxu1 %v1129_v9  ;;  %v3605_v8 = vcombine.low %v3446_v44, %v3450_v39  ;;  %v3606_v9 = vcombine.low %v3454_v40, %v3458_v47  ;;  %v972_v20 = vunpack.c.l.bf16 %v255_v6  ;;  %v908_v44 = vunpack.c.l.bf16 %v223_v22 }
 0x18b   :  { %2368 = vmatpush2.msra.mxu0 %v1126_v16  ;;  %2439 = vmatpush2.msra.mxu1 %v1128_v33  ;;  %v1949_v42 = vpop.f32.mrf.mxu0  ;;  %v2020_v43 = vpop.f32.mrf.mxu1  ;;  %v238_v16 = vld [vmem:[%s5975_s1 + $0x5e0] sm:$0xff]  ;;  %v973_v33 = vunpack.c.h.bf16 %v255_v6 }
 0x18c   :  { %2369 = vmatprep.subr.mxu0 %v1095_v24  ;;  %2440 = vmatprep.subr.mxu1 %v1097_v25  ;;  %v2799_v50 = vcombine.low %v1947_v58, %v1949_v42  ;;  %v2800_v51 = vcombine.low %v2018_v28, %v2020_v43  ;;  %v3129_v24 = vcombine.low %v3121_v2, %v3128_v7  ;;  %v939_v58 = vunpack.c.h.bf16 %v238_v16  ;;  %v190_v42 = vld [vmem:[%s5975_s1 + $0x460] sm:$0xff]  ;;  %v191_v43 = vld [vmem:[%s5975_s1 + $0x468] sm:$0xff] }
 0x18d   :  { %2370 = vmatpush2.msra.mxu0 %v1094_v26  ;;  %2371 = vmatprep.mubr.f32.mxu0 %v4218_v0  ;;  %v3613_v25 = vrot.slane %v3605_v8, %v4822_v27  ;;  %v3620_v26 = vrot.slane %v3606_v9, %v4822_v27  ;;  %v941_v28 = vunpack.c.h.bf16 %v239_v17  ;;  %v938_v30 = vunpack.c.l.bf16 %v238_v16  ;;  %v142_v6 = vld [vmem:[%s5975_s1 + $0x2e0] sm:$0xff]  ;;  %v143_v7 = vld [vmem:[%s5975_s1 + $0x2e8] sm:$0xff] }
 0x18e   :  { %2441 = vmatpush2.msra.mxu1 %v1096_v32  ;;  %2442 = vmatprep.mubr.f32.mxu1 %v4218_v0  ;;  %v2807_v61 = vrot.slane %v2799_v50, %v4822_v27  ;;  %v2814_v63 = vrot.slane %v2800_v51, %v4822_v27  ;;  %v206_v32 = vld [vmem:[%s5975_s1 + $0x4e0] sm:$0xff]  ;;  %v876_v50 = vunpack.c.l.bf16 %v207_v34  ;;  %v779_v9 = vunpack.c.h.bf16 %v158_v60  ;;  %v127_v16 = vld [vmem:[%s5975_s1 + $0x268] sm:$0xff] }
 0x18f   :  { %2372 = vmatmul.mubr.f32.vlgmr.msra.gmra.mxu0 %v5144_v11  ;;  %2443 = vmatmul.mubr.f32.vlgmr.msra.gmra.mxu1 %v5144_v11  ;;  %v1002_v11 = vunpack.c.l.bf16 %v270_v59  ;;  %v3621_v40 = vcombine.low %v3613_v25, %v3620_v26  ;;  %v875_v47 = vunpack.c.h.bf16 %v206_v32  ;;  %v174_v51 = vld [vmem:[%s5975_s1 + $0x3e0] sm:$0xff]  ;;  %v844_v59 = vunpack.c.l.bf16 %v191_v43  ;;  %v111_v25 = vld [vmem:[%s5975_s1 + $0x1e8] sm:$0xff] }
 0x190   :  { %2449 = vmatprep.subr.mxu0 %v1067_v48  ;;  %2520 = vmatprep.subr.mxu1 %v1069_v23  ;;  %v2815_v12 = vcombine.low %v2807_v61, %v2814_v63  ;;  %v877_v48 = vunpack.c.h.bf16 %v207_v34  ;;  %v874_v23 = vunpack.c.l.bf16 %v206_v32  ;;  %v159_v61 = vld [vmem:[%s5975_s1 + $0x368] sm:$0xff]  ;;  %v746_v21 = vunpack.c.l.bf16 %v142_v6 }
 0x191   :  { %2450 = vmatpush1.msra.mxu0 %v1066_v52  ;;  %2521 = vmatpush1.msra.mxu1 %v1068_v53  ;;  %v175_v52 = vld [vmem:[%s5975_s1 + $0x3e8] sm:$0xff]  ;;  %v843_v53 = vunpack.c.h.bf16 %v190_v42  ;;  %v748_v22 = vunpack.c.l.bf16 %v143_v7  ;;  %v716_v34 = vunpack.c.l.bf16 %v127_v16 }
 0x192   :  { %2451 = vmatprep.subr.mxu0 %v1035_v56  ;;  %2522 = vmatprep.subr.mxu1 %v1037_v57  ;;  %v3225_v39 = vadd.f32 %v3129_v24, %v2815_v12  ;;  %v845_v56 = vunpack.c.h.bf16 %v191_v43  ;;  %v842_v57 = vunpack.c.l.bf16 %v190_v42  ;;  %v813_v2 = vunpack.c.h.bf16 %v175_v52  ;;  %v110_v24 = vld [vmem:[%s5975_s1 + $0x1e0] sm:$0xff] }
 0x193   :  { %2452 = vmatpush1.msra.mxu0 %v1034_v1  ;;  %2523 = vmatpush1.msra.mxu1 %v1036_v3  ;;  %v811_v1 = vunpack.c.h.bf16 %v174_v51  ;;  %v810_v3 = vunpack.c.l.bf16 %v174_v51  ;;  %v812_v4 = vunpack.c.l.bf16 %v175_v52  ;;  %v781_v12 = vunpack.c.h.bf16 %v159_v61 }
 0x194   :  { %2453 = vmatprep.subr.mxu0 %v1003_v13  ;;  %2524 = vmatprep.subr.mxu1 %v1005_v14  ;;  %v3717_v63 = vmul.f32 %v3621_v40, %v3225_v39  ;;  %v778_v14 = vunpack.c.l.bf16 %v158_v60  ;;  %v682_v43 = vunpack.c.l.bf16 %v110_v24  ;;  %v684_v39 = vunpack.c.l.bf16 %v111_v25  ;;  %v78_v40 = vld [vmem:[%s5975_s1 + $0xe0] sm:$0xff] }
 0x195   :  { %2454 = vmatpush1.msra.mxu0 %v1002_v11  ;;  %2525 = vmatpush1.msra.mxu1 %v1004_v15  ;;  %v780_v11 = vunpack.c.l.bf16 %v159_v61  ;;  %v126_v15 = vld [vmem:[%s5975_s1 + $0x260] sm:$0xff]  ;;  %v619_v60 = vunpack.c.h.bf16 %v78_v40 }
 0x196   :  { %2455 = vmatprep.subr.mxu0 %v971_v19  ;;  %2526 = vmatprep.subr.mxu1 %v973_v33  ;;  %v3765_v8 = vcombine.high %v3717_v63, %v3717_v63  ;;  %v3772_v13 = vrot.slane %v3717_v63, %v4822_v27  ;;  %v749_v19 = vunpack.c.h.bf16 %v143_v7  ;;  %v714_v32 = vunpack.c.l.bf16 %v126_v15 }
 0x197   :  { %2456 = vmatpush1.msra.mxu0 %v970_v18  ;;  %2527 = vmatpush1.msra.mxu1 %v972_v20  ;;  %v747_v18 = vunpack.c.h.bf16 %v142_v6  ;;  %v618_v63 = vunpack.c.l.bf16 %v78_v40  ;;  %v463_v40 = vld [vmem:[%s5975_s1 + $0xce8] sm:$0xff] }
 0x198   :  { %2457 = vmatprep.subr.mxu0 %v939_v58  ;;  %2528 = vmatprep.subr.mxu1 %v941_v28  ;;  %v3779_v17 = vrot.slane %v3765_v8, %v4822_v27  ;;  %v3780_v33 = vcombine.high %v3772_v13, %v3772_v13  ;;  %v3914_v20 = vsel %vm33_vm0, %v3772_v13, 0.0  ;;  %v715_v58 = vunpack.c.h.bf16 %v126_v15 }
 0x199   :  { %2458 = vmatpush1.msra.mxu0 %v938_v30  ;;  %2529 = vmatpush1.msra.mxu1 %v940_v31  ;;  %v3915_v26 = vadd.f32 %v3914_v20, %v5267_v29  ;;  %v717_v28 = vunpack.c.h.bf16 %v127_v16  ;;  %v526_v16 = vld [vmem:[%s5975_s1 + $0xee0] sm:$0xff] }
 0x19a   :  { %2459 = vmatprep.subr.mxu0 %v907_v35  ;;  %2530 = vmatprep.subr.mxu1 %v909_v36  ;;  %v3781_v30 = vcombine.high %v3779_v17, %v3779_v17  ;;  %v3916_v31 = vsel %vm33_vm0, %v3780_v33, 0.0  ;;  %v94_v35 = vld [vmem:[%s5975_s1 + $0x160] sm:$0xff]  ;;  %v95_v36 = vld [vmem:[%s5975_s1 + $0x168] sm:$0xff]  ;;  %v3918_v42 = vsel %vm33_vm0, %v3779_v17, 0.0 }
 0x19b   :  { %2460 = vmatpush1.msra.mxu0 %v906_v37  ;;  %2531 = vmatpush1.msra.mxu1 %v908_v44  ;;  %v3917_v29 = vadd.f32 %v3916_v31, %v3915_v26  ;;  %v683_v37 = vunpack.c.h.bf16 %v110_v24  ;;  %v685_v44 = vunpack.c.h.bf16 %v111_v25  ;;  %v650_v52 = vunpack.c.l.bf16 %v94_v35  ;;  %v527_v17 = vld [vmem:[%s5975_s1 + $0xee8] sm:$0xff] }
 0x19c   :  { %2461 = vmatprep.subr.mxu0 %v875_v47  ;;  %2532 = vmatprep.subr.mxu1 %v877_v48  ;;  %v79_v47 = vld [vmem:[%s5975_s1 + $0xe8] sm:$0xff]  ;;  %v3920_v51 = vsel %vm33_vm0, %v3781_v30, 0.0  ;;  %v1515_v24 = vunpack.c.h.bf16 %v526_v16  ;;  %v1517_v25 = vunpack.c.h.bf16 %v527_v17  ;;  %v1514_v26 = vunpack.c.l.bf16 %v526_v16 }
 0x19d   :  { %2462 = vmatpush1.msra.mxu0 %v874_v23  ;;  %2533 = vmatpush1.msra.mxu1 %v876_v50  ;;  %v3919_v48 = vadd.f32 %v3918_v42, %v3917_v29  ;;  %v651_v23 = vunpack.c.h.bf16 %v94_v35  ;;  %v653_v50 = vunpack.c.h.bf16 %v95_v36  ;;  %v621_v61 = vunpack.c.h.bf16 %v79_v47  ;;  %v495_v30 = vld [vmem:[%s5975_s1 + $0xde8] sm:$0xff] }
 0x19e   :  { %2463 = vmatprep.subr.mxu0 %v843_v53  ;;  %2534 = vmatprep.subr.mxu1 %v845_v56  ;;  %v652_v53 = vunpack.c.l.bf16 %v95_v36  ;;  %v62_v56 = vld [vmem:[%s5975_s1 + $0x60] sm:$0xff]  ;;  %v479_v29 = vld [vmem:[%s5975_s1 + $0xd68] sm:$0xff] }
 0x19f   :  { %2464 = vmatpush1.msra.mxu0 %v842_v57  ;;  %2535 = vmatpush1.msra.mxu1 %v844_v59  ;;  %v63_v57 = vld [vmem:[%s5975_s1 + $0x68] sm:$0xff]  ;;  %v5493_v59 = vadd.f32 %v3920_v51, %v3919_v48  ;;  %v586_v7 = vunpack.c.l.bf16 %v62_v56  ;;  %v478_v36 = vld [vmem:[%s5975_s1 + $0xd60] sm:$0xff]  ;;  %v1421_v48 = vunpack.c.h.bf16 %v479_v29 }
 0x1a0   :  { %2465 = vmatprep.subr.mxu0 %v811_v1  ;;  %2536 = vmatprep.subr.mxu1 %v813_v2  ;;  %v620_v1 = vunpack.c.l.bf16 %v79_v47  ;;  %v558_v2 = vld [vmem:[%s5975_s1 + $0xfe0] sm:$0xff]  ;;  %v589_v6 = vunpack.c.h.bf16 %v63_v57  ;;  %v588_v8 = vunpack.c.l.bf16 %v63_v57  ;;  %v1419_v47 = vunpack.c.h.bf16 %v478_v36 }
 0x1a1   :  { %2466 = vmatpush1.msra.mxu0 %v810_v3  ;;  %2537 = vmatpush1.msra.mxu1 %v812_v4  ;;  %v559_v3 = vld [vmem:[%s5975_s1 + $0xfe8] sm:$0xff]  ;;  %v587_v4 = vunpack.c.h.bf16 %v62_v56  ;;  %v1579_v13 = vunpack.c.h.bf16 %v558_v2  ;;  %v446_v51 = vld [vmem:[%s5975_s1 + $0xc60] sm:$0xff]  ;;  %v1389_v56 = vunpack.c.h.bf16 %v463_v40 }
 0x1a2   :  { %2467 = vmatprep.subr.mxu0 %v779_v9  ;;  %2538 = vmatprep.subr.mxu1 %v781_v12  ;;  %v542_v9 = vld [vmem:[%s5975_s1 + $0xf60] sm:$0xff]  ;;  %v543_v12 = vld [vmem:[%s5975_s1 + $0xf68] sm:$0xff]  ;;  %v1580_v15 = vunpack.c.l.bf16 %v559_v3 }
 0x1a3   :  { %2468 = vmatpush1.msra.mxu0 %v778_v14  ;;  %2539 = vmatpush1.msra.mxu1 %v780_v11  ;;  %v1581_v14 = vunpack.c.h.bf16 %v559_v3  ;;  %v1578_v11 = vunpack.c.l.bf16 %v558_v2  ;;  %v1546_v33 = vunpack.c.l.bf16 %v542_v9  ;;  %v1548_v20 = vunpack.c.l.bf16 %v543_v12 }
 0x1a4   :  { %2469 = vmatprep.subr.mxu0 %v747_v18  ;;  %2540 = vmatprep.subr.mxu1 %v749_v19  ;;  %v1547_v18 = vunpack.c.h.bf16 %v542_v9  ;;  %v1549_v19 = vunpack.c.h.bf16 %v543_v12  ;;  %v1354_v3 = vunpack.c.l.bf16 %v446_v51 }
 0x1a5   :  { %2470 = vmatpush1.msra.mxu0 %v746_v21  ;;  %2541 = vmatpush1.msra.mxu1 %v748_v22  ;;  %v510_v21 = vld [vmem:[%s5975_s1 + $0xe60] sm:$0xff]  ;;  %v511_v22 = vld [vmem:[%s5975_s1 + $0xe68] sm:$0xff] }
 0x1a6   :  { %2471 = vmatprep.subr.mxu0 %v715_v58  ;;  %2542 = vmatprep.subr.mxu1 %v717_v28  ;;  %v1516_v58 = vunpack.c.l.bf16 %v527_v17  ;;  %v494_v28 = vld [vmem:[%s5975_s1 + $0xde0] sm:$0xff]  ;;  %v1483_v31 = vunpack.c.h.bf16 %v510_v21  ;;  %v1484_v35 = vunpack.c.l.bf16 %v511_v22 }
 0x1a7   :  { %2472 = vmatpush1.msra.mxu0 %v714_v32  ;;  %2543 = vmatpush1.msra.mxu1 %v716_v34  ;;  %v1485_v32 = vunpack.c.h.bf16 %v511_v22  ;;  %v1482_v34 = vunpack.c.l.bf16 %v510_v21  ;;  %v1450_v42 = vunpack.c.l.bf16 %v494_v28 }
 0x1a8   :  { %2473 = vmatprep.subr.mxu0 %v683_v37  ;;  %2544 = vmatprep.subr.mxu1 %v685_v44  ;;  %v1451_v37 = vunpack.c.h.bf16 %v494_v28  ;;  %v1453_v44 = vunpack.c.h.bf16 %v495_v30 }
 0x1a9   :  { %2474 = vmatpush1.msra.mxu0 %v682_v43  ;;  %2545 = vmatpush1.msra.mxu1 %v684_v39  ;;  %v1452_v43 = vunpack.c.l.bf16 %v495_v30  ;;  %v462_v39 = vld [vmem:[%s5975_s1 + $0xce0] sm:$0xff] }
 0x1aa   :  { %2475 = vmatprep.subr.mxu0 %v651_v23  ;;  %2546 = vmatprep.subr.mxu1 %v653_v50  ;;  %v1418_v23 = vunpack.c.l.bf16 %v478_v36  ;;  %v1420_v50 = vunpack.c.l.bf16 %v479_v29  ;;  %v1386_v57 = vunpack.c.l.bf16 %v462_v39  ;;  %v350_v30 = vld [vmem:[%s5975_s1 + $0x960] sm:$0xff] }
 0x1ab   :  { %2476 = vmatpush1.msra.mxu0 %v650_v52  ;;  %2547 = vmatpush1.msra.mxu1 %v652_v53  ;;  %v447_v52 = vld [vmem:[%s5975_s1 + $0xc68] sm:$0xff]  ;;  %v1387_v53 = vunpack.c.h.bf16 %v462_v39  ;;  %v334_v39 = vld [vmem:[%s5975_s1 + $0x8e0] sm:$0xff] }
 0x1ac   :  { %2477 = vmatprep.subr.mxu0 %v619_v60  ;;  %2548 = vmatprep.subr.mxu1 %v621_v61  ;;  %v1388_v60 = vunpack.c.l.bf16 %v463_v40  ;;  %v430_v61 = vld [vmem:[%s5975_s1 + $0xbe0] sm:$0xff]  ;;  %v1357_v2 = vunpack.c.h.bf16 %v447_v52  ;;  %v3002_v40 = vrot.slane %v5355_v62, %v4992_v54 }
 0x1ad   :  { %2478 = vmatpush1.msra.mxu0 %v618_v63  ;;  %2549 = vmatpush1.msra.mxu1 %v620_v1  ;;  %v431_v63 = vld [vmem:[%s5975_s1 + $0xbe8] sm:$0xff]  ;;  %v1355_v1 = vunpack.c.h.bf16 %v446_v51  ;;  %v1322_v12 = vunpack.c.l.bf16 %v430_v61  ;;  %v3014_v51 = vrot.slane %v5355_v62, %v5067_v10 }
 0x1ae   :  { %2479 = vmatprep.subr.mxu0 %v587_v4  ;;  %2550 = vmatprep.subr.mxu1 %v589_v6  ;;  %v1356_v4 = vunpack.c.l.bf16 %v447_v52  ;;  %v414_v6 = vld [vmem:[%s5975_s1 + $0xb60] sm:$0xff]  ;;  %v1325_v9 = vunpack.c.h.bf16 %v431_v63 }
 0x1af   :  { %2480 = vmatpush1.msra.mxu0 %v586_v7  ;;  %2551 = vmatpush1.msra.mxu1 %v588_v8  ;;  %v415_v7 = vld [vmem:[%s5975_s1 + $0xb68] sm:$0xff]  ;;  %v1323_v8 = vunpack.c.h.bf16 %v430_v61  ;;  %v1290_v17 = vunpack.c.l.bf16 %v414_v6 }
 0x1b0   :  { %2481 = vmatprep.subr.mxu0 %v1579_v13  ;;  %2552 = vmatprep.subr.mxu1 %v1581_v14  ;;  %v1324_v13 = vunpack.c.l.bf16 %v431_v63  ;;  %v398_v14 = vld [vmem:[%s5975_s1 + $0xae0] sm:$0xff]  ;;  %v1293_v16 = vunpack.c.h.bf16 %v415_v7  ;;  %v1131_v63 = vunpack.c.h.bf16 %v334_v39 }
 0x1b1   :  { %2482 = vmatpush2.msra.mxu0 %v1578_v11  ;;  %2553 = vmatpush2.msra.mxu1 %v1580_v15  ;;  %v399_v11 = vld [vmem:[%s5975_s1 + $0xae8] sm:$0xff]  ;;  %v1291_v15 = vunpack.c.h.bf16 %v414_v6  ;;  %v1258_v22 = vunpack.c.l.bf16 %v398_v14  ;;  %v304_v6 = vld [vmem:[%s5975_s1 + $0x7f0] sm:$0xff] }
 0x1b2   :  { %2483 = vmatprep.subr.mxu0 %v1547_v18  ;;  %2554 = vmatprep.subr.mxu1 %v1549_v19  ;;  %v1292_v18 = vunpack.c.l.bf16 %v415_v7  ;;  %v382_v19 = vld [vmem:[%s5975_s1 + $0xa60] sm:$0xff]  ;;  %v1261_v21 = vunpack.c.h.bf16 %v399_v11 }
 0x1b3   :  { %2484 = vmatpush2.msra.mxu0 %v1546_v33  ;;  %2555 = vmatpush2.msra.mxu1 %v1548_v20  ;;  %v383_v33 = vld [vmem:[%s5975_s1 + $0xa68] sm:$0xff]  ;;  %v1259_v20 = vunpack.c.h.bf16 %v398_v14 }
 0x1b4   :  { %2485 = vmatprep.subr.mxu0 %v1515_v24  ;;  %2556 = vmatprep.subr.mxu1 %v1517_v25  ;;  %v1260_v24 = vunpack.c.l.bf16 %v399_v11  ;;  %v366_v25 = vld [vmem:[%s5975_s1 + $0x9e0] sm:$0xff]  ;;  %v1229_v28 = vunpack.c.h.bf16 %v383_v33  ;;  %v305_v11 = vld [vmem:[%s5975_s1 + $0x7f8] sm:$0xff] }
 0x1b5   :  { %2486 = vmatpush2.msra.mxu0 %v1514_v26  ;;  %2557 = vmatpush2.msra.mxu1 %v1516_v58  ;;  %v367_v26 = vld [vmem:[%s5975_s1 + $0x9e8] sm:$0xff]  ;;  %v1227_v58 = vunpack.c.h.bf16 %v382_v19  ;;  %v1194_v36 = vunpack.c.l.bf16 %v366_v25  ;;  %v1195_v29 = vunpack.c.h.bf16 %v366_v25  ;;  %v1073_v25 = vunpack.c.h.bf16 %v305_v11 }
 0x1b6   :  { %2487 = vmatprep.subr.mxu0 %v1483_v31  ;;  %2558 = vmatprep.subr.mxu1 %v1485_v32  ;;  %v351_v31 = vld [vmem:[%s5975_s1 + $0x968] sm:$0xff]  ;;  %v3238_v32 = vunpack.c.h.bf16 %v5338_v49 }
 0x1b7   :  { %2488 = vmatpush2.msra.mxu0 %v1482_v34  ;;  %2559 = vmatpush2.msra.mxu1 %v1484_v35  ;;  %v1226_v34 = vunpack.c.l.bf16 %v382_v19  ;;  %v1228_v35 = vunpack.c.l.bf16 %v383_v33  ;;  %v335_v49 = vld [vmem:[%s5975_s1 + $0x8e8] sm:$0xff]  ;;  %v1070_v19 = vunpack.c.l.bf16 %v304_v6  ;;  %v1071_v33 = vunpack.c.h.bf16 %v304_v6 }
 0x1b8   :  { %2489 = vmatprep.subr.mxu0 %v1451_v37  ;;  %2560 = vmatprep.subr.mxu1 %v1453_v44  ;;  %v1196_v37 = vunpack.c.l.bf16 %v367_v26  ;;  %v1197_v44 = vunpack.c.h.bf16 %v367_v26  ;;  %v3302_v52 = vrot.slane %v3238_v32, %v4968_v38  ;;  %v3314_v61 = vrot.slane %v3238_v32, %v4995_v55 }
 0x1b9   :  { %2490 = vmatpush2.msra.mxu0 %v1450_v42  ;;  %2561 = vmatpush2.msra.mxu1 %v1452_v43  ;;  %v1163_v42 = vunpack.c.h.bf16 %v350_v30  ;;  %v1165_v43 = vunpack.c.h.bf16 %v351_v31 }
 0x1ba   :  { %2491 = vmatprep.subr.mxu0 %v1419_v47  ;;  %2562 = vmatprep.subr.mxu1 %v1421_v48  ;;  %v3006_v47 = vrot.slane %v5355_v62, %v5061_v5  ;;  %v1162_v48 = vunpack.c.l.bf16 %v350_v30  ;;  %v1072_v30 = vunpack.c.l.bf16 %v305_v11 }
 0x1bb   :  { %2492 = vmatpush2.msra.mxu0 %v1418_v23  ;;  %2563 = vmatpush2.msra.mxu1 %v1420_v50  ;;  %v318_v23 = vld [vmem:[%s5975_s1 + $0x860] sm:$0xff]  ;;  %v3010_v50 = vrot.slane %v5355_v62, %v4995_v55  ;;  %v1130_v62 = vunpack.c.l.bf16 %v334_v39 }
 0x1bc   :  { %2493 = vmatprep.subr.mxu0 %v1387_v53  ;;  %2564 = vmatprep.subr.mxu1 %v1389_v56  ;;  %v1164_v53 = vunpack.c.l.bf16 %v351_v31  ;;  %v319_v56 = vld [vmem:[%s5975_s1 + $0x868] sm:$0xff]  ;;  %v3130_v7 = vcombine.low %v3002_v40, %v3006_v47  ;;  %v272_v31 = vld [vmem:[%s5975_s1 + $0x6f0] sm:$0xff]  ;;  %v257_v47 = vld [vmem:[%s5975_s1 + $0x678] sm:$0xff] }
 0x1bd   :  { %2494 = vmatpush2.msra.mxu0 %v1386_v57  ;;  %2565 = vmatpush2.msra.mxu1 %v1388_v60  ;;  %v3306_v57 = vrot.slane %v3238_v32, %v4979_v45  ;;  %v3310_v60 = vrot.slane %v3238_v32, %v4992_v54  ;;  %v273_v32 = vld [vmem:[%s5975_s1 + $0x6f8] sm:$0xff]  ;;  %v256_v40 = vld [vmem:[%s5975_s1 + $0x670] sm:$0xff] }
 0x1be   :  { %2495 = vmatprep.subr.mxu0 %v1355_v1  ;;  %2566 = vmatprep.subr.mxu1 %v1357_v2  ;;  %v1133_v1 = vunpack.c.h.bf16 %v335_v49  ;;  %v1132_v2 = vunpack.c.l.bf16 %v335_v49 }
 0x1bf   :  { %2496 = vmatpush2.msra.mxu0 %v1354_v3  ;;  %2567 = vmatpush2.msra.mxu1 %v1356_v4  ;;  %v1099_v3 = vunpack.c.h.bf16 %v318_v23  ;;  %v1101_v4 = vunpack.c.h.bf16 %v319_v56 }
 0x1c0   :  { %2497 = vmatprep.subr.mxu0 %v1323_v8  ;;  %2568 = vmatprep.subr.mxu1 %v1325_v9  ;;  %v3131_v8 = vcombine.low %v3010_v50, %v3014_v51  ;;  %v3462_v9 = vrot.slane %v3302_v52, %v4968_v38  ;;  %v1007_v50 = vunpack.c.h.bf16 %v272_v31  ;;  %v1009_v51 = vunpack.c.h.bf16 %v273_v32 }
 0x1c1   :  { %2498 = vmatpush2.msra.mxu0 %v1322_v12  ;;  %2569 = vmatpush2.msra.mxu1 %v1324_v13  ;;  %v1098_v12 = vunpack.c.l.bf16 %v318_v23  ;;  %v1006_v23 = vunpack.c.l.bf16 %v272_v31  ;;  %v1008_v52 = vunpack.c.l.bf16 %v273_v32 }
 0x1c2   :  { %2499 = vmatprep.subr.mxu0 %v1291_v15  ;;  %2570 = vmatprep.subr.mxu1 %v1293_v16  ;;  %v3466_v15 = vrot.slane %v3306_v57, %v4968_v38  ;;  %v3470_v16 = vrot.slane %v3310_v60, %v4968_v38 }
 0x1c3   :  { %2500 = vmatpush2.msra.mxu0 %v1290_v17  ;;  %2571 = vmatpush2.msra.mxu1 %v1292_v18  ;;  %v3474_v17 = vrot.slane %v3314_v61, %v4968_v38  ;;  %v1100_v18 = vunpack.c.l.bf16 %v319_v56  ;;  %v241_v56 = vld [vmem:[%s5975_s1 + $0x5f8] sm:$0xff] }
 0x1c4   :  { %2501 = vmatprep.subr.mxu0 %v1259_v20  ;;  %2572 = vmatprep.subr.mxu1 %v1261_v21 }
 0x1c5   :  { %2502 = vmatpush2.msra.mxu0 %v1258_v22  ;;  %2573 = vmatpush2.msra.mxu1 %v1260_v24  ;;  %v288_v22 = vld [vmem:[%s5975_s1 + $0x770] sm:$0xff]  ;;  %v289_v24 = vld [vmem:[%s5975_s1 + $0x778] sm:$0xff] }
 0x1c6   :  { %2503 = vmatprep.subr.mxu0 %v1227_v58  ;;  %2574 = vmatprep.subr.mxu1 %v1229_v28  ;;  %v3138_v28 = vrot.slane %v3130_v7, %v4822_v27  ;;  %v1038_v39 = vunpack.c.l.bf16 %v288_v22  ;;  %v1040_v49 = vunpack.c.l.bf16 %v289_v24  ;;  %v945_v7 = vunpack.c.h.bf16 %v241_v56 }
 0x1c7   :  { %2504 = vmatpush2.msra.mxu0 %v1226_v34  ;;  %2575 = vmatpush2.msra.mxu1 %v1228_v35  ;;  %v3145_v34 = vrot.slane %v3131_v8, %v4822_v27  ;;  %v3622_v35 = vcombine.low %v3462_v9, %v3466_v15  ;;  %v944_v9 = vunpack.c.l.bf16 %v241_v56  ;;  %v128_v56 = vld [vmem:[%s5975_s1 + $0x270] sm:$0xff] }
 0x1c8   :  { %2505 = vmatprep.subr.mxu0 %v1195_v29  ;;  %2576 = vmatprep.subr.mxu1 %v1197_v44  ;;  %v1039_v44 = vunpack.c.h.bf16 %v288_v22 }
 0x1c9   :  { %2506 = vmatpush2.msra.mxu0 %v1194_v36  ;;  %2577 = vmatpush2.msra.mxu1 %v1196_v37  ;;  %v3623_v36 = vcombine.low %v3470_v16, %v3474_v17  ;;  %v3146_v57 = vcombine.low %v3138_v28, %v3145_v34  ;;  %v3630_v60 = vrot.slane %v3622_v35, %v4822_v27  ;;  %v160_v34 = vld [vmem:[%s5975_s1 + $0x370] sm:$0xff]  ;;  %v161_v35 = vld [vmem:[%s5975_s1 + $0x378] sm:$0xff] }
 0x1ca   :  { %2507 = vmatprep.subr.mxu0 %v1163_v42  ;;  %2578 = vmatprep.subr.mxu1 %v1165_v43  ;;  %v1041_v42 = vunpack.c.h.bf16 %v289_v24  ;;  %v5635_v43 = vld.sshfl [vmem:[%s5976_s0] sm:$0x33 pattern:$0x76325410] }
 0x1cb   :  { %2508 = vmatpush2.msra.mxu0 %v1162_v48  ;;  %2579 = vmatpush2.msra.mxu1 %v1164_v53  ;;  %v2089_v13 = vpop.f32.mrf.mxu0  ;;  %v2160_v14 = vpop.f32.mrf.mxu1  ;;  %v240_v53 = vld [vmem:[%s5975_s1 + $0x5f0] sm:$0xff]  ;;  %v3637_v61 = vrot.slane %v3623_v36, %v4822_v27 }
 0x1cc   :  { %2509 = vmatprep.subr.mxu0 %v1131_v63  ;;  %2580 = vmatprep.subr.mxu1 %v1133_v1  ;;  %v975_v63 = vunpack.c.h.bf16 %v256_v40  ;;  %v977_v1 = vunpack.c.h.bf16 %v257_v47  ;;  %v943_v6 = vunpack.c.h.bf16 %v240_v53  ;;  %v942_v8 = vunpack.c.l.bf16 %v240_v53 }
 0x1cd   :  { %2510 = vmatpush2.msra.mxu0 %v1130_v62  ;;  %2581 = vmatpush2.msra.mxu1 %v1132_v2  ;;  %v2091_v20 = vpop.f32.mrf.mxu0  ;;  %v2162_v21 = vpop.f32.mrf.mxu1  ;;  %v974_v62 = vunpack.c.l.bf16 %v256_v40  ;;  %v976_v2 = vunpack.c.l.bf16 %v257_v47  ;;  %v3638_v11 = vcombine.low %v3630_v60, %v3637_v61  ;;  %v145_v40 = vld [vmem:[%s5975_s1 + $0x2f8] sm:$0xff]  ;;  %v784_v53 = vunpack.c.l.bf16 %v161_v35 }
 0x1ce   :  { %2511 = vmatprep.subr.mxu0 %v1099_v3  ;;  %2582 = vmatprep.subr.mxu1 %v1101_v4  ;;  %v2816_v26 = vcombine.low %v2089_v13, %v2091_v20  ;;  %v2817_v58 = vcombine.low %v2160_v14, %v2162_v21  ;;  %v224_v3 = vld [vmem:[%s5975_s1 + $0x570] sm:$0xff]  ;;  %v225_v4 = vld [vmem:[%s5975_s1 + $0x578] sm:$0xff] }
 0x1cf   :  { %2512 = vmatpush2.msra.mxu0 %v1098_v12  ;;  %2513 = vmatprep.mubr.f32.mxu0 %v4218_v0  ;;  %v208_v12 = vld [vmem:[%s5975_s1 + $0x4f0] sm:$0xff]  ;;  %v209_v13 = vld [vmem:[%s5975_s1 + $0x4f8] sm:$0xff]  ;;  %v911_v15 = vunpack.c.h.bf16 %v224_v3  ;;  %v913_v16 = vunpack.c.h.bf16 %v225_v4  ;;  %v910_v17 = vunpack.c.l.bf16 %v224_v3  ;;  %v752_v3 = vunpack.c.l.bf16 %v145_v40 }
 0x1d0   :  { %2583 = vmatpush2.msra.mxu1 %v1100_v18  ;;  %2584 = vmatprep.mubr.f32.mxu1 %v4218_v0  ;;  %v2824_v29 = vrot.slane %v2816_v26, %v4822_v27  ;;  %v2831_v37 = vrot.slane %v2817_v58, %v4822_v27  ;;  %v912_v18 = vunpack.c.l.bf16 %v225_v4  ;;  %v879_v20 = vunpack.c.h.bf16 %v208_v12  ;;  %v177_v26 = vld [vmem:[%s5975_s1 + $0x3f8] sm:$0xff]  ;;  %v112_v4 = vld [vmem:[%s5975_s1 + $0x1f0] sm:$0xff] }
 0x1d1   :  { %2514 = vmatmul.mubr.f32.vlgmr.msra.gmra.mxu0 %v5635_v43  ;;  %2585 = vmatmul.mubr.f32.vlgmr.msra.gmra.mxu1 %v5635_v43  ;;  %v881_v21 = vunpack.c.h.bf16 %v209_v13  ;;  %v878_v22 = vunpack.c.l.bf16 %v208_v12  ;;  %v880_v24 = vunpack.c.l.bf16 %v209_v13  ;;  %v718_v12 = vunpack.c.l.bf16 %v128_v56 }
 0x1d2   :  { %2591 = vmatprep.subr.mxu0 %v1071_v33  ;;  %2662 = vmatprep.subr.mxu1 %v1073_v25  ;;  %v2832_v48 = vcombine.low %v2824_v29, %v2831_v37  ;;  %v193_v33 = vld [vmem:[%s5975_s1 + $0x478] sm:$0xff]  ;;  %v176_v25 = vld [vmem:[%s5975_s1 + $0x3f0] sm:$0xff]  ;;  %v817_v37 = vunpack.c.h.bf16 %v177_v26 }
 0x1d3   :  { %2592 = vmatpush1.msra.mxu0 %v1070_v19  ;;  %2663 = vmatpush1.msra.mxu1 %v1072_v30  ;;  %v192_v19 = vld [vmem:[%s5975_s1 + $0x470] sm:$0xff]  ;;  %v849_v30 = vunpack.c.h.bf16 %v193_v33  ;;  %v848_v32 = vunpack.c.l.bf16 %v193_v33  ;;  %v815_v29 = vunpack.c.h.bf16 %v176_v25 }
 0x1d4   :  { %2593 = vmatprep.subr.mxu0 %v1039_v44  ;;  %2664 = vmatprep.subr.mxu1 %v1041_v42  ;;  %v3226_v14 = vadd.f32 %v3146_v57, %v2832_v48  ;;  %v847_v28 = vunpack.c.h.bf16 %v192_v19  ;;  %v846_v31 = vunpack.c.l.bf16 %v192_v19  ;;  %v814_v42 = vunpack.c.l.bf16 %v176_v25  ;;  %v129_v57 = vld [vmem:[%s5975_s1 + $0x278] sm:$0xff] }
 0x1d5   :  { %2594 = vmatpush1.msra.mxu0 %v1038_v39  ;;  %2665 = vmatpush1.msra.mxu1 %v1040_v49  ;;  %v816_v39 = vunpack.c.l.bf16 %v177_v26  ;;  %v144_v49 = vld [vmem:[%s5975_s1 + $0x2f0] sm:$0xff]  ;;  %v783_v48 = vunpack.c.h.bf16 %v160_v34  ;;  %v720_v13 = vunpack.c.l.bf16 %v129_v57  ;;  %v686_v19 = vunpack.c.l.bf16 %v112_v4 }
 0x1d6   :  { %2595 = vmatprep.subr.mxu0 %v1007_v50  ;;  %2666 = vmatprep.subr.mxu1 %v1009_v51  ;;  %v3718_v58 = vmul.f32 %v3638_v11, %v3226_v14  ;;  %v751_v61 = vunpack.c.h.bf16 %v144_v49  ;;  %v96_v14 = vld [vmem:[%s5975_s1 + $0x170] sm:$0xff]  ;;  %v97_v11 = vld [vmem:[%s5975_s1 + $0x178] sm:$0xff] }
 0x1d7   :  { %2596 = vmatpush1.msra.mxu0 %v1006_v23  ;;  %2667 = vmatpush1.msra.mxu1 %v1008_v52  ;;  %v785_v23 = vunpack.c.h.bf16 %v161_v35  ;;  %v782_v52 = vunpack.c.l.bf16 %v160_v34  ;;  %v657_v25 = vunpack.c.h.bf16 %v97_v11  ;;  %v654_v26 = vunpack.c.l.bf16 %v96_v14 }
 0x1d8   :  { %2597 = vmatprep.subr.mxu0 %v975_v63  ;;  %2668 = vmatprep.subr.mxu1 %v977_v1  ;;  %v3782_v36 = vcombine.high %v3718_v58, %v3718_v58  ;;  %v3789_v44 = vrot.slane %v3718_v58, %v4822_v27  ;;  %v753_v63 = vunpack.c.h.bf16 %v145_v40  ;;  %v656_v58 = vunpack.c.l.bf16 %v97_v11  ;;  %v545_v40 = vld [vmem:[%s5975_s1 + $0xf78] sm:$0xff] }
 0x1d9   :  { %2598 = vmatpush1.msra.mxu0 %v974_v62  ;;  %2669 = vmatpush1.msra.mxu1 %v976_v2  ;;  %v750_v2 = vunpack.c.l.bf16 %v144_v49  ;;  %v544_v49 = vld [vmem:[%s5975_s1 + $0xf70] sm:$0xff] }
 0x1da   :  { %2599 = vmatprep.subr.mxu0 %v943_v6  ;;  %2670 = vmatprep.subr.mxu1 %v945_v7  ;;  %v3796_v47 = vrot.slane %v3782_v36, %v4822_v27  ;;  %v3797_v50 = vcombine.high %v3789_v44, %v3789_v44  ;;  %v3922_v51 = vsel %vm33_vm0, %v3789_v44, 0.0  ;;  %v113_v6 = vld [vmem:[%s5975_s1 + $0x1f8] sm:$0xff]  ;;  %v719_v7 = vunpack.c.h.bf16 %v128_v56  ;;  %v560_v36 = vld [vmem:[%s5975_s1 + $0xff0] sm:$0xff] }
 0x1db   :  { %2600 = vmatpush1.msra.mxu0 %v942_v8  ;;  %2671 = vmatpush1.msra.mxu1 %v944_v9  ;;  %v3923_v60 = vadd.f32 %v3922_v51, %v5493_v59  ;;  %v721_v8 = vunpack.c.h.bf16 %v129_v57  ;;  %v688_v33 = vunpack.c.l.bf16 %v113_v6  ;;  %v528_v51 = vld [vmem:[%s5975_s1 + $0xef0] sm:$0xff]  ;;  %v1553_v56 = vunpack.c.h.bf16 %v545_v40 }
 0x1dc   :  { %2601 = vmatprep.subr.mxu0 %v911_v15  ;;  %2672 = vmatprep.subr.mxu1 %v913_v16  ;;  %v3798_v1 = vcombine.high %v3796_v47, %v3796_v47  ;;  %v3924_v62 = vsel %vm33_vm0, %v3797_v50, 0.0  ;;  %v3926_v9 = vsel %vm33_vm0, %v3796_v47, 0.0  ;;  %v687_v16 = vunpack.c.h.bf16 %v112_v4  ;;  %v496_v4 = vld [vmem:[%s5975_s1 + $0xdf0] sm:$0xff] }
 0x1dd   :  { %2602 = vmatpush1.msra.mxu0 %v910_v17  ;;  %2673 = vmatpush1.msra.mxu1 %v912_v18  ;;  %v3925_v59 = vadd.f32 %v3924_v62, %v3923_v60  ;;  %v689_v17 = vunpack.c.h.bf16 %v113_v6  ;;  %v1583_v47 = vunpack.c.h.bf16 %v560_v36  ;;  %v1550_v57 = vunpack.c.l.bf16 %v544_v49  ;;  %v497_v6 = vld [vmem:[%s5975_s1 + $0xdf8] sm:$0xff] }
 0x1de   :  { %2603 = vmatprep.subr.mxu0 %v879_v20  ;;  %2674 = vmatprep.subr.mxu1 %v881_v21  ;;  %v3928_v18 = vsel %vm33_vm0, %v3798_v1, 0.0  ;;  %v80_v20 = vld [vmem:[%s5975_s1 + $0xf0] sm:$0xff]  ;;  %v81_v21 = vld [vmem:[%s5975_s1 + $0xf8] sm:$0xff]  ;;  %v1552_v60 = vunpack.c.l.bf16 %v545_v40  ;;  %v1519_v1 = vunpack.c.h.bf16 %v528_v51  ;;  %v1457_v11 = vunpack.c.h.bf16 %v497_v6 }
 0x1df   :  { %2604 = vmatpush1.msra.mxu0 %v878_v22  ;;  %2675 = vmatpush1.msra.mxu1 %v880_v24  ;;  %v3927_v15 = vadd.f32 %v3926_v9, %v3925_v59  ;;  %v655_v24 = vunpack.c.h.bf16 %v96_v14  ;;  %v622_v34 = vunpack.c.l.bf16 %v80_v20  ;;  %v624_v35 = vunpack.c.l.bf16 %v81_v21 }
 0x1e0   :  { %2605 = vmatprep.subr.mxu0 %v847_v28  ;;  %2676 = vmatprep.subr.mxu1 %v849_v30  ;;  %v64_v28 = vld [vmem:[%s5975_s1 + $0x70] sm:$0xff]  ;;  %v65_v30 = vld [vmem:[%s5975_s1 + $0x78] sm:$0xff]  ;;  %v1455_v14 = vunpack.c.h.bf16 %v496_v4 }
 0x1e1   :  { %2606 = vmatpush1.msra.mxu0 %v846_v31  ;;  %2677 = vmatpush1.msra.mxu1 %v848_v32  ;;  %v5720_v22 = vadd.f32 %v3928_v18, %v3927_v15  ;;  %v623_v31 = vunpack.c.h.bf16 %v80_v20  ;;  %v625_v32 = vunpack.c.h.bf16 %v81_v21  ;;  %v593_v44 = vunpack.c.h.bf16 %v65_v30  ;;  %v465_v18 = vld [vmem:[%s5975_s1 + $0xcf8] sm:$0xff] }
 0x1e2   :  { %2607 = vmatprep.subr.mxu0 %v815_v29  ;;  %2678 = vmatprep.subr.mxu1 %v817_v37  ;;  %v561_v29 = vld [vmem:[%s5975_s1 + $0xff8] sm:$0xff]  ;;  %v591_v37 = vunpack.c.h.bf16 %v64_v28  ;;  %v1454_v15 = vunpack.c.l.bf16 %v496_v4 }
 0x1e3   :  { %2608 = vmatpush1.msra.mxu0 %v814_v42  ;;  %2679 = vmatpush1.msra.mxu1 %v816_v39  ;;  %v590_v42 = vunpack.c.l.bf16 %v64_v28  ;;  %v592_v39 = vunpack.c.l.bf16 %v65_v30  ;;  %v1584_v50 = vunpack.c.l.bf16 %v561_v29  ;;  %v1392_v30 = vunpack.c.l.bf16 %v465_v18 }
 0x1e4   :  { %2609 = vmatprep.subr.mxu0 %v783_v48  ;;  %2680 = vmatprep.subr.mxu1 %v785_v23  ;;  %v1585_v48 = vunpack.c.h.bf16 %v561_v29  ;;  %v1582_v23 = vunpack.c.l.bf16 %v560_v36 }
 0x1e5   :  { %2610 = vmatpush1.msra.mxu0 %v782_v52  ;;  %2681 = vmatpush1.msra.mxu1 %v784_v53  ;;  %v529_v52 = vld [vmem:[%s5975_s1 + $0xef8] sm:$0xff]  ;;  %v1551_v53 = vunpack.c.h.bf16 %v544_v49  ;;  %v5791_v49 = vld [vmem:[%s5977_s3 + $0x10] sm:$0xff] }
 0x1e6   :  { %2611 = vmatprep.subr.mxu0 %v751_v61  ;;  %2682 = vmatprep.subr.mxu1 %v753_v63  ;;  %v512_v61 = vld [vmem:[%s5975_s1 + $0xe70] sm:$0xff]  ;;  %v513_v63 = vld [vmem:[%s5975_s1 + $0xe78] sm:$0xff]  ;;  %v1521_v62 = vunpack.c.h.bf16 %v529_v52 }
 0x1e7   :  { %2612 = vmatpush1.msra.mxu0 %v750_v2  ;;  %2683 = vmatpush1.msra.mxu1 %v752_v3  ;;  %v1518_v2 = vunpack.c.l.bf16 %v528_v51  ;;  %v1520_v3 = vunpack.c.l.bf16 %v529_v52  ;;  %v1487_v59 = vunpack.c.h.bf16 %v512_v61  ;;  %v1488_v9 = vunpack.c.l.bf16 %v513_v63 }
 0x1e8   :  { %2613 = vmatprep.subr.mxu0 %v719_v7  ;;  %2684 = vmatprep.subr.mxu1 %v721_v8  ;;  %v1489_v7 = vunpack.c.h.bf16 %v513_v63  ;;  %v1486_v8 = vunpack.c.l.bf16 %v512_v61 }
 0x1e9   :  { %2614 = vmatpush1.msra.mxu0 %v718_v12  ;;  %2685 = vmatpush1.msra.mxu1 %v720_v13  ;;  %v480_v12 = vld [vmem:[%s5975_s1 + $0xd70] sm:$0xff]  ;;  %v481_v13 = vld [vmem:[%s5975_s1 + $0xd78] sm:$0xff] }
 0x1ea   :  { %2615 = vmatprep.subr.mxu0 %v687_v16  ;;  %2686 = vmatprep.subr.mxu1 %v689_v17  ;;  %v1456_v16 = vunpack.c.l.bf16 %v497_v6  ;;  %v464_v17 = vld [vmem:[%s5975_s1 + $0xcf0] sm:$0xff]  ;;  %v1422_v20 = vunpack.c.l.bf16 %v480_v12  ;;  %v1424_v21 = vunpack.c.l.bf16 %v481_v13 }
 0x1eb   :  { %2616 = vmatpush1.msra.mxu0 %v686_v19  ;;  %2687 = vmatpush1.msra.mxu1 %v688_v33  ;;  %v1423_v19 = vunpack.c.h.bf16 %v480_v12  ;;  %v1425_v33 = vunpack.c.h.bf16 %v481_v13  ;;  %v1390_v28 = vunpack.c.l.bf16 %v464_v17  ;;  %v353_v12 = vld [vmem:[%s5975_s1 + $0x978] sm:$0xff] }
 0x1ec   :  { %2617 = vmatprep.subr.mxu0 %v655_v24  ;;  %2688 = vmatprep.subr.mxu1 %v657_v25  ;;  %v448_v24 = vld [vmem:[%s5975_s1 + $0xc70] sm:$0xff]  ;;  %v449_v25 = vld [vmem:[%s5975_s1 + $0xc78] sm:$0xff] }
 0x1ed   :  { %2618 = vmatpush1.msra.mxu0 %v654_v26  ;;  %2689 = vmatpush1.msra.mxu1 %v656_v58  ;;  %v1391_v26 = vunpack.c.h.bf16 %v464_v17  ;;  %v1393_v58 = vunpack.c.h.bf16 %v465_v18  ;;  %v1358_v36 = vunpack.c.l.bf16 %v448_v24  ;;  %v1360_v29 = vunpack.c.l.bf16 %v449_v25 }
 0x1ee   :  { %2619 = vmatprep.subr.mxu0 %v623_v31  ;;  %2690 = vmatprep.subr.mxu1 %v625_v32  ;;  %v432_v31 = vld [vmem:[%s5975_s1 + $0xbf0] sm:$0xff]  ;;  %v433_v32 = vld [vmem:[%s5975_s1 + $0xbf8] sm:$0xff] }
 0x1ef   :  { %2620 = vmatpush1.msra.mxu0 %v622_v34  ;;  %2691 = vmatpush1.msra.mxu1 %v624_v35  ;;  %v1359_v34 = vunpack.c.h.bf16 %v448_v24  ;;  %v1361_v35 = vunpack.c.h.bf16 %v449_v25  ;;  %v1326_v40 = vunpack.c.l.bf16 %v432_v31 }
 0x1f0   :  { %2621 = vmatprep.subr.mxu0 %v591_v37  ;;  %2692 = vmatprep.subr.mxu1 %v593_v44  ;;  %v416_v37 = vld [vmem:[%s5975_s1 + $0xb70] sm:$0xff]  ;;  %v417_v44 = vld [vmem:[%s5975_s1 + $0xb78] sm:$0xff] }
 0x1f1   :  { %2622 = vmatpush1.msra.mxu0 %v590_v42  ;;  %2693 = vmatpush1.msra.mxu1 %v592_v39  ;;  %v1327_v42 = vunpack.c.h.bf16 %v432_v31  ;;  %v1329_v39 = vunpack.c.h.bf16 %v433_v32  ;;  %v1297_v51 = vunpack.c.h.bf16 %v417_v44  ;;  %v1294_v52 = vunpack.c.l.bf16 %v416_v37 }
 0x1f2   :  { %2623 = vmatprep.subr.mxu0 %v1583_v47  ;;  %2694 = vmatprep.subr.mxu1 %v1585_v48  ;;  %v1328_v47 = vunpack.c.l.bf16 %v433_v32  ;;  %v400_v48 = vld [vmem:[%s5975_s1 + $0xaf0] sm:$0xff]  ;;  %v1168_v31 = vunpack.c.l.bf16 %v353_v12 }
 0x1f3   :  { %2624 = vmatpush2.msra.mxu0 %v1582_v23  ;;  %2695 = vmatpush2.msra.mxu1 %v1584_v50  ;;  %v401_v23 = vld [vmem:[%s5975_s1 + $0xaf8] sm:$0xff]  ;;  %v1295_v50 = vunpack.c.h.bf16 %v416_v37  ;;  %v1263_v61 = vunpack.c.h.bf16 %v400_v48  ;;  %v320_v32 = vld [vmem:[%s5975_s1 + $0x870] sm:$0xff] }
 0x1f4   :  { %2625 = vmatprep.subr.mxu0 %v1551_v53  ;;  %2696 = vmatprep.subr.mxu1 %v1553_v56  ;;  %v1296_v53 = vunpack.c.l.bf16 %v417_v44  ;;  %v384_v56 = vld [vmem:[%s5975_s1 + $0xa70] sm:$0xff]  ;;  %v1265_v63 = vunpack.c.h.bf16 %v401_v23 }
 0x1f5   :  { %2626 = vmatpush2.msra.mxu0 %v1550_v57  ;;  %2697 = vmatpush2.msra.mxu1 %v1552_v60  ;;  %v385_v57 = vld [vmem:[%s5975_s1 + $0xa78] sm:$0xff]  ;;  %v3239_v60 = vunpack.c.l.bf16 %v5791_v49  ;;  %v1231_v4 = vunpack.c.h.bf16 %v384_v56 }
 0x1f6   :  { %2627 = vmatprep.subr.mxu0 %v1519_v1  ;;  %2698 = vmatprep.subr.mxu1 %v1521_v62  ;;  %v1262_v1 = vunpack.c.l.bf16 %v400_v48  ;;  %v1264_v62 = vunpack.c.l.bf16 %v401_v23  ;;  %v1233_v6 = vunpack.c.h.bf16 %v385_v57  ;;  %v1103_v48 = vunpack.c.h.bf16 %v320_v32 }
 0x1f7   :  { %2628 = vmatpush2.msra.mxu0 %v1518_v2  ;;  %2699 = vmatpush2.msra.mxu1 %v1520_v3  ;;  %v368_v2 = vld [vmem:[%s5975_s1 + $0x9f0] sm:$0xff]  ;;  %v369_v3 = vld [vmem:[%s5975_s1 + $0x9f8] sm:$0xff]  ;;  %v3318_v13 = vrot.slane %v3239_v60, %v4968_v38  ;;  %v3330_v17 = vrot.slane %v3239_v60, %v4995_v55 }
 0x1f8   :  { %2629 = vmatprep.subr.mxu0 %v1487_v59  ;;  %2700 = vmatprep.subr.mxu1 %v1489_v7  ;;  %v5815_v59 = vld [vmem:[%s5978_s2 + $0x10] sm:$0xff]  ;;  %v1230_v7 = vunpack.c.l.bf16 %v384_v56  ;;  %v1198_v18 = vunpack.c.l.bf16 %v368_v2 }
 0x1f9   :  { %2630 = vmatpush2.msra.mxu0 %v1486_v8  ;;  %2701 = vmatpush2.msra.mxu1 %v1488_v9  ;;  %v1232_v8 = vunpack.c.l.bf16 %v385_v57  ;;  %v352_v9 = vld [vmem:[%s5975_s1 + $0x970] sm:$0xff]  ;;  %v3022_v24 = vrot.slane %v5815_v59, %v4971_v41 }
 0x1fa   :  { %2631 = vmatprep.subr.mxu0 %v1455_v14  ;;  %2702 = vmatprep.subr.mxu1 %v1457_v11  ;;  %v3322_v14 = vrot.slane %v3239_v60, %v4979_v45  ;;  %v1199_v11 = vunpack.c.h.bf16 %v368_v2  ;;  %v1167_v25 = vunpack.c.h.bf16 %v352_v9 }
 0x1fb   :  { %2632 = vmatpush2.msra.mxu0 %v1454_v15  ;;  %2703 = vmatpush2.msra.mxu1 %v1456_v16  ;;  %v1201_v15 = vunpack.c.h.bf16 %v369_v3  ;;  %v3326_v16 = vrot.slane %v3239_v60, %v4992_v54 }
 0x1fc   :  { %2633 = vmatprep.subr.mxu0 %v1423_v19  ;;  %2704 = vmatprep.subr.mxu1 %v1425_v33  ;;  %v1200_v19 = vunpack.c.l.bf16 %v369_v3  ;;  %v336_v33 = vld [vmem:[%s5975_s1 + $0x8f0] sm:$0xff] }
 0x1fd   :  { %2634 = vmatpush2.msra.mxu0 %v1422_v20  ;;  %2705 = vmatpush2.msra.mxu1 %v1424_v21  ;;  %v337_v20 = vld [vmem:[%s5975_s1 + $0x8f8] sm:$0xff]  ;;  %v3018_v21 = vrot.slane %v5815_v59, %v4968_v38  ;;  %v3486_v44 = vrot.slane %v3326_v16, %v4968_v38 }
 0x1fe   :  { %2635 = vmatprep.subr.mxu0 %v1391_v26  ;;  %2706 = vmatprep.subr.mxu1 %v1393_v58  ;;  %v1169_v26 = vunpack.c.h.bf16 %v353_v12  ;;  %v3026_v58 = vrot.slane %v5815_v59, %v4979_v45  ;;  %v1137_v37 = vunpack.c.h.bf16 %v337_v20 }
 0x1ff   :  { %2636 = vmatpush2.msra.mxu0 %v1390_v28  ;;  %2707 = vmatpush2.msra.mxu1 %v1392_v30  ;;  %v3030_v28 = vrot.slane %v5815_v59, %v4982_v46  ;;  %v1166_v30 = vunpack.c.l.bf16 %v352_v9 }
 0x200   :  { %2637 = vmatprep.subr.mxu0 %v1359_v34  ;;  %2708 = vmatprep.subr.mxu1 %v1361_v35  ;;  %v321_v34 = vld [vmem:[%s5975_s1 + $0x878] sm:$0xff]  ;;  %v3478_v35 = vrot.slane %v3318_v13, %v4968_v38 }
 0x201   :  { %2638 = vmatpush2.msra.mxu0 %v1358_v36  ;;  %2709 = vmatpush2.msra.mxu1 %v1360_v29  ;;  %v3482_v36 = vrot.slane %v3322_v14, %v4968_v38  ;;  %v1135_v29 = vunpack.c.h.bf16 %v336_v33  ;;  %v1105_v23 = vunpack.c.h.bf16 %v321_v34  ;;  %v1104_v57 = vunpack.c.l.bf16 %v321_v34 }
 0x202   :  { %2639 = vmatprep.subr.mxu0 %v1327_v42  ;;  %2710 = vmatprep.subr.mxu1 %v1329_v39  ;;  %v3490_v42 = vrot.slane %v3330_v17, %v4968_v38  ;;  %v1134_v39 = vunpack.c.l.bf16 %v336_v33  ;;  %v3038_v34 = vrot.slane %v5815_v59, %v5061_v5 }
 0x203   :  { %2640 = vmatpush2.msra.mxu0 %v1326_v40  ;;  %2711 = vmatpush2.msra.mxu1 %v1328_v47  ;;  %v1136_v40 = vunpack.c.l.bf16 %v337_v20  ;;  %v3147_v47 = vcombine.low %v3018_v21, %v3022_v24  ;;  %v3639_v56 = vcombine.low %v3478_v35, %v3482_v36  ;;  %v3042_v35 = vrot.slane %v5815_v59, %v4995_v55 }
 0x204   :  { %2641 = vmatprep.subr.mxu0 %v1295_v50  ;;  %2712 = vmatprep.subr.mxu1 %v1297_v51  ;;  %v3148_v50 = vcombine.low %v3026_v58, %v3030_v28  ;;  %v1102_v51 = vunpack.c.l.bf16 %v320_v32  ;;  %v3640_v60 = vcombine.low %v3486_v44, %v3490_v42  ;;  %v3240_v58 = vunpack.c.h.bf16 %v5791_v49 }
 0x205   :  { %2642 = vmatpush2.msra.mxu0 %v1294_v52  ;;  %2713 = vmatpush2.msra.mxu1 %v1296_v53  ;;  %v3034_v32 = vrot.slane %v5815_v59, %v4992_v54  ;;  %v3046_v49 = vrot.slane %v5815_v59, %v5067_v10 }
 0x206   :  { %2643 = vmatprep.subr.mxu0 %v1263_v61  ;;  %2714 = vmatprep.subr.mxu1 %v1265_v63  ;;  %v3162_v3 = vrot.slane %v3148_v50, %v4822_v27  ;;  %v3334_v28 = vrot.slane %v3240_v58, %v4968_v38 }
 0x207   :  { %2644 = vmatpush2.msra.mxu0 %v1262_v1  ;;  %2715 = vmatpush2.msra.mxu1 %v1264_v62  ;;  %v3155_v1 = vrot.slane %v3147_v47, %v4822_v27  ;;  %v3164_v42 = vcombine.low %v3034_v32, %v3038_v34 }
 0x208   :  { %2645 = vmatprep.subr.mxu0 %v1231_v4  ;;  %2716 = vmatprep.subr.mxu1 %v1233_v6  ;;  %v3647_v4 = vrot.slane %v3639_v56, %v4822_v27  ;;  %v3494_v36 = vrot.slane %v3334_v28, %v4968_v38 }
 0x209   :  { %2646 = vmatpush2.msra.mxu0 %v1230_v7  ;;  %2717 = vmatpush2.msra.mxu1 %v1232_v8  ;;  %v3654_v8 = vrot.slane %v3640_v60, %v4822_v27  ;;  %v3163_v12 = vcombine.low %v3155_v1, %v3162_v3  ;;  %v3172_v59 = vrot.slane %v3164_v42, %v4822_v27 }
 0x20a   :  { %2647 = vmatprep.subr.mxu0 %v1199_v11  ;;  %2718 = vmatprep.subr.mxu1 %v1201_v15 }
 0x20b   :  { %2648 = vmatpush2.msra.mxu0 %v1198_v18  ;;  %2719 = vmatpush2.msra.mxu1 %v1200_v19  ;;  %v3655_v13 = vcombine.low %v3647_v4, %v3654_v8 }
 0x20c   :  { %2649 = vmatprep.subr.mxu0 %v1167_v25  ;;  %2720 = vmatprep.subr.mxu1 %v1169_v26 }
 0x20d   :  { %2650 = vmatpush2.msra.mxu0 %v1166_v30  ;;  %2721 = vmatpush2.msra.mxu1 %v1168_v31  ;;  %v2231_v52 = vpop.f32.mrf.mxu0  ;;  %v2302_v53 = vpop.f32.mrf.mxu1  ;;  %v3338_v30 = vrot.slane %v3240_v58, %v4979_v45  ;;  %v3342_v31 = vrot.slane %v3240_v58, %v4992_v54 }
 0x20e   :  { %2651 = vmatprep.subr.mxu0 %v1135_v29  ;;  %2722 = vmatprep.subr.mxu1 %v1137_v37 }
 0x20f   :  { %2652 = vmatpush2.msra.mxu0 %v1134_v39  ;;  %2723 = vmatpush2.msra.mxu1 %v1136_v40  ;;  %v2233_v61 = vpop.f32.mrf.mxu0  ;;  %v2304_v63 = vpop.f32.mrf.mxu1  ;;  %v3498_v29 = vrot.slane %v3338_v30, %v4968_v38  ;;  %v3502_v37 = vrot.slane %v3342_v31, %v4968_v38  ;;  %v3165_v39 = vcombine.low %v3042_v35, %v3046_v49 }
 0x210   :  { %2653 = vmatprep.subr.mxu0 %v1103_v48  ;;  %2724 = vmatprep.subr.mxu1 %v1105_v23  ;;  %v2833_v62 = vcombine.low %v2231_v52, %v2233_v61  ;;  %v2834_v2 = vcombine.low %v2302_v53, %v2304_v63  ;;  %v3988_v63 = vmov 0.0  }
 0x211   :  { %2654 = vmatpush2.msra.mxu0 %v1102_v51  ;;  %2655 = vmatprep.mubr.f32.mxu0 %v4218_v0  ;;  %v3656_v48 = vcombine.low %v3494_v36, %v3498_v29  ;;  %v3179_v56 = vrot.slane %v3165_v39, %v4822_v27  ;;  %40 = vst.msk [vmem:[#allocation2 + $0x38] sm:$0xff] %vm5888_vm6, %v3988_v63 }
 0x212   :  { %2725 = vmatpush2.msra.mxu1 %v1104_v57  ;;  %2726 = vmatprep.mubr.f32.mxu1 %v4218_v0  ;;  %v2841_v6 = vrot.slane %v2833_v62, %v4822_v27  ;;  %v2848_v7 = vrot.slane %v2834_v2, %v4822_v27 }
 0x213   :  { %2656 = vmatmul.mubr.f32.vlgmr.msra.gmra.mxu0 %v5635_v43  ;;  %2727 = vmatmul.mubr.f32.vlgmr.msra.gmra.mxu1 %v5635_v43  ;;  %v3664_v1 = vrot.slane %v3656_v48, %v4822_v27  ;;  %v3180_v3 = vcombine.low %v3172_v59, %v3179_v56 }
 0x214   :  { %v2849_v9 = vcombine.low %v2841_v6, %v2848_v7 }
 0x216   :  { %v3227_v14 = vadd.f32 %v3163_v12, %v2849_v9 }
 0x218   :  { %v3719_v11 = vmul.f32 %v3655_v13, %v3227_v14 }
 0x21a   :  { %v3799_v15 = vcombine.high %v3719_v11, %v3719_v11  ;;  %v3806_v16 = vrot.slane %v3719_v11, %v4822_v27 }
 0x21c   :  { %v3813_v0 = vrot.slane %v3799_v15, %v4822_v27  ;;  %v3814_v17 = vcombine.high %v3806_v16, %v3806_v16  ;;  %v3930_v18 = vsel %vm33_vm0, %v3806_v16, 0.0 }
 0x21d   :  { %v3931_v19 = vadd.f32 %v3930_v18, %v5720_v22  ;;  %v3346_v22 = vrot.slane %v3240_v58, %v4995_v55 }
 0x21e   :  { %v3815_v33 = vcombine.high %v3813_v0, %v3813_v0  ;;  %v3932_v20 = vsel %vm33_vm0, %v3814_v17, 0.0  ;;  %v3934_v43 = vsel %vm33_vm0, %v3813_v0, 0.0 }
 0x21f   :  { %v3933_v21 = vadd.f32 %v3932_v20, %v3931_v19  ;;  %v3506_v44 = vrot.slane %v3346_v22, %v4968_v38  ;;  %v10_v20 = vstv %s5979_s4 }
 0x220   :  { %v3936_v25 = vsel %vm33_vm0, %v3815_v33, 0.0  ;;  %11 = vst [vmem:[#allocation3] sm:$0x1] %v10_v20 }
 0x221   :  { %v3935_v24 = vadd.f32 %v3934_v43, %v3933_v21  ;;  %v3657_v23 = vcombine.low %v3502_v37, %v3506_v44  ;;  %v3234_v21 = vld [vmem:[%s5977_s3 + $0x18] sm:$0xff] }
 0x222   :  { %v3241_v43 = vunpack.c.l.bf16 %v3234_v21 }
 0x223   :  { %v3937_v26 = vadd.f32 %v3936_v25, %v3935_v24  ;;  %v3671_v62 = vrot.slane %v3657_v23, %v4822_v27  ;;  %v5913_v24 = vld [vmem:[%s5978_s2 + $0x18] sm:$0xff] }
 0x224   :  { %v3350_v25 = vrot.slane %v3241_v43, %v4968_v38  ;;  %v3358_v58 = vrot.slane %v3241_v43, %v4992_v54  ;;  %v3362_v28 = vrot.slane %v3241_v43, %v4995_v55  ;;  %v3050_v30 = vrot.slane %v5913_v24, %v4968_v38 }
 0x225   :  { %v3672_v4 = vcombine.low %v3664_v1, %v3671_v62  ;;  %v3054_v31 = vrot.slane %v5913_v24, %v4971_v41  ;;  %v3058_v22 = vrot.slane %v5913_v24, %v4979_v45  ;;  %v3062_v32 = vrot.slane %v5913_v24, %v4982_v46 }
 0x226   :  { %v3510_v34 = vrot.slane %v3350_v25, %v4968_v38  ;;  %v3518_v49 = vrot.slane %v3358_v58, %v4968_v38  ;;  %v3522_v36 = vrot.slane %v3362_v28, %v4968_v38  ;;  %v3070_v58 = vrot.slane %v5913_v24, %v5061_v5 }
 0x227   :  { %v3181_v29 = vcombine.low %v3050_v30, %v3054_v31  ;;  %v3182_v37 = vcombine.low %v3058_v22, %v3062_v32  ;;  %v3074_v30 = vrot.slane %v5913_v24, %v4995_v55 }
 0x228   :  { %v3674_v41 = vcombine.low %v3518_v49, %v3522_v36 }
 0x229   :  { %v3189_v46 = vrot.slane %v3181_v29, %v4822_v27 }
 0x24f   :  { %v2373_v40 = vpop.f32.mrf.mxu0  ;;  %v2444_v47 = vpop.f32.mrf.mxu1 }
 0x251   :  { %v2375_v50 = vpop.f32.mrf.mxu0  ;;  %v2446_v51 = vpop.f32.mrf.mxu1 }
 0x252   :  { %v2850_v52 = vcombine.low %v2373_v40, %v2375_v50  ;;  %v2851_v53 = vcombine.low %v2444_v47, %v2446_v51  ;;  %v3196_v50 = vrot.slane %v3182_v37, %v4822_v27 }
 0x254   :  { %v2858_v60 = vrot.slane %v2850_v52, %v4822_v27  ;;  %v2865_v61 = vrot.slane %v2851_v53, %v4822_v27  ;;  %v3688_v53 = vrot.slane %v3674_v41, %v4822_v27 }
 0x256   :  { %v2866_v2 = vcombine.low %v2858_v60, %v2865_v61  ;;  %v3197_v60 = vcombine.low %v3189_v46, %v3196_v50 }
 0x258   :  { %v3228_v6 = vadd.f32 %v3180_v3, %v2866_v2 }
 0x25a   :  { %v3720_v7 = vmul.f32 %v3672_v4, %v3228_v6 }
 0x25c   :  { %v3816_v8 = vcombine.high %v3720_v7, %v3720_v7  ;;  %v3823_v9 = vrot.slane %v3720_v7, %v4822_v27 }
 0x25e   :  { %v3830_v12 = vrot.slane %v3816_v8, %v4822_v27  ;;  %v3831_v13 = vcombine.high %v3823_v9, %v3823_v9  ;;  %v3938_v14 = vsel %vm33_vm0, %v3823_v9, 0.0 }
 0x25f   :  { %v3939_v11 = vadd.f32 %v3938_v14, %v3937_v26  ;;  %v3354_v26 = vrot.slane %v3241_v43, %v4979_v45 }
 0x260   :  { %v3940_v15 = vsel %vm33_vm0, %v3831_v13, 0.0  ;;  %v3832_v16 = vcombine.high %v3830_v12, %v3830_v12  ;;  %v3942_v17 = vsel %vm33_vm0, %v3830_v12, 0.0 }
 0x261   :  { %v3941_v0 = vadd.f32 %v3940_v15, %v3939_v11  ;;  %v3514_v35 = vrot.slane %v3354_v26, %v4968_v38  ;;  %v3066_v26 = vrot.slane %v5913_v24, %v4992_v54 }
 0x262   :  { %v3944_v19 = vsel %vm33_vm0, %v3832_v16, 0.0  ;;  %v3242_v16 = vunpack.c.h.bf16 %v3234_v21 }
 0x263   :  { %v3943_v18 = vadd.f32 %v3942_v17, %v3941_v0  ;;  %v3673_v39 = vcombine.low %v3510_v34, %v3514_v35  ;;  %v48_v35 = vld [vmem:[#allocation2 + $0x38] sm:$0xff]  ;;  %v3198_v36 = vcombine.low %v3066_v26, %v3070_v58 }
 0x264   :  { %v3374_v20 = vrot.slane %v3242_v16, %v4992_v54 }
 0x265   :  { %v3945_v33 = vadd.f32 %v3944_v19, %v3943_v18  ;;  %v3681_v52 = vrot.slane %v3673_v39, %v4822_v27  ;;  %v3366_v18 = vrot.slane %v3242_v16, %v4968_v38  ;;  %v3370_v19 = vrot.slane %v3242_v16, %v4979_v45 }
 0x266   :  { %v3078_v45 = vrot.slane %v5913_v24, %v5067_v10  ;;  %v3534_v54 = vrot.slane %v3374_v20, %v4968_v38  ;;  %v3206_v10 = vrot.slane %v3198_v36, %v4822_v27 }
 0x267   :  { %v3689_v61 = vcombine.low %v3681_v52, %v3688_v53  ;;  %v3526_v31 = vrot.slane %v3366_v18, %v4968_v38  ;;  %v3530_v22 = vrot.slane %v3370_v19, %v4968_v38 }
 0x268   :  { %v3199_v29 = vcombine.low %v3074_v30, %v3078_v45 }
 0x269   :  { %v3690_v37 = vcombine.low %v3526_v31, %v3530_v22 }
 0x26a   :  { %v3213_v24 = vrot.slane %v3199_v29, %v4822_v27 }
 0x26c   :  { %v3214_v41 = vcombine.low %v3206_v10, %v3213_v24 }
 0x291   :  { %v2515_v44 = vpop.f32.mrf.mxu0  ;;  %v2586_v42 = vpop.f32.mrf.mxu1 }
 0x293   :  { %v2517_v40 = vpop.f32.mrf.mxu0  ;;  %v2588_v47 = vpop.f32.mrf.mxu1 }
 0x294   :  { %v2867_v48 = vcombine.low %v2515_v44, %v2517_v40  ;;  %v2868_v23 = vcombine.low %v2586_v42, %v2588_v47  ;;  %v3698_v42 = vrot.slane %v3690_v37, %v4822_v27 }
 0x296   :  { %v2875_v51 = vrot.slane %v2867_v48, %v4822_v27  ;;  %v2882_v59 = vrot.slane %v2868_v23, %v4822_v27 }
 0x298   :  { %v2883_v56 = vcombine.low %v2875_v51, %v2882_v59 }
 0x29a   :  { %v3229_v63 = vadd.f32 %v3197_v60, %v2883_v56 }
 0x29c   :  { %v3721_v1 = vmul.f32 %v3689_v61, %v3229_v63 }
 0x29e   :  { %v3833_v62 = vcombine.high %v3721_v1, %v3721_v1  ;;  %v3840_v2 = vrot.slane %v3721_v1, %v4822_v27 }
 0x2a0   :  { %v3847_v3 = vrot.slane %v3833_v62, %v4822_v27  ;;  %v3848_v4 = vcombine.high %v3840_v2, %v3840_v2  ;;  %v3946_v6 = vsel %vm33_vm0, %v3840_v2, 0.0  ;;  %v3981_v62 = vld [vmem:[#allocation3] ss:$0 sm:$0xff] }
 0x2a1   :  { %v3947_v7 = vadd.f32 %v3946_v6, %v3945_v33  ;;  %v3378_v33 = vrot.slane %v3242_v16, %v4995_v55 }
 0x2a2   :  { %v3849_v8 = vcombine.high %v3847_v3, %v3847_v3  ;;  %v3948_v9 = vsel %vm33_vm0, %v3848_v4, 0.0  ;;  %v3950_v13 = vsel %vm33_vm0, %v3847_v3, 0.0 }
 0x2a3   :  { %v3949_v12 = vadd.f32 %v3948_v9, %v3947_v7  ;;  %v3538_v5 = vrot.slane %v3378_v33, %v4968_v38 }
 0x2a4   :  { %v3952_v11 = vsel %vm33_vm0, %v3849_v8, 0.0 }
 0x2a5   :  { %v3951_v14 = vadd.f32 %v3950_v13, %v3949_v12  ;;  %v3691_v44 = vcombine.low %v3534_v54, %v3538_v5 }
 0x2a7   :  { %v3953_v15 = vadd.f32 %v3952_v11, %v3951_v14  ;;  %v3705_v39 = vrot.slane %v3691_v44, %v4822_v27 }
 0x2a9   :  { %v3706_v38 = vcombine.low %v3698_v42, %v3705_v39 }
 0x2d3   :  { %v2657_v0 = vpop.f32.mrf.mxu0  ;;  %v2728_v17 = vpop.f32.mrf.mxu1 }
 0x2d5   :  { %v2659_v43 = vpop.f32.mrf.mxu0  ;;  %v2730_v25 = vpop.f32.mrf.mxu1 }
 0x2d6   :  { %v2884_v28 = vcombine.low %v2657_v0, %v2659_v43  ;;  %v2885_v21 = vcombine.low %v2728_v17, %v2730_v25 }
 0x2d8   :  { %v2892_v32 = vrot.slane %v2884_v28, %v4822_v27  ;;  %v2899_v34 = vrot.slane %v2885_v21, %v4822_v27 }
 0x2da   :  { %v2900_v49 = vcombine.low %v2892_v32, %v2899_v34 }
 0x2dc   :  { %v2916_v55 = vadd.f32 %v2900_v49, %v48_v35 }
 0x2de   :  { %2931 = vst.msk [vmem:[#allocation2 + $0x38] sm:$0xff] %vm5888_vm6, %v2916_v55 }
 0x2e5   :  { %v2942_v40 = vld [vmem:[#allocation2 + $0x38] sm:$0xff] }
 0x2e6   :  { %v3230_v47 = vadd.f32 %v3214_v41, %v2942_v40 }
 0x2e8   :  { %v3722_v48 = vmul.f32 %v3706_v38, %v3230_v47 }
 0x2ea   :  { %v3850_v23 = vcombine.high %v3722_v48, %v3722_v48  ;;  %v3857_v46 = vrot.slane %v3722_v48, %v4822_v27 }
 0x2ec   :  { %v3864_v50 = vrot.slane %v3850_v23, %v4822_v27  ;;  %v3865_v57 = vcombine.high %v3857_v46, %v3857_v46  ;;  %v3954_v51 = vsel %vm33_vm0, %v3857_v46, 0.0 }
 0x2ed   :  { %v3955_v59 = vadd.f32 %v3954_v51, %v3953_v15 }
 0x2ee   :  { %v3866_v52 = vcombine.high %v3864_v50, %v3864_v50  ;;  %v3956_v53 = vsel %vm33_vm0, %v3865_v57, 0.0  ;;  %v3958_v60 = vsel %vm33_vm0, %v3864_v50, 0.0 }
 0x2ef   :  { %v3957_v56 = vadd.f32 %v3956_v53, %v3955_v59 }
 0x2f0   :  { %v3961_v63 = vsel %vm3960_vm7, %v3866_v52, 0.0 }
 0x2f1   :  { %v3959_v61 = vadd.f32 %v3958_v60, %v3957_v56 }
 0x2f3   :  { %v3962_v1 = vadd.f32 %v3961_v63, %v3959_v61 }
 0x2f5   :  { %3963 = vadd.xlane.f32.xlu0 %v3962_v1 }
 0x37e   :  { %v3964_v2 = vpop.xlane.xlu0 %3963 }
 0x37f   :  { %v3972_v3 = vadd.f32 %v3981_v62, %v3964_v2 }
 0x381   :  { %v3973_v27 = vand.u32 2147483647, %v3972_v3 }
 0x383   :  { %3975 = vst.msk [vmem:[%s5980_s5] sm:$0x3] %vm3974_vm8, %v3973_v27 }

</bundles_post_ra>
